<compile_context>
chip_gen: v7x
topology: tpu7x:2x2x1
jax: 0.10.0
libtpu: 0.0.40
codegen_flags: <defaults>
</compile_context>

<pallas_src>
import numpy as np
import jax
import jax.numpy as jnp
from jax.experimental import pallas as pl
from jax.experimental.pallas import tpu as pltpu  # noqa: F401  (kept for TPU-specific params if needed)

# ----------------------------- configuration ------------------------------
N_NODES = 64
N_DIM = 16            # node attribute dim
HIDDEN_DIM = 32
N_LAYERS = 2
PREDICTOR_DIM = 32
NEG_SLOPE = 0.2
MASK_RATE = 0.5
ALPHA_L = 2
TASKS = ("p_recon", "p_link", "p_ming")
NUM_MASK = int(MASK_RATE * N_NODES)
THRESHOLD = min(10000, N_NODES)        # link-pred sample count (static)


# ---------------------------------------------------------------------------
# The fused forward kernel
#   inputs : A_hat, x, mask_token, int32 index tensors, all model weights
#   outputs: recon_loss, link_loss, ming_loss  (three (1,1) scalars)
# ---------------------------------------------------------------------------
def _gmae_fused_kernel(
    a_ref, x_ref, mask_tok_ref, mask_idx_ref, perm_ref, src_idx_ref, dst_idx_ref,
    w1_ref, b1_ref, w2_ref, b2_ref,            # encoder GCN layers
    we2d_ref,                                  # encoder_to_decoder (bias-free)
    wdec_ref, bdec_ref,                        # decoder GCN layer
    wl1_ref, bl1_ref, wl2_ref, bl2_ref,        # edge_recon_fc
    wdisc_ref,                                 # Discriminator weight
    recon_ref, link_ref, ming_ref,
):
    f32 = jnp.float32
    n, h = N_NODES, HIDDEN_DIM
    a = a_ref[...]
    x = x_ref[...]

    # ---- build x_masked / x_perm / mask_vec in-kernel from index tensors ----
    mask_hits = (jax.lax.broadcasted_iota(jnp.int32, (n, NUM_MASK), 0)
                 == mask_idx_ref[...]).astype(f32)                     # (N, NUM_MASK)
    mask_vec = jnp.max(mask_hits, axis=-1, keepdims=True)              # (N, 1)
    x_masked = x + mask_vec * (mask_tok_ref[...] - x)                  # masked rows -> token

    perm_oh = (jax.lax.broadcasted_iota(jnp.int32, (n, n), 1)
               == perm_ref[...]).astype(f32)                           # P[i, perm[i]] = 1
    x_perm = jnp.dot(perm_oh, x, preferred_element_type=f32)           # x[perm] on the MXU

    # ---- 2-layer GCN encoder, weight matmuls batched over the 3 passes ------
    # layer = relu(A_hat @ (X @ W) + b)   (weight-first association, same math)
    b1 = b1_ref[...]
    b2 = b2_ref[...]
    x_all = jnp.concatenate([x_masked, x, x_perm], axis=0)             # (3N, D) sublane stack
    xw1 = jnp.dot(x_all, w1_ref[...], preferred_element_type=f32)      # (3N, H)
    h1_m = jnp.maximum(jnp.dot(a, xw1[0 * n:1 * n], preferred_element_type=f32) + b1, 0.0)
    h1_o = jnp.maximum(jnp.dot(a, xw1[1 * n:2 * n], preferred_element_type=f32) + b1, 0.0)
    h1_p = jnp.maximum(jnp.dot(a, xw1[2 * n:3 * n], preferred_element_type=f32) + b1, 0.0)

    h1_all = jnp.concatenate([h1_m, h1_o, h1_p], axis=0)               # (3N, H)
    hw2 = jnp.dot(h1_all, w2_ref[...], preferred_element_type=f32)     # (3N, H)
    h2_m = jnp.maximum(jnp.dot(a, hw2[0 * n:1 * n], preferred_element_type=f32) + b2, 0.0)
    h2_o = jnp.maximum(jnp.dot(a, hw2[1 * n:2 * n], preferred_element_type=f32) + b2, 0.0)
    h2_p = jnp.maximum(jnp.dot(a, hw2[2 * n:3 * n], preferred_element_type=f32) + b2, 0.0)

    # ---- p_recon: enc2dec -> decoder GCN -> masked SCE loss -----------------
    we2d = we2d_ref[...]                                               # (2H, H)
    rep = (jnp.dot(h1_m, we2d[:h], preferred_element_type=f32)
           + jnp.dot(h2_m, we2d[h:], preferred_element_type=f32))      # [H1|H2] @ We2d, no concat
    # decoder: f_in(32) > f_out(16) -> contract features first: A @ (rep @ W)
    z = jnp.dot(rep, wdec_ref[...], preferred_element_type=f32)
    recon = jnp.dot(a, z, preferred_element_type=f32) + bdec_ref[...]
    # F.normalize(p=2, dim=-1) semantics (eps=1e-12 on the norm)
    rn = recon * jax.lax.rsqrt(jnp.maximum(jnp.sum(recon * recon, -1, keepdims=True), 1e-24))
    xn = x * jax.lax.rsqrt(jnp.maximum(jnp.sum(x * x, -1, keepdims=True), 1e-24))
    cos = jnp.sum(rn * xn, axis=-1, keepdims=True)                     # (N, 1)
    recon_loss = jnp.sum(((1.0 - cos) ** ALPHA_L) * mask_vec) * (1.0 / NUM_MASK)
    recon_ref[...] = jnp.reshape(recon_loss, (1, 1))

    # ---- p_link: one-hot MXU gathers + split-weight pair MLP + logits BCE ---
    wl1 = wl1_ref[...]                                                 # (4H, H)
    # pair = [src_H1 | src_H2 | dst_H1 | dst_H2] -> fold into per-node projections
    proj_src = (jnp.dot(h1_m, wl1[0 * h:1 * h], preferred_element_type=f32)
                + jnp.dot(h2_m, wl1[1 * h:2 * h], preferred_element_type=f32))
    proj_dst = (jnp.dot(h1_m, wl1[2 * h:3 * h], preferred_element_type=f32)
                + jnp.dot(h2_m, wl1[3 * h:4 * h], preferred_element_type=f32))
    pair_cols = jax.lax.broadcasted_iota(jnp.int32, (2 * THRESHOLD, n), 1)
    g_src = (pair_cols == src_idx_ref[...]).astype(f32)                # (2T, N) one-hot
    g_dst = (pair_cols == dst_idx_ref[...]).astype(f32)
    hh = (jnp.dot(g_src, proj_src, preferred_element_type=f32)
          + jnp.dot(g_dst, proj_dst, preferred_element_type=f32) + bl1_ref[...])
    hh = jnp.where(hh > 0, hh, NEG_SLOPE * hh)                         # LeakyReLU
    zl = jnp.dot(hh, wl2_ref[...], preferred_element_type=f32) + bl2_ref[...]   # (2T, 1)
    y = (jax.lax.broadcasted_iota(jnp.int32, zl.shape, 0) < THRESHOLD).astype(f32)
    # BCELoss(sigmoid(zl), y) computed stably in logits space
    link_loss = jnp.mean(jnp.maximum(zl, 0.0) - zl * y
                         + jnp.log(1.0 + jnp.exp(-jnp.abs(zl))))
    link_ref[...] = jnp.reshape(link_loss, (1, 1))

    # ---- p_ming: summary, shared W@summary, pos/neg discriminator BCEs ------
    s = jax.nn.sigmoid(jnp.mean(h2_o, axis=0, keepdims=True))          # (1, H) summary
    ws = jnp.sum(wdisc_ref[...] * s, axis=1, keepdims=True)            # (H, 1) = W @ summary (once)
    zp = jnp.dot(h2_o, ws, preferred_element_type=f32)                 # (N, 1)
    zn = jnp.dot(h2_p, ws, preferred_element_type=f32)
    # BCE(sigmoid(zp), 1) = softplus(-zp) ; BCE(sigmoid(zn), 0) = softplus(zn)
    l1 = jnp.mean(jnp.maximum(-zp, 0.0) + jnp.log(1.0 + jnp.exp(-jnp.abs(zp))))
    l2 = jnp.mean(jnp.maximum(zn, 0.0) + jnp.log(1.0 + jnp.exp(-jnp.abs(zn))))
    ming_ref[...] = jnp.reshape(l1 + l2, (1, 1))


def pallas_gmae_forward(a_hat, x, mask_token, mask_idx, perm2, src_idx, dst_idx,
                        enc_params, we2d, dec_params, edge_fc, disc_w):
    (w1, b1), (w2, b2) = enc_params
    wdec, bdec = dec_params
    (wl1, bl1), (wl2, bl2) = edge_fc
    scalar = jax.ShapeDtypeStruct((1, 1), jnp.float32)
    recon_l, link_l, ming_l = pl.pallas_call(
        _gmae_fused_kernel,
        out_shape=(scalar, scalar, scalar),
        # no grid, no BlockSpecs: every input is whole-array VMEM-resident (<1 MiB total)
        cost_estimate=pl.CostEstimate(flops=4_600_000, transcendentals=1_024,
                                      bytes_accessed=40_000),
    )(a_hat, x, mask_token, mask_idx, perm2, src_idx, dst_idx,
      w1, b1, w2, b2, we2d, wdec, bdec, wl1, bl1, wl2, bl2, disc_w)
    return recon_l[0, 0], link_l[0, 0], ming_l[0, 0]


# ---------------------------------------------------------------------------
# Parameter init (deterministic)
# ---------------------------------------------------------------------------
def xavier_uniform(key, shape):
    fan_in, fan_out = shape
    bound = float(np.sqrt(6.0 / (fan_in + fan_out)))
    return jax.random.uniform(key, shape, jnp.float32, -bound, bound)


def init_params(key):
    ks = jax.random.split(key, 16)
    params = {}
    # encoder: 2-layer GCN(n_dim -> hidden -> hidden), ReLU (encoding=True)
    # TODO(synk): model/gcn.py not provided; standard GCN without norm/dropout assumed.
    params["enc"] = [
        (xavier_uniform(ks[0], (N_DIM, HIDDEN_DIM)), jnp.zeros((1, HIDDEN_DIM), jnp.float32)),
        (xavier_uniform(ks[1], (HIDDEN_DIM, HIDDEN_DIM)), jnp.zeros((1, HIDDEN_DIM), jnp.float32)),
    ]
    # decoder: single GCN layer hidden -> n_dim, no activation (encoding=False)
    params["dec"] = (xavier_uniform(ks[2], (HIDDEN_DIM, N_DIM)),
                     jnp.zeros((1, N_DIM), jnp.float32))
    params["mask_token"] = jnp.zeros((1, N_DIM), jnp.float32)
    # encoder_to_decoder: Linear(hidden*n_layers -> hidden, bias=False)
    params["enc2dec_W"] = xavier_uniform(ks[3], (HIDDEN_DIM * N_LAYERS, HIDDEN_DIM))
    # edge_recon_fc: Linear(hidden*n_layers*2 -> hidden), LeakyReLU, Linear(hidden -> 1), Sigmoid
    params["edge_fc"] = [
        (xavier_uniform(ks[4], (HIDDEN_DIM * N_LAYERS * 2, HIDDEN_DIM)),
         jnp.zeros((1, HIDDEN_DIM), jnp.float32)),
        (xavier_uniform(ks[5], (HIDDEN_DIM, 1)), jnp.zeros((1, 1), jnp.float32)),
    ]
    # Discriminator weight: uniform(-1/sqrt(H), 1/sqrt(H))
    bound = 1.0 / float(np.sqrt(HIDDEN_DIM))
    params["disc_W"] = jax.random.uniform(ks[6], (HIDDEN_DIM, HIDDEN_DIM),
                                          jnp.float32, -bound, bound)
    # minsg_head + BayesianLossWeighting log_vars: kept for shape fidelity, unused here
    params["minsg"] = [
        (xavier_uniform(ks[7], (HIDDEN_DIM, PREDICTOR_DIM)), jnp.zeros((1, PREDICTOR_DIM), jnp.float32)),
        (xavier_uniform(ks[8], (PREDICTOR_DIM, HIDDEN_DIM)), jnp.zeros((1, HIDDEN_DIM), jnp.float32)),
    ]
    params["log_vars"] = jnp.zeros((len(TASKS),), jnp.float32)
    return params


# ---------------------------------------------------------------------------
# GMAEModel.forward  ==  compute_loss(g)  ->  dict of losses
# (XLA glue = RNG index generation only; all tensor math is in the fused kernel)
# ---------------------------------------------------------------------------
def gmae_forward(params, x, a_hat, edges_src, edges_dst, key):
    k_mask, k_pos, k_nsrc, k_ndst, k_ming = jax.random.split(key, 5)
    num_nodes = x.shape[0]
    num_edges = edges_src.shape[0]

    # --- masking indices (p_recon) + node permutation (p_ming) ---
    perm = jax.random.permutation(k_mask, num_nodes)
    mask_idx = perm[:NUM_MASK].astype(jnp.int32).reshape(1, NUM_MASK)
    perm2 = jax.random.permutation(k_ming, num_nodes).astype(jnp.int32).reshape(num_nodes, 1)
    # TODO(synk): dgl.khop_in_subgraph node sampling for ming replaced by the full graph.

    # --- link-pred sample indices (p_link) ---
    pos_idx = jax.random.choice(k_pos, num_edges, (THRESHOLD,), replace=False)
    # TODO(synk): dgl.global_uniform_negative_sampling rejects existing edges;
    # plain uniform node pairs are used as negatives here.
    neg_src = jax.random.randint(k_nsrc, (THRESHOLD,), 0, num_nodes)
    neg_dst = jax.random.randint(k_ndst, (THRESHOLD,), 0, num_nodes)
    src_idx = jnp.concatenate([edges_src[pos_idx], neg_src]).astype(jnp.int32).reshape(2 * THRESHOLD, 1)
    dst_idx = jnp.concatenate([edges_dst[pos_idx], neg_dst]).astype(jnp.int32).reshape(2 * THRESHOLD, 1)

    recon_l, link_l, ming_l = pallas_gmae_forward(
        a_hat, x, params["mask_token"], mask_idx, perm2, src_idx, dst_idx,
        params["enc"], params["enc2dec_W"], params["dec"], params["edge_fc"],
        params["disc_W"])

    return {"recon_loss": recon_l, "link_loss": link_l, "ming_loss": ming_l}


# ---------------------------------------------------------------------------
# Graph construction (deterministic) + driver
# ---------------------------------------------------------------------------
def build_graph(num_nodes):
    rng = np.random.default_rng(0)
    adj = (rng.random((num_nodes, num_nodes)) < 0.10).astype(np.float32)
    adj = np.maximum(adj, adj.T)
    np.fill_diagonal(adj, 0.0)
    src, dst = np.nonzero(adj)
    adj_loop = adj + np.eye(num_nodes, dtype=np.float32)
    deg = adj_loop.sum(axis=1)
    d_inv_sqrt = 1.0 / np.sqrt(deg)
    a_hat = (d_inv_sqrt[:, None] * adj_loop * d_inv_sqrt[None, :]).astype(np.float32)
    return (jnp.asarray(a_hat),
            jnp.asarray(src, dtype=jnp.int32),
            jnp.asarray(dst, dtype=jnp.int32))


if __name__ == "__main__":
    key = jax.random.PRNGKey(0)
    k_param, k_feat, k_fwd = jax.random.split(key, 3)

    params = init_params(k_param)
    a_hat, edges_src, edges_dst = build_graph(N_NODES)
    assert edges_src.shape[0] >= THRESHOLD
    x = jax.random.normal(k_feat, (N_NODES, N_DIM), dtype=jnp.float32)

    fwd = jax.jit(gmae_forward)
    losses = fwd(params, x, a_hat, edges_src, edges_dst, k_fwd)
    losses = jax.tree_util.tree_map(jax.block_until_ready, losses)

    for name in ("recon_loss", "link_loss", "ming_loss"):
        v = float(losses[name])
        assert np.isfinite(v), f"{name} is not finite: {v}"

    print("KERNEL_OK")
</pallas_src>

<mosaic_0001>
module attributes {stable_mosaic.version = 11 : i64} {
  func.func @_gmae_fused_kernel(%arg0: memref<64x64xf32, #tpu.memory_space<vmem>>, %arg1: memref<64x16xf32, #tpu.memory_space<vmem>>, %arg2: memref<1x16xf32, #tpu.memory_space<vmem>>, %arg3: memref<1x32xi32, #tpu.memory_space<vmem>>, %arg4: memref<64x1xi32, #tpu.memory_space<vmem>>, %arg5: memref<128x1xi32, #tpu.memory_space<vmem>>, %arg6: memref<128x1xi32, #tpu.memory_space<vmem>>, %arg7: memref<16x32xf32, #tpu.memory_space<vmem>>, %arg8: memref<1x32xf32, #tpu.memory_space<vmem>>, %arg9: memref<32x32xf32, #tpu.memory_space<vmem>>, %arg10: memref<1x32xf32, #tpu.memory_space<vmem>>, %arg11: memref<64x32xf32, #tpu.memory_space<vmem>>, %arg12: memref<32x16xf32, #tpu.memory_space<vmem>>, %arg13: memref<1x16xf32, #tpu.memory_space<vmem>>, %arg14: memref<128x32xf32, #tpu.memory_space<vmem>>, %arg15: memref<1x32xf32, #tpu.memory_space<vmem>>, %arg16: memref<32x1xf32, #tpu.memory_space<vmem>>, %arg17: memref<1x1xf32, #tpu.memory_space<vmem>>, %arg18: memref<32x32xf32, #tpu.memory_space<vmem>>, %arg19: memref<1x1xf32, #tpu.memory_space<vmem>>, %arg20: memref<1x1xf32, #tpu.memory_space<vmem>>, %arg21: memref<1x1xf32, #tpu.memory_space<vmem>>) attributes {dimension_semantics = [], scalar_prefetch = 0 : i64, scratch_operands = 0 : i64, tpu.core_type = #tpu.core_type<tc>} {
    %c0 = arith.constant 0 : index
    %c0_0 = arith.constant 0 : index
    %0 = vector.load %arg0[%c0, %c0_0] : memref<64x64xf32, #tpu.memory_space<vmem>>, vector<64x64xf32>
    %c0_1 = arith.constant 0 : index
    %c0_2 = arith.constant 0 : index
    %1 = vector.load %arg1[%c0_1, %c0_2] : memref<64x16xf32, #tpu.memory_space<vmem>>, vector<64x16xf32>
    %2 = tpu.iota {dimensions = array<i32: 0>} : vector<64x32xi32>
    %c0_3 = arith.constant 0 : index
    %c0_4 = arith.constant 0 : index
    %3 = vector.load %arg3[%c0_3, %c0_4] : memref<1x32xi32, #tpu.memory_space<vmem>>, vector<1x32xi32>
    %4 = vector.broadcast %3 : vector<1x32xi32> to vector<64x32xi32>
    %5 = arith.cmpi eq, %2, %4 : vector<64x32xi32>
    %6 = arith.extui %5 : vector<64x32xi1> to vector<64x32xi32>
    %7 = arith.sitofp %6 : vector<64x32xi32> to vector<64x32xf32>
    %cst = arith.constant dense<0xFF800000> : vector<64xf32>
    %8 = vector.multi_reduction <maximumf>, %7, %cst [1] : vector<64x32xf32> to vector<64xf32>
    %9 = vector.shape_cast %8 : vector<64xf32> to vector<64x1xf32>
    %c0_5 = arith.constant 0 : index
    %c0_6 = arith.constant 0 : index
    %10 = vector.load %arg2[%c0_5, %c0_6] : memref<1x16xf32, #tpu.memory_space<vmem>>, vector<1x16xf32>
    %11 = vector.broadcast %10 : vector<1x16xf32> to vector<64x16xf32>
    %12 = arith.subf %11, %1 : vector<64x16xf32>
    %13 = vector.broadcast %9 : vector<64x1xf32> to vector<64x16xf32>
    %14 = arith.mulf %13, %12 : vector<64x16xf32>
    %15 = arith.addf %1, %14 : vector<64x16xf32>
    %16 = tpu.iota {dimensions = array<i32: 1>} : vector<64x64xi32>
    %c0_7 = arith.constant 0 : index
    %c0_8 = arith.constant 0 : index
    %17 = vector.load %arg4[%c0_7, %c0_8] : memref<64x1xi32, #tpu.memory_space<vmem>>, vector<64x1xi32>
    %18 = vector.broadcast %17 : vector<64x1xi32> to vector<64x64xi32>
    %19 = arith.cmpi eq, %16, %18 : vector<64x64xi32>
    %20 = arith.extui %19 : vector<64x64xi1> to vector<64x64xi32>
    %21 = arith.sitofp %20 : vector<64x64xi32> to vector<64x64xf32>
    %cst_9 = arith.constant dense<0.000000e+00> : vector<64x16xf32>
    %22 = tpu.matmul %21, %1, %cst_9 {dimension_numbers = #tpu.dot_dimension_numbers<[1], [0], [0], [1], [0, 0, 1, 1], [], []>} : vector<64x64xf32>, vector<64x16xf32>, vector<64x16xf32> -> vector<64x16xf32>
    %c0_10 = arith.constant 0 : index
    %c0_11 = arith.constant 0 : index
    %23 = vector.load %arg8[%c0_10, %c0_11] : memref<1x32xf32, #tpu.memory_space<vmem>>, vector<1x32xf32>
    %c0_12 = arith.constant 0 : index
    %c0_13 = arith.constant 0 : index
    %24 = vector.load %arg10[%c0_12, %c0_13] : memref<1x32xf32, #tpu.memory_space<vmem>>, vector<1x32xf32>
    %25 = tpu.concatenate %15, %1, %22 in 0 : vector<64x16xf32>, vector<64x16xf32>, vector<64x16xf32> -> vector<192x16xf32>
    %c0_14 = arith.constant 0 : index
    %c0_15 = arith.constant 0 : index
    %26 = vector.load %arg7[%c0_14, %c0_15] : memref<16x32xf32, #tpu.memory_space<vmem>>, vector<16x32xf32>
    %cst_16 = arith.constant dense<0.000000e+00> : vector<192x32xf32>
    %27 = tpu.matmul %25, %26, %cst_16 {dimension_numbers = #tpu.dot_dimension_numbers<[1], [0], [0], [1], [0, 0, 1, 1], [], []>} : vector<192x16xf32>, vector<16x32xf32>, vector<192x32xf32> -> vector<192x32xf32>
    %28 = vector.extract_strided_slice %27 {offsets = [0, 0], sizes = [64, 32], strides = [1, 1]} : vector<192x32xf32> to vector<64x32xf32>
    %cst_17 = arith.constant dense<0.000000e+00> : vector<64x32xf32>
    %29 = tpu.matmul %0, %28, %cst_17 {dimension_numbers = #tpu.dot_dimension_numbers<[1], [0], [0], [1], [0, 0, 1, 1], [], []>} : vector<64x64xf32>, vector<64x32xf32>, vector<64x32xf32> -> vector<64x32xf32>
    %30 = vector.broadcast %23 : vector<1x32xf32> to vector<64x32xf32>
    %31 = arith.addf %29, %30 : vector<64x32xf32>
    %cst_18 = arith.constant 0.000000e+00 : f32
    %32 = vector.broadcast %cst_18 : f32 to vector<64x32xf32>
    %33 = arith.maximumf %31, %32 : vector<64x32xf32>
    %34 = vector.extract_strided_slice %27 {offsets = [64, 0], sizes = [64, 32], strides = [1, 1]} : vector<192x32xf32> to vector<64x32xf32>
    %cst_19 = arith.constant dense<0.000000e+00> : vector<64x32xf32>
    %35 = tpu.matmul %0, %34, %cst_19 {dimension_numbers = #tpu.dot_dimension_numbers<[1], [0], [0], [1], [0, 0, 1, 1], [], []>} : vector<64x64xf32>, vector<64x32xf32>, vector<64x32xf32> -> vector<64x32xf32>
    %36 = vector.broadcast %23 : vector<1x32xf32> to vector<64x32xf32>
    %37 = arith.addf %35, %36 : vector<64x32xf32>
    %cst_20 = arith.constant 0.000000e+00 : f32
    %38 = vector.broadcast %cst_20 : f32 to vector<64x32xf32>
    %39 = arith.maximumf %37, %38 : vector<64x32xf32>
    %40 = vector.extract_strided_slice %27 {offsets = [128, 0], sizes = [64, 32], strides = [1, 1]} : vector<192x32xf32> to vector<64x32xf32>
    %cst_21 = arith.constant dense<0.000000e+00> : vector<64x32xf32>
    %41 = tpu.matmul %0, %40, %cst_21 {dimension_numbers = #tpu.dot_dimension_numbers<[1], [0], [0], [1], [0, 0, 1, 1], [], []>} : vector<64x64xf32>, vector<64x32xf32>, vector<64x32xf32> -> vector<64x32xf32>
    %42 = vector.broadcast %23 : vector<1x32xf32> to vector<64x32xf32>
    %43 = arith.addf %41, %42 : vector<64x32xf32>
    %cst_22 = arith.constant 0.000000e+00 : f32
    %44 = vector.broadcast %cst_22 : f32 to vector<64x32xf32>
    %45 = arith.maximumf %43, %44 : vector<64x32xf32>
    %46 = tpu.concatenate %33, %39, %45 in 0 : vector<64x32xf32>, vector<64x32xf32>, vector<64x32xf32> -> vector<192x32xf32>
    %c0_23 = arith.constant 0 : index
    %c0_24 = arith.constant 0 : index
    %47 = vector.load %arg9[%c0_23, %c0_24] : memref<32x32xf32, #tpu.memory_space<vmem>>, vector<32x32xf32>
    %cst_25 = arith.constant dense<0.000000e+00> : vector<192x32xf32>
    %48 = tpu.matmul %46, %47, %cst_25 {dimension_numbers = #tpu.dot_dimension_numbers<[1], [0], [0], [1], [0, 0, 1, 1], [], []>} : vector<192x32xf32>, vector<32x32xf32>, vector<192x32xf32> -> vector<192x32xf32>
    %49 = vector.extract_strided_slice %48 {offsets = [0, 0], sizes = [64, 32], strides = [1, 1]} : vector<192x32xf32> to vector<64x32xf32>
    %cst_26 = arith.constant dense<0.000000e+00> : vector<64x32xf32>
    %50 = tpu.matmul %0, %49, %cst_26 {dimension_numbers = #tpu.dot_dimension_numbers<[1], [0], [0], [1], [0, 0, 1, 1], [], []>} : vector<64x64xf32>, vector<64x32xf32>, vector<64x32xf32> -> vector<64x32xf32>
    %51 = vector.broadcast %24 : vector<1x32xf32> to vector<64x32xf32>
    %52 = arith.addf %50, %51 : vector<64x32xf32>
    %cst_27 = arith.constant 0.000000e+00 : f32
    %53 = vector.broadcast %cst_27 : f32 to vector<64x32xf32>
    %54 = arith.maximumf %52, %53 : vector<64x32xf32>
    %55 = vector.extract_strided_slice %48 {offsets = [64, 0], sizes = [64, 32], strides = [1, 1]} : vector<192x32xf32> to vector<64x32xf32>
    %cst_28 = arith.constant dense<0.000000e+00> : vector<64x32xf32>
    %56 = tpu.matmul %0, %55, %cst_28 {dimension_numbers = #tpu.dot_dimension_numbers<[1], [0], [0], [1], [0, 0, 1, 1], [], []>} : vector<64x64xf32>, vector<64x32xf32>, vector<64x32xf32> -> vector<64x32xf32>
    %57 = vector.broadcast %24 : vector<1x32xf32> to vector<64x32xf32>
    %58 = arith.addf %56, %57 : vector<64x32xf32>
    %cst_29 = arith.constant 0.000000e+00 : f32
    %59 = vector.broadcast %cst_29 : f32 to vector<64x32xf32>
    %60 = arith.maximumf %58, %59 : vector<64x32xf32>
    %61 = vector.extract_strided_slice %48 {offsets = [128, 0], sizes = [64, 32], strides = [1, 1]} : vector<192x32xf32> to vector<64x32xf32>
    %cst_30 = arith.constant dense<0.000000e+00> : vector<64x32xf32>
    %62 = tpu.matmul %0, %61, %cst_30 {dimension_numbers = #tpu.dot_dimension_numbers<[1], [0], [0], [1], [0, 0, 1, 1], [], []>} : vector<64x64xf32>, vector<64x32xf32>, vector<64x32xf32> -> vector<64x32xf32>
    %63 = vector.broadcast %24 : vector<1x32xf32> to vector<64x32xf32>
    %64 = arith.addf %62, %63 : vector<64x32xf32>
    %cst_31 = arith.constant 0.000000e+00 : f32
    %65 = vector.broadcast %cst_31 : f32 to vector<64x32xf32>
    %66 = arith.maximumf %64, %65 : vector<64x32xf32>
    %c0_32 = arith.constant 0 : index
    %c0_33 = arith.constant 0 : index
    %67 = vector.load %arg11[%c0_32, %c0_33] : memref<64x32xf32, #tpu.memory_space<vmem>>, vector<64x32xf32>
    %68 = vector.extract_strided_slice %67 {offsets = [0, 0], sizes = [32, 32], strides = [1, 1]} : vector<64x32xf32> to vector<32x32xf32>
    %cst_34 = arith.constant dense<0.000000e+00> : vector<64x32xf32>
    %69 = tpu.matmul %33, %68, %cst_34 {dimension_numbers = #tpu.dot_dimension_numbers<[1], [0], [0], [1], [0, 0, 1, 1], [], []>} : vector<64x32xf32>, vector<32x32xf32>, vector<64x32xf32> -> vector<64x32xf32>
    %70 = vector.extract_strided_slice %67 {offsets = [32, 0], sizes = [32, 32], strides = [1, 1]} : vector<64x32xf32> to vector<32x32xf32>
    %cst_35 = arith.constant dense<0.000000e+00> : vector<64x32xf32>
    %71 = tpu.matmul %54, %70, %cst_35 {dimension_numbers = #tpu.dot_dimension_numbers<[1], [0], [0], [1], [0, 0, 1, 1], [], []>} : vector<64x32xf32>, vector<32x32xf32>, vector<64x32xf32> -> vector<64x32xf32>
    %72 = arith.addf %69, %71 : vector<64x32xf32>
    %c0_36 = arith.constant 0 : index
    %c0_37 = arith.constant 0 : index
    %73 = vector.load %arg12[%c0_36, %c0_37] : memref<32x16xf32, #tpu.memory_space<vmem>>, vector<32x16xf32>
    %cst_38 = arith.constant dense<0.000000e+00> : vector<64x16xf32>
    %74 = tpu.matmul %72, %73, %cst_38 {dimension_numbers = #tpu.dot_dimension_numbers<[1], [0], [0], [1], [0, 0, 1, 1], [], []>} : vector<64x32xf32>, vector<32x16xf32>, vector<64x16xf32> -> vector<64x16xf32>
    %cst_39 = arith.constant dense<0.000000e+00> : vector<64x16xf32>
    %75 = tpu.matmul %0, %74, %cst_39 {dimension_numbers = #tpu.dot_dimension_numbers<[1], [0], [0], [1], [0, 0, 1, 1], [], []>} : vector<64x64xf32>, vector<64x16xf32>, vector<64x16xf32> -> vector<64x16xf32>
    %c0_40 = arith.constant 0 : index
    %c0_41 = arith.constant 0 : index
    %76 = vector.load %arg13[%c0_40, %c0_41] : memref<1x16xf32, #tpu.memory_space<vmem>>, vector<1x16xf32>
    %77 = vector.broadcast %76 : vector<1x16xf32> to vector<64x16xf32>
    %78 = arith.addf %75, %77 : vector<64x16xf32>
    %79 = arith.mulf %78, %78 : vector<64x16xf32>
    %cst_42 = arith.constant dense<0.000000e+00> : vector<64xf32>
    %80 = vector.multi_reduction <add>, %79, %cst_42 [1] : vector<64x16xf32> to vector<64xf32>
    %81 = vector.shape_cast %80 : vector<64xf32> to vector<64x1xf32>
    %cst_43 = arith.constant 1.000000e-24 : f32
    %82 = vector.broadcast %cst_43 : f32 to vector<64x1xf32>
    %83 = arith.maximumf %81, %82 : vector<64x1xf32>
    %84 = math.rsqrt %83 : vector<64x1xf32>
    %85 = vector.broadcast %84 : vector<64x1xf32> to vector<64x16xf32>
    %86 = arith.mulf %78, %85 : vector<64x16xf32>
    %87 = arith.mulf %1, %1 : vector<64x16xf32>
    %cst_44 = arith.constant dense<0.000000e+00> : vector<64xf32>
    %88 = vector.multi_reduction <add>, %87, %cst_44 [1] : vector<64x16xf32> to vector<64xf32>
    %89 = vector.shape_cast %88 : vector<64xf32> to vector<64x1xf32>
    %cst_45 = arith.constant 1.000000e-24 : f32
    %90 = vector.broadcast %cst_45 : f32 to vector<64x1xf32>
    %91 = arith.maximumf %89, %90 : vector<64x1xf32>
    %92 = math.rsqrt %91 : vector<64x1xf32>
    %93 = vector.broadcast %92 : vector<64x1xf32> to vector<64x16xf32>
    %94 = arith.mulf %1, %93 : vector<64x16xf32>
    %95 = arith.mulf %86, %94 : vector<64x16xf32>
    %cst_46 = arith.constant dense<0.000000e+00> : vector<64xf32>
    %96 = vector.multi_reduction <add>, %95, %cst_46 [1] : vector<64x16xf32> to vector<64xf32>
    %97 = vector.shape_cast %96 : vector<64xf32> to vector<64x1xf32>
    %cst_47 = arith.constant 1.000000e+00 : f32
    %98 = vector.broadcast %cst_47 : f32 to vector<64x1xf32>
    %99 = arith.subf %98, %97 : vector<64x1xf32>
    %100 = arith.mulf %99, %99 : vector<64x1xf32>
    %101 = arith.mulf %100, %9 : vector<64x1xf32>
    %102 = vector.shape_cast %101 : vector<64x1xf32> to vector<1x64x1xf32>
    %cst_48 = arith.constant dense<0.000000e+00> : vector<1xf32>
    %103 = vector.multi_reduction <add>, %102, %cst_48 [1, 2] : vector<1x64x1xf32> to vector<1xf32>
    %104 = vector.shape_cast %103 : vector<1xf32> to vector<1x1x1xf32>
    %105 = vector.extract %104[0, 0, 0] : f32 from vector<1x1x1xf32>
    %cst_49 = arith.constant 3.125000e-02 : f32
    %106 = arith.mulf %105, %cst_49 : f32
    %107 = vector.broadcast %106 : f32 to vector<1x1xf32>
    %c0_50 = arith.constant 0 : index
    %c0_51 = arith.constant 0 : index
    %108 = vector.load %arg19[%c0_50, %c0_51] : memref<1x1xf32, #tpu.memory_space<vmem>>, vector<1x1xf32>
    tpu.vector_store %arg19[%c0_50, %c0_51], %107 {strides = array<i32>} : memref<1x1xf32, #tpu.memory_space<vmem>>, vector<1x1xf32>,
    %c0_52 = arith.constant 0 : index
    %c0_53 = arith.constant 0 : index
    %109 = vector.load %arg14[%c0_52, %c0_53] : memref<128x32xf32, #tpu.memory_space<vmem>>, vector<128x32xf32>
    %110 = vector.extract_strided_slice %109 {offsets = [0, 0], sizes = [32, 32], strides = [1, 1]} : vector<128x32xf32> to vector<32x32xf32>
    %cst_54 = arith.constant dense<0.000000e+00> : vector<64x32xf32>
    %111 = tpu.matmul %33, %110, %cst_54 {dimension_numbers = #tpu.dot_dimension_numbers<[1], [0], [0], [1], [0, 0, 1, 1], [], []>} : vector<64x32xf32>, vector<32x32xf32>, vector<64x32xf32> -> vector<64x32xf32>
    %112 = vector.extract_strided_slice %109 {offsets = [32, 0], sizes = [32, 32], strides = [1, 1]} : vector<128x32xf32> to vector<32x32xf32>
    %cst_55 = arith.constant dense<0.000000e+00> : vector<64x32xf32>
    %113 = tpu.matmul %54, %112, %cst_55 {dimension_numbers = #tpu.dot_dimension_numbers<[1], [0], [0], [1], [0, 0, 1, 1], [], []>} : vector<64x32xf32>, vector<32x32xf32>, vector<64x32xf32> -> vector<64x32xf32>
    %114 = arith.addf %111, %113 : vector<64x32xf32>
    %115 = vector.extract_strided_slice %109 {offsets = [64, 0], sizes = [32, 32], strides = [1, 1]} : vector<128x32xf32> to vector<32x32xf32>
    %cst_56 = arith.constant dense<0.000000e+00> : vector<64x32xf32>
    %116 = tpu.matmul %33, %115, %cst_56 {dimension_numbers = #tpu.dot_dimension_numbers<[1], [0], [0], [1], [0, 0, 1, 1], [], []>} : vector<64x32xf32>, vector<32x32xf32>, vector<64x32xf32> -> vector<64x32xf32>
    %117 = vector.extract_strided_slice %109 {offsets = [96, 0], sizes = [32, 32], strides = [1, 1]} : vector<128x32xf32> to vector<32x32xf32>
    %cst_57 = arith.constant dense<0.000000e+00> : vector<64x32xf32>
    %118 = tpu.matmul %54, %117, %cst_57 {dimension_numbers = #tpu.dot_dimension_numbers<[1], [0], [0], [1], [0, 0, 1, 1], [], []>} : vector<64x32xf32>, vector<32x32xf32>, vector<64x32xf32> -> vector<64x32xf32>
    %119 = arith.addf %116, %118 : vector<64x32xf32>
    %120 = tpu.iota {dimensions = array<i32: 1>} : vector<128x64xi32>
    %c0_58 = arith.constant 0 : index
    %c0_59 = arith.constant 0 : index
    %121 = vector.load %arg5[%c0_58, %c0_59] : memref<128x1xi32, #tpu.memory_space<vmem>>, vector<128x1xi32>
    %122 = vector.broadcast %121 : vector<128x1xi32> to vector<128x64xi32>
    %123 = arith.cmpi eq, %120, %122 : vector<128x64xi32>
    %124 = arith.extui %123 : vector<128x64xi1> to vector<128x64xi32>
    %125 = arith.sitofp %124 : vector<128x64xi32> to vector<128x64xf32>
    %c0_60 = arith.constant 0 : index
    %c0_61 = arith.constant 0 : index
    %126 = vector.load %arg6[%c0_60, %c0_61] : memref<128x1xi32, #tpu.memory_space<vmem>>, vector<128x1xi32>
    %127 = vector.broadcast %126 : vector<128x1xi32> to vector<128x64xi32>
    %128 = arith.cmpi eq, %120, %127 : vector<128x64xi32>
    %129 = arith.extui %128 : vector<128x64xi1> to vector<128x64xi32>
    %130 = arith.sitofp %129 : vector<128x64xi32> to vector<128x64xf32>
    %cst_62 = arith.constant dense<0.000000e+00> : vector<128x32xf32>
    %131 = tpu.matmul %125, %114, %cst_62 {dimension_numbers = #tpu.dot_dimension_numbers<[1], [0], [0], [1], [0, 0, 1, 1], [], []>} : vector<128x64xf32>, vector<64x32xf32>, vector<128x32xf32> -> vector<128x32xf32>
    %cst_63 = arith.constant dense<0.000000e+00> : vector<128x32xf32>
    %132 = tpu.matmul %130, %119, %cst_63 {dimension_numbers = #tpu.dot_dimension_numbers<[1], [0], [0], [1], [0, 0, 1, 1], [], []>} : vector<128x64xf32>, vector<64x32xf32>, vector<128x32xf32> -> vector<128x32xf32>
    %133 = arith.addf %131, %132 : vector<128x32xf32>
    %c0_64 = arith.constant 0 : index
    %c0_65 = arith.constant 0 : index
    %134 = vector.load %arg15[%c0_64, %c0_65] : memref<1x32xf32, #tpu.memory_space<vmem>>, vector<1x32xf32>
    %135 = vector.broadcast %134 : vector<1x32xf32> to vector<128x32xf32>
    %136 = arith.addf %133, %135 : vector<128x32xf32>
    %cst_66 = arith.constant 0.000000e+00 : f32
    %137 = vector.broadcast %cst_66 : f32 to vector<128x32xf32>
    %138 = arith.cmpf ogt, %136, %137 : vector<128x32xf32>
    %cst_67 = arith.constant 2.000000e-01 : f32
    %139 = vector.broadcast %cst_67 : f32 to vector<128x32xf32>
    %140 = arith.mulf %139, %136 : vector<128x32xf32>
    %141 = arith.select %138, %136, %140 : vector<128x32xi1>, vector<128x32xf32>
    %c0_68 = arith.constant 0 : index
    %c0_69 = arith.constant 0 : index
    %142 = vector.load %arg16[%c0_68, %c0_69] : memref<32x1xf32, #tpu.memory_space<vmem>>, vector<32x1xf32>
    %cst_70 = arith.constant dense<0.000000e+00> : vector<128x1xf32>
    %143 = tpu.matmul %141, %142, %cst_70 {dimension_numbers = #tpu.dot_dimension_numbers<[1], [0], [0], [1], [0, 0, 1, 1], [], []>} : vector<128x32xf32>, vector<32x1xf32>, vector<128x1xf32> -> vector<128x1xf32>
    %c0_71 = arith.constant 0 : index
    %c0_72 = arith.constant 0 : index
    %144 = vector.load %arg17[%c0_71, %c0_72] : memref<1x1xf32, #tpu.memory_space<vmem>>, vector<1x1xf32>
    %145 = vector.broadcast %144 : vector<1x1xf32> to vector<128x1xf32>
    %146 = arith.addf %143, %145 : vector<128x1xf32>
    %147 = tpu.iota {dimensions = array<i32: 0>} : vector<128x1xi32>
    %c64_i32 = arith.constant 64 : i32
    %148 = vector.broadcast %c64_i32 : i32 to vector<128x1xi32>
    %149 = arith.cmpi slt, %147, %148 : vector<128x1xi32>
    %150 = arith.extui %149 : vector<128x1xi1> to vector<128x1xi32>
    %151 = arith.sitofp %150 : vector<128x1xi32> to vector<128x1xf32>
    %cst_73 = arith.constant 0.000000e+00 : f32
    %152 = vector.broadcast %cst_73 : f32 to vector<128x1xf32>
    %153 = arith.maximumf %146, %152 : vector<128x1xf32>
    %154 = arith.mulf %146, %151 : vector<128x1xf32>
    %155 = arith.subf %153, %154 : vector<128x1xf32>
    %156 = math.absf %146 : vector<128x1xf32>
    %cst_74 = arith.constant 0.000000e+00 : f32
    %157 = vector.broadcast %cst_74 : f32 to vector<128x1xf32>
    %158 = arith.subf %157, %156 : vector<128x1xf32>
    %159 = math.exp %158 : vector<128x1xf32>
    %cst_75 = arith.constant 1.000000e+00 : f32
    %160 = vector.broadcast %cst_75 : f32 to vector<128x1xf32>
    %161 = arith.addf %160, %159 : vector<128x1xf32>
    %162 = math.log %161 : vector<128x1xf32>
    %163 = arith.addf %155, %162 : vector<128x1xf32>
    %164 = vector.shape_cast %163 : vector<128x1xf32> to vector<1x128x1xf32>
    %cst_76 = arith.constant dense<0.000000e+00> : vector<1xf32>
    %165 = vector.multi_reduction <add>, %164, %cst_76 [1, 2] : vector<1x128x1xf32> to vector<1xf32>
    %166 = vector.shape_cast %165 : vector<1xf32> to vector<1x1x1xf32>
    %167 = vector.extract %166[0, 0, 0] : f32 from vector<1x1x1xf32>
    %cst_77 = arith.constant 1.280000e+02 : f32
    %168 = arith.divf %167, %cst_77 : f32
    %169 = vector.broadcast %168 : f32 to vector<1x1xf32>
    %c0_78 = arith.constant 0 : index
    %c0_79 = arith.constant 0 : index
    %170 = vector.load %arg20[%c0_78, %c0_79] : memref<1x1xf32, #tpu.memory_space<vmem>>, vector<1x1xf32>
    tpu.vector_store %arg20[%c0_78, %c0_79], %169 {strides = array<i32>} : memref<1x1xf32, #tpu.memory_space<vmem>>, vector<1x1xf32>,
    %cst_80 = arith.constant dense<0.000000e+00> : vector<32xf32>
    %171 = vector.multi_reduction <add>, %60, %cst_80 [0] : vector<64x32xf32> to vector<32xf32>
    %172 = vector.shape_cast %171 : vector<32xf32> to vector<1x32xf32>
    %cst_81 = arith.constant 6.400000e+01 : f32
    %173 = vector.broadcast %cst_81 : f32 to vector<1x32xf32>
    %174 = arith.divf %172, %173 : vector<1x32xf32>
    %175 = arith.negf %174 : vector<1x32xf32>
    %176 = math.exp %175 : vector<1x32xf32>
    %cst_82 = arith.constant 1.000000e+00 : f32
    %177 = vector.broadcast %cst_82 : f32 to vector<1x32xf32>
    %178 = arith.addf %177, %176 : vector<1x32xf32>
    %179 = arith.divf %177, %178 : vector<1x32xf32>
    %c0_83 = arith.constant 0 : index
    %c0_84 = arith.constant 0 : index
    %180 = vector.load %arg18[%c0_83, %c0_84] : memref<32x32xf32, #tpu.memory_space<vmem>>, vector<32x32xf32>
    %181 = vector.broadcast %179 : vector<1x32xf32> to vector<32x32xf32>
    %182 = arith.mulf %180, %181 : vector<32x32xf32>
    %cst_85 = arith.constant dense<0.000000e+00> : vector<32xf32>
    %183 = vector.multi_reduction <add>, %182, %cst_85 [1] : vector<32x32xf32> to vector<32xf32>
    %184 = vector.shape_cast %183 : vector<32xf32> to vector<32x1xf32>
    %cst_86 = arith.constant dense<0.000000e+00> : vector<64x1xf32>
    %185 = tpu.matmul %60, %184, %cst_86 {dimension_numbers = #tpu.dot_dimension_numbers<[1], [0], [0], [1], [0, 0, 1, 1], [], []>} : vector<64x32xf32>, vector<32x1xf32>, vector<64x1xf32> -> vector<64x1xf32>
    %cst_87 = arith.constant dense<0.000000e+00> : vector<64x1xf32>
    %186 = tpu.matmul %66, %184, %cst_87 {dimension_numbers = #tpu.dot_dimension_numbers<[1], [0], [0], [1], [0, 0, 1, 1], [], []>} : vector<64x32xf32>, vector<32x1xf32>, vector<64x1xf32> -> vector<64x1xf32>
    %cst_88 = arith.constant 0.000000e+00 : f32
    %187 = vector.broadcast %cst_88 : f32 to vector<64x1xf32>
    %188 = arith.subf %187, %185 : vector<64x1xf32>
    %cst_89 = arith.constant 0.000000e+00 : f32
    %189 = vector.broadcast %cst_89 : f32 to vector<64x1xf32>
    %190 = arith.maximumf %188, %189 : vector<64x1xf32>
    %191 = math.absf %185 : vector<64x1xf32>
    %cst_90 = arith.constant 0.000000e+00 : f32
    %192 = vector.broadcast %cst_90 : f32 to vector<64x1xf32>
    %193 = arith.subf %192, %191 : vector<64x1xf32>
    %194 = math.exp %193 : vector<64x1xf32>
    %cst_91 = arith.constant 1.000000e+00 : f32
    %195 = vector.broadcast %cst_91 : f32 to vector<64x1xf32>
    %196 = arith.addf %195, %194 : vector<64x1xf32>
    %197 = math.log %196 : vector<64x1xf32>
    %198 = arith.addf %190, %197 : vector<64x1xf32>
    %199 = vector.shape_cast %198 : vector<64x1xf32> to vector<1x64x1xf32>
    %cst_92 = arith.constant dense<0.000000e+00> : vector<1xf32>
    %200 = vector.multi_reduction <add>, %199, %cst_92 [1, 2] : vector<1x64x1xf32> to vector<1xf32>
    %201 = vector.shape_cast %200 : vector<1xf32> to vector<1x1x1xf32>
    %202 = vector.extract %201[0, 0, 0] : f32 from vector<1x1x1xf32>
    %cst_93 = arith.constant 6.400000e+01 : f32
    %203 = arith.divf %202, %cst_93 : f32
    %cst_94 = arith.constant 0.000000e+00 : f32
    %204 = vector.broadcast %cst_94 : f32 to vector<64x1xf32>
    %205 = arith.maximumf %186, %204 : vector<64x1xf32>
    %206 = math.absf %186 : vector<64x1xf32>
    %cst_95 = arith.constant 0.000000e+00 : f32
    %207 = vector.broadcast %cst_95 : f32 to vector<64x1xf32>
    %208 = arith.subf %207, %206 : vector<64x1xf32>
    %209 = math.exp %208 : vector<64x1xf32>
    %cst_96 = arith.constant 1.000000e+00 : f32
    %210 = vector.broadcast %cst_96 : f32 to vector<64x1xf32>
    %211 = arith.addf %210, %209 : vector<64x1xf32>
    %212 = math.log %211 : vector<64x1xf32>
    %213 = arith.addf %205, %212 : vector<64x1xf32>
    %214 = vector.shape_cast %213 : vector<64x1xf32> to vector<1x64x1xf32>
    %cst_97 = arith.constant dense<0.000000e+00> : vector<1xf32>
    %215 = vector.multi_reduction <add>, %214, %cst_97 [1, 2] : vector<1x64x1xf32> to vector<1xf32>
    %216 = vector.shape_cast %215 : vector<1xf32> to vector<1x1x1xf32>
    %217 = vector.extract %216[0, 0, 0] : f32 from vector<1x1x1xf32>
    %cst_98 = arith.constant 6.400000e+01 : f32
    %218 = arith.divf %217, %cst_98 : f32
    %219 = arith.addf %203, %218 : f32
    %220 = vector.broadcast %219 : f32 to vector<1x1xf32>
    %c0_99 = arith.constant 0 : index
    %c0_100 = arith.constant 0 : index
    %221 = vector.load %arg21[%c0_99, %c0_100] : memref<1x1xf32, #tpu.memory_space<vmem>>, vector<1x1xf32>
    tpu.vector_store %arg21[%c0_99, %c0_100], %220 {strides = array<i32>} : memref<1x1xf32, #tpu.memory_space<vmem>>, vector<1x1xf32>,
    return
  }
}

</mosaic_0001>

<bundles_post_ra>
// kernel: gmae_forward.3
= control target key start
LH: loop header
LB: loop body
LE: loop exit
PB: predicated region body
PF: predicated region fallthrough
CT: control target
= control target key end

     0   :  { %s7987_s0 = inlined_call_operand.vmem [shape: f32[64,64], index: 0, kind: input, shape index: {}]   ;;  %s7988_s1 = inlined_call_operand.vmem [shape: f32[64,16], index: 1, kind: input, shape index: {}]   ;;  %s7989_s2 = inlined_call_operand.vmem [shape: f32[1,16], index: 2, kind: input, shape index: {}]   ;;  %s7990_s3 = inlined_call_operand.vmem [shape: s32[1,32], index: 3, kind: input, shape index: {}]   ;;  %s7991_s4 = inlined_call_operand.vmem [shape: s32[64,1], index: 4, kind: input, shape index: {}]   ;;  %s7992_s5 = inlined_call_operand.vmem [shape: s32[128,1], index: 5, kind: input, shape index: {}]   ;;  %s7993_s6 = inlined_call_operand.vmem [shape: s32[128,1], index: 6, kind: input, shape index: {}]   ;;  %s7994_s7 = inlined_call_operand.vmem [shape: f32[16,32], index: 7, kind: input, shape index: {}]   ;;  %s7995_s8 = inlined_call_operand.vmem [shape: f32[1,32], index: 8, kind: input, shape index: {}]   ;;  %s7996_s9 = inlined_call_operand.vmem [shape: f32[32,32], index: 9, kind: input, shape index: {}]   ;;  %s7997_s10 = inlined_call_operand.vmem [shape: f32[1,32], index: 10, kind: input, shape index: {}]   ;;  %s7998_s11 = inlined_call_operand.vmem [shape: f32[64,32], index: 11, kind: input, shape index: {}]   ;;  %s7999_s12 = inlined_call_operand.vmem [shape: f32[32,16], index: 12, kind: input, shape index: {}]   ;;  %s8000_s13 = inlined_call_operand.vmem [shape: f32[1,16], index: 13, kind: input, shape index: {}]   ;;  %s8001_s14 = inlined_call_operand.vmem [shape: f32[128,32], index: 14, kind: input, shape index: {}]   ;;  %s8002_s15 = inlined_call_operand.vmem [shape: f32[1,32], index: 15, kind: input, shape index: {}]   ;;  %s8003_s16 = inlined_call_operand.vmem [shape: f32[32,1], index: 16, kind: input, shape index: {}]   ;;  %s8004_s17 = inlined_call_operand.<no memory space> [shape: f32[1,1], index: 17, kind: input, shape index: {}]   ;;  %s8005_s18 = inlined_call_operand.vmem [shape: f32[32,32], index: 18, kind: input, shape index: {}]   ;;  %s8006_s19 = inlined_call_operand.hbm [shape: f32[1,1], index: 19, kind: output, shape index: {0}]   ;;  %s8007_s20 = inlined_call_operand.hbm [shape: f32[1,1], index: 20, kind: output, shape index: {1}]   ;;  %s8008_s21 = inlined_call_operand.hbm [shape: f32[1,1], index: 21, kind: output, shape index: {2}]  }
   0x1   :  { %8043 = sst [smem:[#allocation37_spill]] %s7987_s0  ;;  %v27_v0 = vstv %s8004_s17 }
   0x2   :  { %8044 = sst [smem:[#allocation38_spill]] %s7988_s1  ;;  %28 = vst [vmem:[#allocation2] sm:$0x1] %v27_v0 }
   0x3   :  { %8045 = sst [smem:[#allocation39_spill]] %s7989_s2 }
   0x4   :  { %8046 = sst [smem:[#allocation40_spill]] %s7990_s3 }
   0x5   :  { %8047 = sst [smem:[#allocation41_spill]] %s7991_s4 }
   0x6   :  { %8048 = sst [smem:[#allocation42_spill]] %s7992_s5 }
   0x7   :  { %29 = vsyncpa [#allocation4], 0  ;;  %v85_v1 = vlaneseq  ;;  %s8049_s3 = sld [smem:[#allocation40_spill]]  ;;  %v6246_v3 = vmov 0   ;;  %vm123_vm0 = vcmask 261120  }
   0x8   :  { %5995 = vset.pattern.permute.xlu1 %v6246_v3  ;;  %5994 = vset.pattern.permute.xlu0 %v6246_v3 }
   0x9   :  { %v86_v4 = vshrl.u32 %v85_v1, 7 }
   0xd   :  { %v4443_v2 = vld [vmem:[%s8049_s3] ss:$0 sm:$0xff] }
   0xe   :  { %30 = vsyncpa [#allocation6], 0  ;;  %vm99_vm1 = vcmp.eq.s32.totalorder %v86_v4, %v4443_v2  ;;  %v88_v5 = vadd.s32 16, %v86_v4  ;;  %v87_v6 = vadd.s32 8, %v86_v4  ;;  %v89_v7 = vadd.s32 24, %v86_v4  ;;  %v369_v29 = vld [vmem:[%s7994_s7] sm:$0xff] }
   0xf   :  { %v8021_v8 = vmov 0.0   ;;  %v90_v10 = vadd.s32 32, %v86_v4  ;;  %v91_v11 = vadd.s32 40, %v86_v4  ;;  %v92_v12 = vadd.s32 48, %v86_v4  ;;  %v370_v30 = vld [vmem:[%s7994_s7 + $0x8] sm:$0xff]  ;;  %s8050_s5 = sld [smem:[#allocation41_spill]] }
  0x10   :  { %v4444_v9 = vsel %vm99_vm1, 1.0, %v8021_v8  ;;  %vm101_vm2 = vcmp.eq.s32.totalorder %v88_v5, %v4443_v2  ;;  %vm100_vm3 = vcmp.eq.s32.totalorder %v87_v6, %v4443_v2  ;;  %vm102_vm4 = vcmp.eq.s32.totalorder %v89_v7, %v4443_v2  ;;  %v2837_v35 = vld [vmem:[%s7993_s6 + $0x8] sm:$0xff]  ;;  %v2839_v37 = vld [vmem:[%s7993_s6 + $0x18] sm:$0xff]  ;;  %v2836_v46 = vld [vmem:[%s7993_s6] sm:$0xff]  ;;  %s8051_s7 = sld [smem:[#allocation42_spill]]  ;;  %s8052_s29 = sld [smem:[#allocation38_spill]] }
  0x11   :  { %v124_v13 = vsel %vm123_vm0, %v4444_v9, -inf  ;;  %v4446_v14 = vsel %vm101_vm2, 1.0, %v8021_v8  ;;  %v4445_v15 = vsel %vm100_vm3, 1.0, %v8021_v8  ;;  %v4447_v16 = vsel %vm102_vm4, 1.0, %v8021_v8  ;;  %v2841_v39 = vld [vmem:[%s7993_s6 + $0x28] sm:$0xff]  ;;  %v2843_v41 = vld [vmem:[%s7993_s6 + $0x38] sm:$0xff] }
  0x12   :  { %125 = vmax.xlane.f32.xlu0 %v124_v13  ;;  %vm103_vm5 = vcmp.eq.s32.totalorder %v90_v10, %v4443_v2  ;;  %v130_v17 = vsel %vm123_vm0, %v4446_v14, -inf  ;;  %v127_v18 = vsel %vm123_vm0, %v4445_v15, -inf  ;;  %vm104_vm6 = vcmp.eq.s32.totalorder %v91_v11, %v4443_v2  ;;  %v2845_v43 = vld [vmem:[%s7993_s6 + $0x48] sm:$0xff]  ;;  %v2847_v45 = vld [vmem:[%s7993_s6 + $0x58] sm:$0xff]  ;;  %v2838_v48 = vld [vmem:[%s7993_s6 + $0x10] sm:$0xff]  ;;  %s8062_s23 = sld [smem:[#allocation37_spill]] }
  0x13   :  { %131 = vmax.xlane.f32.xlu1 %v130_v17  ;;  %v4448_v19 = vsel %vm103_vm5, 1.0, %v8021_v8  ;;  %v93_v20 = vadd.s32 56, %v86_v4  ;;  %v133_v21 = vsel %vm123_vm0, %v4447_v16, -inf  ;;  %vm105_vm7 = vcmp.eq.s32.totalorder %v92_v12, %v4443_v2  ;;  %v2849_v47 = vld [vmem:[%s7993_s6 + $0x68] sm:$0xff]  ;;  %v2851_v49 = vld [vmem:[%s7993_s6 + $0x78] sm:$0xff]  ;;  %v2840_v50 = vld [vmem:[%s7993_s6 + $0x20] sm:$0xff] }
  0x14   :  { %v4449_v22 = vsel %vm104_vm6, 1.0, %v8021_v8  ;;  %v136_v23 = vsel %vm123_vm0, %v4448_v19, -inf  ;;  %v4450_v24 = vsel %vm105_vm7, 1.0, %v8021_v8  ;;  %v5705_v31 = vpack.c.bf16 %v370_v30, %v369_v29  ;;  %v2842_v52 = vld [vmem:[%s7993_s6 + $0x30] sm:$0xff]  ;;  %v2844_v54 = vld [vmem:[%s7993_s6 + $0x40] sm:$0xff]  ;;  %s6248_s0 = smov [#allocation3]  }
  0x15   :  { %vm106_vm8 = vcmp.eq.s32.totalorder %v93_v20, %v4443_v2  ;;  %v139_v25 = vsel %vm123_vm0, %v4449_v22, -inf  ;;  %v142_v27 = vsel %vm123_vm0, %v4450_v24, -inf  ;;  %v182_v32 = vld [vmem:[%s8050_s5 + $0x8] sm:$0xff]  ;;  %v181_v33 = vld [vmem:[%s8050_s5] sm:$0xff]  ;;  %v183_v34 = vld [vmem:[%s8050_s5 + $0x10] sm:$0xff]  ;;  %vm371_vm9 = vcmask 130048  }
  0x16   :  { %128 = vmax.xlane.f32.xlu0 %v127_v18  ;;  %v4451_v26 = vsel %vm106_vm8, 1.0, %v8021_v8  ;;  %5706 = vmatprep.subr.bf16.mxu1 %v5705_v31  ;;  %v184_v36 = vld [vmem:[%s8050_s5 + $0x18] sm:$0xff]  ;;  %v185_v38 = vld [vmem:[%s8050_s5 + $0x20] sm:$0xff]  ;;  %v186_v40 = vld [vmem:[%s8050_s5 + $0x28] sm:$0xff]  ;;  %vm237_vm11 = vcmask 523264   ;;  %s4408_s4 = sshll.u32 %s6248_s0, 4  ;;  %s4409_s4 = int_to_ptr.vmem [resolvable:$true] %s4408_s4 }
  0x17   :  { %134 = vmax.xlane.f32.xlu1 %v133_v21  ;;  %v145_v28 = vsel %vm123_vm0, %v4451_v26, -inf  ;;  %5708 = vmatpush3.bf16.msra.mxu1 %v5705_v31  ;;  %v187_v42 = vld [vmem:[%s8050_s5 + $0x30] sm:$0xff]  ;;  %v188_v44 = vld [vmem:[%s8050_s5 + $0x38] sm:$0xff]  ;;  %v2725_v51 = vld [vmem:[%s8051_s7 + $0x8] sm:$0xff]  ;;  %s6176_s30 = scalar_lea.vmem %s4409_s4, 16  ;;  %s6180_s5 = scalar_lea.vmem %s4409_s4, 32 }
  0x18   :  { %v2727_v53 = vld [vmem:[%s8051_s7 + $0x18] sm:$0xff]  ;;  %v2729_v55 = vld [vmem:[%s8051_s7 + $0x28] sm:$0xff]  ;;  %v2846_v56 = vld [vmem:[%s7993_s6 + $0x50] sm:$0xff]  ;;  %p6177_p0 = scmp.ne.s32.totalorder %s4409_s4, %s6176_s30  ;;  %p6181_p1 = scmp.lt.s32.totalorder %s4409_s4, %s4409_s4 }
  0x19   :  { %v2731_v57 = vld [vmem:[%s8051_s7 + $0x38] sm:$0xff]  ;;  %v2848_v58 = vld [vmem:[%s7993_s6 + $0x60] sm:$0xff]  ;;  %v2733_v59 = vld [vmem:[%s8051_s7 + $0x48] sm:$0xff]  ;;  %p6182_p2 = scmp.lt.s32.totalorder %s6180_s5, %s6176_s30 }
  0x1a   :  { %137 = vmax.xlane.f32.xlu0 %v136_v23  ;;  %v2850_v60 = vld [vmem:[%s7993_s6 + $0x70] sm:$0xff]  ;;  %v2735_v61 = vld [vmem:[%s8051_s7 + $0x58] sm:$0xff]  ;;  %v6483_v62 = vld [vmem:[%s8052_s29] sm:$0xff]  ;;  %s8053_s6 = sld [smem:[#allocation39_spill]] }
  0x1b   :  { %140 = vmax.xlane.f32.xlu1 %v139_v25  ;;  %v6488_v63 = vld [vmem:[%s8052_s29 + $0x8] sm:$0xff]  ;;  %v2724_v0 = vld [vmem:[%s8051_s7] sm:$0xff]  ;;  %v6501_v4 = vld [vmem:[%s8052_s29 + $0x10] sm:$0xff]  ;;  %p6183_p3 = por %p6182_p2, %p6181_p1 }
  0x1c   :  { %v5689_v2 = vpack.c.bf16 %v6488_v63, %v6483_v62  ;;  %v2737_v3 = vld [vmem:[%s8051_s7 + $0x68] sm:$0xff]  ;;  %v6506_v5 = vld [vmem:[%s8052_s29 + $0x18] sm:$0xff]  ;;  %v2726_v6 = vld [vmem:[%s8051_s7 + $0x10] sm:$0xff] }
  0x1d   :  { %v5693_v7 = vpack.c.bf16 %v6506_v5, %v6501_v4  ;;  %v2739_v9 = vld [vmem:[%s8051_s7 + $0x78] sm:$0xff]  ;;  %v6519_v10 = vld [vmem:[%s8052_s29 + $0x20] sm:$0xff]  ;;  %v6524_v11 = vld [vmem:[%s8052_s29 + $0x28] sm:$0xff]  ;;  %p6184_p4 = pnand %p6183_p3, %p6177_p0 }
  0x1e   :  { %143 = vmax.xlane.f32.xlu0 %v142_v27  ;;  %5690 = vmatprep.subr.bf16.mxu0 %v5689_v2  ;;  %v2728_v12 = vld [vmem:[%s8051_s7 + $0x20] sm:$0xff]  ;;  %v5697_v13 = vpack.c.bf16 %v6524_v11, %v6519_v10  ;;  %v6534_v14 = vld [vmem:[%s8052_s29 + $0x30] sm:$0xff]  ;;  %v6539_v15 = vld [vmem:[%s8052_s29 + $0x38] sm:$0xff] }
  0x1f   :  { %146 = vmax.xlane.f32.xlu1 %v145_v28  ;;  %5692 = vmatpush3.bf16.msra.mxu0 %v5689_v2  ;;  %v2730_v16 = vld [vmem:[%s8051_s7 + $0x30] sm:$0xff]  ;;  %v5701_v17 = vpack.c.bf16 %v6539_v15, %v6534_v14  ;;  %v2732_v18 = vld [vmem:[%s8051_s7 + $0x40] sm:$0xff] }
  0x20   :  { %5694 = vmatprep.subr.bf16.mxu0 %v5693_v7  ;;  %v2734_v19 = vld [vmem:[%s8051_s7 + $0x50] sm:$0xff]  ;;  %v2736_v20 = vld [vmem:[%s8051_s7 + $0x60] sm:$0xff] }
  0x21   :  { %v2738_v21 = vld [vmem:[%s8051_s7 + $0x70] sm:$0xff]  ;;  %v4452_v22 = vld [vmem:[%s8053_s6] ss:$0 sm:$0xff] }
  0x22   :  { %v155_v23 = vsub.f32 %v4452_v22, %v6483_v62  ;;  %v157_v24 = vsub.f32 %v4452_v22, %v6501_v4  ;;  %v156_v27 = vsub.f32 %v4452_v22, %v6488_v63  ;;  %v158_v31 = vsub.f32 %v4452_v22, %v6506_v5 }
  0x23   :  { %5696 = vmatpush3.bf16.msra.mxu0 %v5693_v7 }
  0x24   :  { %5698 = vmatprep.subr.bf16.mxu0 %v5697_v13 }
  0x27   :  { %5700 = vmatpush3.bf16.msra.mxu0 %v5697_v13 }
  0x28   :  { %5702 = vmatprep.subr.bf16.mxu0 %v5701_v17 }
  0x2b   :  { %5704 = vmatpush3.bf16.msra.mxu0 %v5701_v17 }
  0x30   :  { %193 = vperm.xlu1 %5995, %v182_v32  }
  0x34   :  { %190 = vperm.xlu0 %5994, %v181_v33   ;;  %196 = vperm.xlu1 %5995, %v183_v34   ;;  %v159_v34 = vsub.f32 %v4452_v22, %v6519_v10 }
  0x38   :  { %2856 = vperm.xlu0 %5994, %v2837_v35   ;;  %199 = vperm.xlu1 %5995, %v184_v36  }
  0x3c   :  { %2862 = vperm.xlu0 %5994, %v2839_v37   ;;  %202 = vperm.xlu1 %5995, %v185_v38  }
  0x40   :  { %2868 = vperm.xlu0 %5994, %v2841_v39   ;;  %205 = vperm.xlu1 %5995, %v186_v40   ;;  %v160_v39 = vsub.f32 %v4452_v22, %v6524_v11 }
  0x44   :  { %2874 = vperm.xlu0 %5994, %v2843_v41   ;;  %208 = vperm.xlu1 %5995, %v187_v42  }
  0x48   :  { %2880 = vperm.xlu0 %5994, %v2845_v43   ;;  %211 = vperm.xlu1 %5995, %v188_v44   ;;  %v161_v43 = vsub.f32 %v4452_v22, %v6534_v14 }
  0x4c   :  { %2886 = vperm.xlu0 %5994, %v2847_v45   ;;  %2853 = vperm.xlu1 %5995, %v2836_v46  }
  0x50   :  { %2892 = vperm.xlu0 %5994, %v2849_v47   ;;  %2859 = vperm.xlu1 %5995, %v2838_v48   ;;  %v162_v47 = vsub.f32 %v4452_v22, %v6539_v15 }
  0x54   :  { %2898 = vperm.xlu0 %5994, %v2851_v49   ;;  %2865 = vperm.xlu1 %5995, %v2840_v50  }
  0x58   :  { %2744 = vperm.xlu0 %5994, %v2725_v51   ;;  %2871 = vperm.xlu1 %5995, %v2842_v52   ;;  %v6604_v52 = vand.u32 127, %v85_v1 }
  0x5c   :  { %2750 = vperm.xlu0 %5994, %v2727_v53   ;;  %2877 = vperm.xlu1 %5995, %v2844_v54  }
  0x60   :  { %2756 = vperm.xlu0 %5994, %v2729_v55   ;;  %2883 = vperm.xlu1 %5995, %v2846_v56  }
  0x64   :  { %2762 = vperm.xlu0 %5994, %v2731_v57   ;;  %2889 = vperm.xlu1 %5995, %v2848_v58  }
  0x68   :  { %2768 = vperm.xlu0 %5994, %v2733_v59   ;;  %2895 = vperm.xlu1 %5995, %v2850_v60  }
  0x6c   :  { %2774 = vperm.xlu0 %5994, %v2735_v61   ;;  %2741 = vperm.xlu1 %5995, %v2724_v0  }
  0x70   :  { %2780 = vperm.xlu0 %5994, %v2737_v3   ;;  %2747 = vperm.xlu1 %5995, %v2726_v6  }
  0x74   :  { %2786 = vperm.xlu0 %5994, %v2739_v9   ;;  %2753 = vperm.xlu1 %5995, %v2728_v12   ;;  %v6655_v9 = vld [vmem:[%s8062_s23] sm:$0xff] }
  0x78   :  { %2759 = vperm.xlu1 %5995, %v2730_v16  }
  0x7c   :  { %2765 = vperm.xlu1 %5995, %v2732_v18  }
  0x80   :  { %2771 = vperm.xlu1 %5995, %v2734_v19  }
  0x84   :  { %2777 = vperm.xlu1 %5995, %v2736_v20  }
  0x88   :  { %2783 = vperm.xlu1 %5995, %v2738_v21  }
  0x9f   :  { %v6563_v25 = vpop.xlane.xlu0 %125 }
  0xa0   :  { %8054 = vst [vmem:[#allocation10_spill] sm:$0xff] %v6563_v25  ;;  %v163_v26 = vmul.f32 %v155_v23, %v6563_v25  ;;  %v6567_v28 = vpop.xlane.xlu1 %131 }
  0xa1   :  { %8055 = vst [vmem:[#allocation11_spill] sm:$0xff] %v6567_v28  ;;  %v165_v29 = vmul.f32 %v157_v24, %v6567_v28 }
  0xa2   :  { %v171_v30 = vadd.f32 %v163_v26, %v6483_v62  ;;  %v6662_v26 = vld [vmem:[%s8062_s23 + $0x8] sm:$0xff] }
  0xa3   :  { %v6572_v32 = vpop.xlane.xlu0 %128  ;;  %v173_v35 = vadd.f32 %v165_v29, %v6501_v4  ;;  %v6668_v29 = vld [vmem:[%s8062_s23 + $0x10] sm:$0xff] }
  0xa4   :  { %8056 = vst [vmem:[#allocation12_spill] sm:$0xff] %v6572_v32  ;;  %v164_v33 = vmul.f32 %v156_v27, %v6572_v32  ;;  %5121 = vmatprep.mubr.msk.f32.mxu1 %vm371_vm9, %v171_v30  ;;  %v6578_v36 = vpop.xlane.xlu1 %134 }
  0xa5   :  { %8057 = vst [vmem:[#allocation13_spill] sm:$0xff] %v6578_v36  ;;  %v166_v38 = vmul.f32 %v158_v31, %v6578_v36 }
  0xa6   :  { %v172_v37 = vadd.f32 %v164_v33, %v6488_v63 }
  0xa7   :  { %v6583_v40 = vpop.xlane.xlu0 %137  ;;  %v174_v41 = vadd.f32 %v166_v38, %v6506_v5  ;;  %v6683_v38 = vld [vmem:[%s8062_s23 + $0x20] sm:$0xff] }
  0xa8   :  { %8058 = vst [vmem:[#allocation14_spill] sm:$0xff] %v6583_v40  ;;  %5122 = vmatmul.mubr.msk.f32.vlgmr.msra.gmra.mrb[0].mxu1 %vm371_vm9, %v172_v37  ;;  %v167_v42 = vmul.f32 %v159_v34, %v6583_v40  ;;  %v6590_v44 = vpop.xlane.xlu1 %140  ;;  %v6678_v34 = vld [vmem:[%s8062_s23 + $0x18] sm:$0xff] }
  0xa9   :  { %5124 = vmatprep.mubr.msk.f32.mxu1 %vm371_vm9, %v173_v35  ;;  %8059 = vst [vmem:[#allocation15_spill] sm:$0xff] %v6590_v44  ;;  %v168_v46 = vmul.f32 %v160_v39, %v6590_v44 }
  0xaa   :  { %v175_v45 = vadd.f32 %v167_v42, %v6519_v10  ;;  %v6694_v42 = vld [vmem:[%s8062_s23 + $0x28] sm:$0xff] }
  0xab   :  { %v6595_v48 = vpop.xlane.xlu0 %143  ;;  %v176_v49 = vadd.f32 %v168_v46, %v6524_v11 }
  0xac   :  { %8060 = vst [vmem:[#allocation16_spill] sm:$0xff] %v6595_v48  ;;  %5125 = vmatmul.mubr.msk.f32.gmra.mrb[2].mxu1 %vm371_vm9, %v174_v41  ;;  %v169_v50 = vmul.f32 %v161_v43, %v6595_v48  ;;  %v6600_v51 = vpop.xlane.xlu1 %146 }
  0xad   :  { %8061 = vst [vmem:[#allocation17_spill] sm:$0xff] %v6600_v51  ;;  %5127 = vmatprep.mubr.msk.f32.mxu1 %vm371_vm9, %v175_v45  ;;  %v170_v54 = vmul.f32 %v162_v47, %v6600_v51  ;;  %v6699_v45 = vld [vmem:[%s8062_s23 + $0x30] sm:$0xff]  ;;  %v998_v47 = vld [vmem:[%s7996_s9] sm:$0xff] }
  0xae   :  { %v177_v53 = vadd.f32 %v169_v50, %v6534_v14 }
  0xaf   :  { %v178_v55 = vadd.f32 %v170_v54, %v6539_v15  ;;  %v6714_v54 = vld [vmem:[%s8062_s23 + $0x38] sm:$0xff] }
  0xb0   :  { %5128 = vmatmul.mubr.msk.f32.gmra.mrb[4].mxu1 %vm371_vm9, %v176_v49  ;;  %v194_v56 = vpop.permute.xlu1 %193  ;;  %v999_v49 = vld [vmem:[%s7996_s9 + $0x8] sm:$0xff] }
  0xb1   :  { %5130 = vmatprep.mubr.msk.f32.mxu1 %vm371_vm9, %v177_v53  ;;  %vm214_vm10 = vcmp.eq.s32.totalorder %v6604_v52, %v194_v56 }
  0xb2   :  { %v4454_v1 = vsel %vm214_vm10, 1.0, %v8021_v8 }
  0xb3   :  { %v191_v57 = vpop.permute.xlu0 %190 }
  0xb4   :  { %5131 = vmatmul.mubr.msk.f32.gmra.mrb[6].mxu1 %vm371_vm9, %v178_v55  ;;  %vm213_vm12 = vcmp.eq.s32.totalorder %v6604_v52, %v191_v57  ;;  %v197_v58 = vpop.permute.xlu1 %196 }
  0xb5   :  { %v4453_v59 = vsel %vm213_vm12, 1.0, %v8021_v8  ;;  %5133 = vmatprep.mubr.msk.f32.mxu1 %vm371_vm9, %v6483_v62  ;;  %vm215_vm13 = vcmp.eq.s32.totalorder %v6604_v52, %v197_v58  ;;  %v1000_v58 = vld [vmem:[%s7996_s9 + $0x10] sm:$0xff] }
  0xb6   :  { %5105 = vmatprep.mubr.msk.f32.mxu0 %vm237_vm11, %v4453_v59  ;;  %v4455_v60 = vsel %vm215_vm13, 1.0, %v8021_v8  ;;  %v1001_v59 = vld [vmem:[%s7996_s9 + $0x18] sm:$0xff] }
  0xb7   :  { %5106 = vmatmul.mubr.msk.f32.vlgmr.msra.gmra.mrb[0].mxu0 %vm237_vm11, %v4454_v1  ;;  %v5757_v1 = vpack.c.bf16 %v999_v49, %v998_v47 }
  0xb8   :  { %5108 = vmatprep.mubr.msk.f32.mxu0 %vm237_vm11, %v4455_v60  ;;  %5134 = vmatmul.mubr.msk.f32.gmra.mrb[8].mxu1 %vm371_vm9, %v6488_v63  ;;  %v200_v61 = vpop.permute.xlu1 %199  ;;  %v5761_v60 = vpack.c.bf16 %v1001_v59, %v1000_v58 }
  0xb9   :  { %5136 = vmatprep.mubr.msk.f32.mxu1 %vm371_vm9, %v6501_v4  ;;  %vm216_vm14 = vcmp.eq.s32.totalorder %v6604_v52, %v200_v61 }
  0xba   :  { %v4456_v62 = vsel %vm216_vm14, 1.0, %v8021_v8 }
  0xbb   :  { %5109 = vmatmul.mubr.msk.f32.gmra.mrb[2].mxu0 %vm237_vm11, %v4456_v62 }
  0xbc   :  { %5137 = vmatmul.mubr.msk.f32.gmra.mrb[10].mxu1 %vm371_vm9, %v6506_v5  ;;  %v203_v0 = vpop.permute.xlu1 %202 }
  0xbd   :  { %5139 = vmatprep.mubr.msk.f32.mxu1 %vm371_vm9, %v6519_v10  ;;  %vm217_vm15 = vcmp.eq.s32.totalorder %v6604_v52, %v203_v0  ;;  %v6749_v0 = vld [vmem:[%s7995_s8] ss:$0 sm:$0xff] }
  0xbe   :  { %v4457_v63 = vsel %vm217_vm15, 1.0, %v8021_v8 }
  0xbf   :  { %5111 = vmatprep.mubr.msk.f32.mxu0 %vm237_vm11, %v4457_v63 }
  0xc0   :  { %5140 = vmatmul.mubr.msk.f32.gmra.mrb[12].mxu1 %vm371_vm9, %v6524_v11  ;;  %v206_v2 = vpop.permute.xlu1 %205 }
  0xc1   :  { %5142 = vmatprep.mubr.msk.f32.mxu1 %vm371_vm9, %v6534_v14  ;;  %vm218_vm1 = vcmp.eq.s32.totalorder %v6604_v52, %v206_v2 }
  0xc2   :  { %v4458_v3 = vsel %vm218_vm1, 1.0, %v8021_v8 }
  0xc3   :  { %5112 = vmatmul.mubr.msk.f32.gmra.mrb[4].mxu0 %vm237_vm11, %v4458_v3 }
  0xc4   :  { %5143 = vmatmul.mubr.msk.f32.gmra.mrb[14].mxu1 %vm371_vm9, %v6539_v15  ;;  %v209_v4 = vpop.permute.xlu1 %208 }
  0xc5   :  { %vm219_vm2 = vcmp.eq.s32.totalorder %v6604_v52, %v209_v4 }
  0xc6   :  { %v4459_v5 = vsel %vm219_vm2, 1.0, %v8021_v8 }
  0xc7   :  { %5114 = vmatprep.mubr.msk.f32.mxu0 %vm237_vm11, %v4459_v5 }
  0xc8   :  { %v212_v6 = vpop.permute.xlu1 %211 }
  0xc9   :  { %vm220_vm3 = vcmp.eq.s32.totalorder %v6604_v52, %v212_v6 }
  0xca   :  { %v4460_v7 = vsel %vm220_vm3, 1.0, %v8021_v8 }
  0xcb   :  { %5115 = vmatmul.mubr.msk.f32.gmra.mrb[6].mxu0 %vm237_vm11, %v4460_v7 }
  0xcc   :  { %5173 = vmatprep.mubr.msk.f32.mxu0 %vm237_vm11, %v6655_v9 }
 0x17b   :  { %v5123_v10 = vpop.f32.mrb[0].mxu1 }
 0x17c   :  { %v510_v11 = vpop.f32.mrb[1].mxu1 }
 0x17d   :  { %v5709_v12 = vpack.c.bf16 %v5123_v10, %v510_v11 }
 0x17f   :  { %v5126_v13 = vpop.f32.mrb[2].mxu1  ;;  %5710 = vmatprep.subr.bf16.mxu0 %v5709_v12 }
 0x180   :  { %v520_v14 = vpop.f32.mrb[3].mxu1  ;;  %5712 = vmatpush3.bf16.msra.mxu0 %v5709_v12 }
 0x181   :  { %v5713_v15 = vpack.c.bf16 %v5126_v13, %v520_v14 }
 0x183   :  { %v5129_v16 = vpop.f32.mrb[4].mxu1  ;;  %5714 = vmatprep.subr.bf16.mxu0 %v5713_v15 }
 0x184   :  { %v530_v17 = vpop.f32.mrb[5].mxu1  ;;  %5716 = vmatpush3.bf16.msra.mxu0 %v5713_v15 }
 0x185   :  { %v5717_v18 = vpack.c.bf16 %v5129_v16, %v530_v17 }
 0x187   :  { %v5132_v19 = vpop.f32.mrb[6].mxu1  ;;  %5718 = vmatprep.subr.bf16.mxu0 %v5717_v18 }
 0x188   :  { %v540_v20 = vpop.f32.mrb[7].mxu1  ;;  %5720 = vmatpush3.bf16.msra.mxu0 %v5717_v18 }
 0x189   :  { %v5721_v21 = vpack.c.bf16 %v5132_v19, %v540_v20 }
 0x18a   :  { %v5107_v22 = vpop.f32.mrb[0].mxu0 }
 0x18b   :  { %5722 = vmatprep.subr.bf16.mxu0 %v5721_v21  ;;  %v328_v23 = vpop.f32.mrb[1].mxu0  ;;  %v5135_v24 = vpop.f32.mrb[8].mxu1 }
 0x18c   :  { %5724 = vmatpush3.bf16.msra.mxu0 %v5721_v21  ;;  %5145 = vmatprep.mubr.msk.f32.mxu1 %vm371_vm9, %v328_v23  ;;  %v550_v27 = vpop.f32.mrb[9].mxu1 }
 0x18d   :  { %5146 = vmatmul.mubr.msk.f32.gmra.mrb[16].mxu1 %vm371_vm9, %v5107_v22  ;;  %v5725_v30 = vpack.c.bf16 %v5135_v24, %v550_v27 }
 0x18e   :  { %v5110_v31 = vpop.f32.mrb[2].mxu0 }
 0x18f   :  { %5174 = vmatmul.mubr.msk.f32.vlgmr.msra.gmra.mrb[8].mxu0 %vm237_vm11, %v6662_v26  ;;  %v5138_v33 = vpop.f32.mrb[10].mxu1  ;;  %5726 = vmatprep.subr.bf16.mxu0 %v5725_v30  ;;  %v338_v35 = vpop.f32.mrb[3].mxu0 }
 0x190   :  { %5176 = vmatprep.mubr.msk.f32.mxu0 %vm237_vm11, %v6668_v29  ;;  %v560_v37 = vpop.f32.mrb[11].mxu1  ;;  %5728 = vmatpush3.bf16.msra.mxu0 %v5725_v30 }
 0x191   :  { %5148 = vmatprep.mubr.msk.f32.mxu1 %vm371_vm9, %v338_v35  ;;  %v5729_v39 = vpack.c.bf16 %v5138_v33, %v560_v37 }
 0x192   :  { %5149 = vmatmul.mubr.msk.f32.gmra.mrb[18].mxu1 %vm371_vm9, %v5110_v31 }
 0x193   :  { %5177 = vmatmul.mubr.msk.f32.gmra.mrb[10].mxu0 %vm237_vm11, %v6678_v34  ;;  %v5141_v41 = vpop.f32.mrb[12].mxu1  ;;  %5730 = vmatprep.subr.bf16.mxu0 %v5729_v39 }
 0x194   :  { %5179 = vmatprep.mubr.msk.f32.mxu0 %vm237_vm11, %v6683_v38  ;;  %v570_v43 = vpop.f32.mrb[13].mxu1  ;;  %5732 = vmatpush3.bf16.msra.mxu0 %v5729_v39 }
 0x195   :  { %v5733_v46 = vpack.c.bf16 %v5141_v41, %v570_v43 }
 0x196   :  { %v5113_v50 = vpop.f32.mrb[4].mxu0 }
 0x197   :  { %5180 = vmatmul.mubr.msk.f32.gmra.mrb[12].mxu0 %vm237_vm11, %v6694_v42  ;;  %v5144_v53 = vpop.f32.mrb[14].mxu1  ;;  %5734 = vmatprep.subr.bf16.mxu0 %v5733_v46  ;;  %v348_v55 = vpop.f32.mrb[5].mxu0 }
 0x198   :  { %5182 = vmatprep.mubr.msk.f32.mxu0 %vm237_vm11, %v6699_v45  ;;  %v580_v56 = vpop.f32.mrb[15].mxu1  ;;  %5736 = vmatpush3.bf16.msra.mxu0 %v5733_v46 }
 0x199   :  { %5151 = vmatprep.mubr.msk.f32.mxu1 %vm371_vm9, %v348_v55  ;;  %v5737_v57 = vpack.c.bf16 %v5144_v53, %v580_v56 }
 0x19a   :  { %5152 = vmatmul.mubr.msk.f32.gmra.mrb[20].mxu1 %vm371_vm9, %v5113_v50 }
 0x19b   :  { %5183 = vmatmul.mubr.msk.f32.gmra.mrb[14].mxu0 %vm237_vm11, %v6714_v54  ;;  %5738 = vmatprep.subr.bf16.mxu0 %v5737_v57 }
 0x19c   :  { %5740 = vmatpush3.bf16.msra.mxu0 %v5737_v57  ;;  %5201 = vmatprep.mubr.msk.f32.mxu0 %vm237_vm11, %v6655_v9 }
 0x19d   :  { %5758 = vmatprep.subr.bf16.mxu0 %v5757_v1 }
 0x19e   :  { %v5116_v61 = vpop.f32.mrb[6].mxu0 }
 0x19f   :  { %5202 = vmatmul.mubr.msk.f32.vlgmr.msra.gmra.mrb[16].mxu0 %vm237_vm11, %v6662_v26  ;;  %v358_v62 = vpop.f32.mrb[7].mxu0 }
 0x1a0   :  { %5204 = vmatprep.mubr.msk.f32.mxu0 %vm237_vm11, %v6668_v29  ;;  %5760 = vmatpush3.bf16.msra.mxu0 %v5757_v1 }
 0x1a1   :  { %5154 = vmatprep.mubr.msk.f32.mxu1 %vm371_vm9, %v358_v62  ;;  %5762 = vmatprep.subr.bf16.mxu0 %v5761_v60 }
 0x1a2   :  { %5155 = vmatmul.mubr.msk.f32.gmra.mrb[22].mxu1 %vm371_vm9, %v5116_v61 }
 0x1a3   :  { %5205 = vmatmul.mubr.msk.f32.gmra.mrb[18].mxu0 %vm237_vm11, %v6678_v34  ;;  %5229 = vmatprep.mubr.msk.f32.mxu1 %vm237_vm11, %v6655_v9 }
 0x1a4   :  { %5207 = vmatprep.mubr.msk.f32.mxu0 %vm237_vm11, %v6683_v38  ;;  %5764 = vmatpush3.bf16.msra.mxu0 %v5761_v60 }
 0x1a7   :  { %5208 = vmatmul.mubr.msk.f32.gmra.mrb[20].mxu0 %vm237_vm11, %v6694_v42 }
 0x1a8   :  { %5210 = vmatprep.mubr.msk.f32.mxu0 %vm237_vm11, %v6699_v45 }
 0x1ab   :  { %5211 = vmatmul.mubr.msk.f32.gmra.mrb[22].mxu0 %vm237_vm11, %v6714_v54 }
 0x260   :  { %v5147_v63 = vpop.f32.mrb[16].mxu1 }
 0x261   :  { %v590_v2 = vpop.f32.mrb[17].mxu1 }
 0x262   :  { %v5175_v3 = vpop.f32.mrb[8].mxu0  ;;  %v5741_v4 = vpack.c.bf16 %v5147_v63, %v590_v2 }
 0x263   :  { %v731_v5 = vadd.f32 %v5175_v3, %v6749_v0  ;;  %v725_v6 = vpop.f32.mrb[9].mxu0 }
 0x264   :  { %v726_v7 = vadd.f32 %v6749_v0, %v725_v6  ;;  %5742 = vmatprep.subr.bf16.mxu1 %v5741_v4 }
 0x265   :  { %v5150_v10 = vpop.f32.mrb[18].mxu1  ;;  %5744 = vmatpush3.bf16.msra.mxu1 %v5741_v4  ;;  %v6755_v14 = vmax.f32 %v731_v5, 0.0 }
 0x266   :  { %v6753_v11 = vmax.f32 %v726_v7, 0.0  ;;  %v5178_v12 = vpop.f32.mrb[10].mxu0  ;;  %v600_v13 = vpop.f32.mrb[19].mxu1 }
 0x267   :  { %v741_v15 = vadd.f32 %v5178_v12, %v6749_v0  ;;  %v735_v16 = vpop.f32.mrb[11].mxu0  ;;  %v5745_v17 = vpack.c.bf16 %v5150_v10, %v600_v13 }
 0x268   :  { %v736_v18 = vadd.f32 %v6749_v0, %v735_v16  ;;  %5249 = vmatprep.mubr.msk.f32.mxu0 %vm123_vm0, %v6753_v11 }
 0x269   :  { %5250 = vmatmul.mubr.msk.f32.vlgmr.msra.gmra.mrb[24].mxu0 %vm123_vm0, %v6755_v14  ;;  %5746 = vmatprep.subr.bf16.mxu1 %v5745_v17  ;;  %v6765_v21 = vmax.f32 %v741_v15, 0.0 }
 0x26a   :  { %v6763_v19 = vmax.f32 %v736_v18, 0.0  ;;  %v5181_v20 = vpop.f32.mrb[12].mxu0  ;;  %5748 = vmatpush3.bf16.msra.mxu1 %v5745_v17 }
 0x26b   :  { %v751_v22 = vadd.f32 %v5181_v20, %v6749_v0  ;;  %v745_v23 = vpop.f32.mrb[13].mxu0 }
 0x26c   :  { %v746_v24 = vadd.f32 %v6749_v0, %v745_v23  ;;  %5252 = vmatprep.mubr.msk.f32.mxu0 %vm123_vm0, %v6763_v19  ;;  %v1609_v23 = vld [vmem:[%s7998_s11 + $0x28] sm:$0xff] }
 0x26d   :  { %5253 = vmatmul.mubr.msk.f32.gmra.mrb[26].mxu0 %vm123_vm0, %v6765_v21  ;;  %v5153_v27 = vpop.f32.mrb[20].mxu1  ;;  %v6775_v35 = vmax.f32 %v751_v22, 0.0  ;;  %v1608_v22 = vld [vmem:[%s7998_s11 + $0x20] sm:$0xff] }
 0x26e   :  { %v6773_v30 = vmax.f32 %v746_v24, 0.0  ;;  %v5184_v31 = vpop.f32.mrb[14].mxu0  ;;  %v610_v33 = vpop.f32.mrb[21].mxu1  ;;  %v1610_v24 = vld [vmem:[%s7998_s11 + $0x30] sm:$0xff] }
 0x26f   :  { %v761_v37 = vadd.f32 %v5184_v31, %v6749_v0  ;;  %v755_v39 = vpop.f32.mrb[15].mxu0  ;;  %v5749_v41 = vpack.c.bf16 %v5153_v27, %v610_v33  ;;  %v5813_v27 = vpack.c.bf16 %v1609_v23, %v1608_v22  ;;  %v1611_v31 = vld [vmem:[%s7998_s11 + $0x38] sm:$0xff] }
 0x270   :  { %v756_v43 = vadd.f32 %v6749_v0, %v755_v39  ;;  %5255 = vmatprep.mubr.msk.f32.mxu0 %vm123_vm0, %v6773_v30  ;;  %v5817_v33 = vpack.c.bf16 %v1611_v31, %v1610_v24 }
 0x271   :  { %5256 = vmatmul.mubr.msk.f32.gmra.mrb[28].mxu0 %vm123_vm0, %v6775_v35  ;;  %5750 = vmatprep.subr.bf16.mxu1 %v5749_v41  ;;  %v6785_v49 = vmax.f32 %v761_v37, 0.0 }
 0x272   :  { %v6783_v46 = vmax.f32 %v756_v43, 0.0  ;;  %5752 = vmatpush3.bf16.msra.mxu1 %v5749_v41  ;;  %v5203_v47 = vpop.f32.mrb[16].mxu0  ;;  %5814 = vmatprep.subr.bf16.mxu0 %v5813_v27 }
 0x273   :  { %v844_v50 = vadd.f32 %v5203_v47, %v6749_v0  ;;  %v838_v53 = vpop.f32.mrb[17].mxu0  ;;  %5816 = vmatpush3.bf16.msra.mxu0 %v5813_v27 }
 0x274   :  { %5258 = vmatprep.mubr.msk.f32.mxu0 %vm123_vm0, %v6783_v46  ;;  %v839_v55 = vadd.f32 %v6749_v0, %v838_v53  ;;  %5818 = vmatprep.subr.bf16.mxu0 %v5817_v33 }
 0x275   :  { %5259 = vmatmul.mubr.msk.f32.gmra.mrb[30].mxu0 %vm123_vm0, %v6785_v49  ;;  %v5156_v56 = vpop.f32.mrb[22].mxu1  ;;  %v878_v57 = vmax.f32 %v844_v50, 0.0 }
 0x276   :  { %v620_v1 = vpop.f32.mrb[23].mxu1  ;;  %v877_v58 = vmax.f32 %v839_v55, 0.0  ;;  %v5206_v59 = vpop.f32.mrb[18].mxu0 }
 0x277   :  { %v5753_v60 = vpack.c.bf16 %v5156_v56, %v620_v1  ;;  %v854_v61 = vadd.f32 %v5206_v59, %v6749_v0  ;;  %v848_v62 = vpop.f32.mrb[19].mxu0  ;;  %5820 = vmatpush3.bf16.msra.mxu0 %v5817_v33 }
 0x278   :  { %v849_v63 = vadd.f32 %v6749_v0, %v848_v62  ;;  %5261 = vmatprep.mubr.msk.f32.mxu0 %vm123_vm0, %v877_v58 }
 0x279   :  { %5754 = vmatprep.subr.bf16.mxu1 %v5753_v60  ;;  %v880_v2 = vmax.f32 %v854_v61, 0.0  ;;  %5262 = vmatmul.mubr.msk.f32.gmra.mrb[32].mxu0 %vm123_vm0, %v878_v57 }
 0x27a   :  { %5756 = vmatpush3.bf16.msra.mxu1 %v5753_v60  ;;  %v879_v3 = vmax.f32 %v849_v63, 0.0  ;;  %v5209_v4 = vpop.f32.mrb[20].mxu0 }
 0x27b   :  { %v864_v5 = vadd.f32 %v5209_v4, %v6749_v0  ;;  %v858_v6 = vpop.f32.mrb[21].mxu0 }
 0x27c   :  { %v859_v7 = vadd.f32 %v6749_v0, %v858_v6  ;;  %5264 = vmatprep.mubr.msk.f32.mxu0 %vm123_vm0, %v879_v3 }
 0x27d   :  { %v882_v10 = vmax.f32 %v864_v5, 0.0  ;;  %5265 = vmatmul.mubr.msk.f32.gmra.mrb[34].mxu0 %vm123_vm0, %v880_v2  ;;  %5230 = vmatmul.mubr.msk.f32.vlgmr.msra.gmra.mrb[24].mxu1 %vm237_vm11, %v6662_v26 }
 0x27e   :  { %v881_v12 = vmax.f32 %v859_v7, 0.0  ;;  %v5212_v13 = vpop.f32.mrb[22].mxu0  ;;  %5232 = vmatprep.mubr.msk.f32.mxu1 %vm237_vm11, %v6668_v29 }
 0x27f   :  { %v874_v15 = vadd.f32 %v5212_v13, %v6749_v0  ;;  %v868_v16 = vpop.f32.mrb[23].mxu0 }
 0x280   :  { %v869_v17 = vadd.f32 %v6749_v0, %v868_v16  ;;  %5267 = vmatprep.mubr.msk.f32.mxu0 %vm123_vm0, %v881_v12 }
 0x281   :  { %v884_v18 = vmax.f32 %v874_v15, 0.0  ;;  %5268 = vmatmul.mubr.msk.f32.gmra.mrb[36].mxu0 %vm123_vm0, %v882_v10  ;;  %5233 = vmatmul.mubr.msk.f32.gmra.mrb[26].mxu1 %vm237_vm11, %v6678_v34 }
 0x282   :  { %v883_v20 = vmax.f32 %v869_v17, 0.0  ;;  %5235 = vmatprep.mubr.msk.f32.mxu1 %vm237_vm11, %v6683_v38 }
 0x284   :  { %5270 = vmatprep.mubr.msk.f32.mxu0 %vm123_vm0, %v883_v20 }
 0x285   :  { %5271 = vmatmul.mubr.msk.f32.gmra.mrb[38].mxu0 %vm123_vm0, %v884_v18  ;;  %5236 = vmatmul.mubr.msk.f32.gmra.mrb[28].mxu1 %vm237_vm11, %v6694_v42 }
 0x286   :  { %5238 = vmatprep.mubr.msk.f32.mxu1 %vm237_vm11, %v6699_v45 }
 0x289   :  { %5239 = vmatmul.mubr.msk.f32.gmra.mrb[30].mxu1 %vm237_vm11, %v6714_v54 }
 0x28a   :  { %5301 = vmatprep.mubr.msk.f32.mxu1 %vm237_vm11, %v6655_v9 }
 0x33c   :  { %v5251_v37 = vpop.f32.mrb[24].mxu0 }
 0x33d   :  { %v1140_v39 = vpop.f32.mrb[25].mxu0 }
 0x33e   :  { %v5765_v41 = vpack.c.bf16 %v5251_v37, %v1140_v39 }
 0x340   :  { %v5254_v43 = vpop.f32.mrb[26].mxu0  ;;  %5766 = vmatprep.subr.bf16.mxu1 %v5765_v41 }
 0x341   :  { %v1150_v47 = vpop.f32.mrb[27].mxu0  ;;  %5768 = vmatpush3.bf16.msra.mxu1 %v5765_v41 }
 0x342   :  { %v5769_v50 = vpack.c.bf16 %v5254_v43, %v1150_v47 }
 0x344   :  { %v5257_v53 = vpop.f32.mrb[28].mxu0  ;;  %5770 = vmatprep.subr.bf16.mxu1 %v5769_v50 }
 0x345   :  { %v1160_v55 = vpop.f32.mrb[29].mxu0  ;;  %5772 = vmatpush3.bf16.msra.mxu1 %v5769_v50 }
 0x346   :  { %v5773_v56 = vpack.c.bf16 %v5257_v53, %v1160_v55 }
 0x348   :  { %v5260_v57 = vpop.f32.mrb[30].mxu0  ;;  %5774 = vmatprep.subr.bf16.mxu1 %v5773_v56 }
 0x349   :  { %v1170_v1 = vpop.f32.mrb[31].mxu0  ;;  %5776 = vmatpush3.bf16.msra.mxu1 %v5773_v56 }
 0x34a   :  { %v5777_v58 = vpack.c.bf16 %v5260_v57, %v1170_v1 }
 0x34c   :  { %5778 = vmatprep.subr.bf16.mxu1 %v5777_v58  ;;  %v5263_v59 = vpop.f32.mrb[32].mxu0 }
 0x34d   :  { %5780 = vmatpush3.bf16.msra.mxu1 %v5777_v58  ;;  %v1180_v60 = vpop.f32.mrb[33].mxu0  ;;  %v1605_v58 = vld [vmem:[%s7998_s11 + $0x8] sm:$0xff] }
 0x34e   :  { %v5781_v61 = vpack.c.bf16 %v5263_v59, %v1180_v60  ;;  %v6892_v60 = vld [vmem:[%s7997_s10] ss:$0 sm:$0xff] }
 0x350   :  { %5302 = vmatmul.mubr.msk.f32.vlgmr.msra.gmra.mrb[32].mxu1 %vm237_vm11, %v6662_v26  ;;  %v5266_v62 = vpop.f32.mrb[34].mxu0  ;;  %5782 = vmatprep.subr.bf16.mxu1 %v5781_v61  ;;  %v5231_v63 = vpop.f32.mrb[24].mxu1 }
 0x351   :  { %5304 = vmatprep.mubr.msk.f32.mxu1 %vm237_vm11, %v6668_v29  ;;  %v1190_v2 = vpop.f32.mrb[35].mxu0  ;;  %5784 = vmatpush3.bf16.msra.mxu1 %v5781_v61  ;;  %v957_v3 = vadd.f32 %v5231_v63, %v6749_v0  ;;  %v951_v4 = vpop.f32.mrb[25].mxu1 }
 0x352   :  { %v5785_v5 = vpack.c.bf16 %v5266_v62, %v1190_v2  ;;  %v952_v6 = vadd.f32 %v6749_v0, %v951_v4  ;;  %v1607_v4 = vld [vmem:[%s7998_s11 + $0x18] sm:$0xff] }
 0x353   :  { %v991_v7 = vmax.f32 %v957_v3, 0.0  ;;  %v1606_v3 = vld [vmem:[%s7998_s11 + $0x10] sm:$0xff] }
 0x354   :  { %5305 = vmatmul.mubr.msk.f32.gmra.mrb[34].mxu1 %vm237_vm11, %v6678_v34  ;;  %v5269_v10 = vpop.f32.mrb[36].mxu0  ;;  %5786 = vmatprep.subr.bf16.mxu1 %v5785_v5  ;;  %v990_v12 = vmax.f32 %v952_v6, 0.0  ;;  %v5234_v13 = vpop.f32.mrb[26].mxu1 }
 0x355   :  { %5307 = vmatprep.mubr.msk.f32.mxu1 %vm237_vm11, %v6683_v38  ;;  %v1200_v15 = vpop.f32.mrb[37].mxu0  ;;  %5788 = vmatpush3.bf16.msra.mxu1 %v5785_v5  ;;  %v967_v16 = vadd.f32 %v5234_v13, %v6749_v0  ;;  %v961_v17 = vpop.f32.mrb[27].mxu1  ;;  %v5825_v13 = vpack.c.bf16 %v1607_v4, %v1606_v3  ;;  %v1846_v4 = vld [vmem:[%s7999_s12] sm:$0xff] }
 0x356   :  { %v5789_v18 = vpack.c.bf16 %v5269_v10, %v1200_v15  ;;  %v962_v20 = vadd.f32 %v6749_v0, %v961_v17  ;;  %5273 = vmatprep.mubr.msk.f32.mxu0 %vm123_vm0, %v990_v12  ;;  %v2293_v17 = vld [vmem:[%s8001_s14 + $0x28] sm:$0xff] }
 0x357   :  { %v993_v22 = vmax.f32 %v967_v16, 0.0  ;;  %5274 = vmatmul.mubr.msk.f32.gmra.mrb[40].mxu0 %vm123_vm0, %v991_v7  ;;  %v2292_v16 = vld [vmem:[%s8001_s14 + $0x20] sm:$0xff] }
 0x358   :  { %5308 = vmatmul.mubr.msk.f32.gmra.mrb[36].mxu1 %vm237_vm11, %v6694_v42  ;;  %v5272_v23 = vpop.f32.mrb[38].mxu0  ;;  %5790 = vmatprep.subr.bf16.mxu1 %v5789_v18  ;;  %v992_v24 = vmax.f32 %v962_v20, 0.0  ;;  %v5237_v27 = vpop.f32.mrb[28].mxu1 }
 0x359   :  { %5310 = vmatprep.mubr.msk.f32.mxu1 %vm237_vm11, %v6699_v45  ;;  %v1210_v31 = vpop.f32.mrb[39].mxu0  ;;  %5792 = vmatpush3.bf16.msra.mxu1 %v5789_v18  ;;  %v977_v33 = vadd.f32 %v5237_v27, %v6749_v0  ;;  %v971_v37 = vpop.f32.mrb[29].mxu1 }
 0x35a   :  { %v5793_v39 = vpack.c.bf16 %v5272_v23, %v1210_v31  ;;  %v972_v41 = vadd.f32 %v6749_v0, %v971_v37  ;;  %5276 = vmatprep.mubr.msk.f32.mxu0 %vm123_vm0, %v992_v24 }
 0x35b   :  { %v995_v43 = vmax.f32 %v977_v33, 0.0  ;;  %5277 = vmatmul.mubr.msk.f32.gmra.mrb[42].mxu0 %vm123_vm0, %v993_v22  ;;  %v5853_v33 = vpack.c.bf16 %v2293_v17, %v2292_v16  ;;  %v2289_v16 = vld [vmem:[%s8001_s14 + $0x8] sm:$0xff] }
 0x35c   :  { %5311 = vmatmul.mubr.msk.f32.gmra.mrb[38].mxu1 %vm237_vm11, %v6714_v54  ;;  %5794 = vmatprep.subr.bf16.mxu1 %v5793_v39  ;;  %v994_v47 = vmax.f32 %v972_v41, 0.0  ;;  %v5240_v50 = vpop.f32.mrb[30].mxu1 }
 0x35d   :  { %5796 = vmatpush3.bf16.msra.mxu1 %v5793_v39  ;;  %v987_v53 = vadd.f32 %v5240_v50, %v6749_v0  ;;  %v981_v55 = vpop.f32.mrb[31].mxu1  ;;  %5329 = vmatprep.mubr.msk.f32.mxu1 %vm237_vm11, %v6655_v9 }
 0x35e   :  { %v982_v56 = vadd.f32 %v6749_v0, %v981_v55  ;;  %5279 = vmatprep.mubr.msk.f32.mxu0 %vm123_vm0, %v994_v47  ;;  %v1604_v0 = vld [vmem:[%s7998_s11] sm:$0xff] }
 0x35f   :  { %v997_v57 = vmax.f32 %v987_v53, 0.0  ;;  %5280 = vmatmul.mubr.msk.f32.gmra.mrb[44].mxu0 %vm123_vm0, %v995_v43  ;;  %v5821_v59 = vpack.c.bf16 %v1605_v58, %v1604_v0 }
 0x360   :  { %v996_v1 = vmax.f32 %v982_v56, 0.0  ;;  %5330 = vmatmul.mubr.msk.f32.vlgmr.msra.gmra.mrb[40].mxu1 %vm237_vm11, %v6662_v26 }
 0x361   :  { %5332 = vmatprep.mubr.msk.f32.mxu1 %vm237_vm11, %v6668_v29  ;;  %5822 = vmatprep.subr.bf16.mxu0 %v5821_v59 }
 0x362   :  { %5282 = vmatprep.mubr.msk.f32.mxu0 %vm123_vm0, %v996_v1 }
 0x363   :  { %5283 = vmatmul.mubr.msk.f32.gmra.mrb[46].mxu0 %vm123_vm0, %v997_v57 }
 0x364   :  { %5333 = vmatmul.mubr.msk.f32.gmra.mrb[42].mxu1 %vm237_vm11, %v6678_v34 }
 0x365   :  { %5335 = vmatprep.mubr.msk.f32.mxu1 %vm237_vm11, %v6683_v38 }
 0x368   :  { %5336 = vmatmul.mubr.msk.f32.gmra.mrb[44].mxu1 %vm237_vm11, %v6694_v42 }
 0x369   :  { %5338 = vmatprep.mubr.msk.f32.mxu1 %vm237_vm11, %v6699_v45 }
 0x36c   :  { %5339 = vmatmul.mubr.msk.f32.gmra.mrb[46].mxu1 %vm237_vm11, %v6714_v54 }
 0x36d   :  { %5357 = vmatprep.mubr.msk.f32.mxu1 %vm237_vm11, %v6655_v9 }
 0x423   :  { %v5303_v61 = vpop.f32.mrb[32].mxu1 }
 0x424   :  { %v1337_v62 = vadd.f32 %v5303_v61, %v6892_v60  ;;  %v1331_v63 = vpop.f32.mrb[33].mxu1 }
 0x425   :  { %v1332_v2 = vadd.f32 %v6892_v60, %v1331_v63  ;;  %v2294_v63 = vld [vmem:[%s8001_s14 + $0x30] sm:$0xff] }
 0x426   :  { %v6904_v7 = vmax.f32 %v1337_v62, 0.0 }
 0x427   :  { %v6902_v5 = vmax.f32 %v1332_v2, 0.0  ;;  %v5306_v6 = vpop.f32.mrb[34].mxu1  ;;  %v2295_v2 = vld [vmem:[%s8001_s14 + $0x38] sm:$0xff] }
 0x428   :  { %v1347_v10 = vadd.f32 %v5306_v6, %v6892_v60  ;;  %v1341_v12 = vpop.f32.mrb[35].mxu1  ;;  %v1847_v6 = vld [vmem:[%s7999_s12 + $0x8] sm:$0xff] }
 0x429   :  { %v1342_v15 = vadd.f32 %v6892_v60, %v1341_v12  ;;  %5377 = vmatprep.mubr.msk.f32.mxu0 %vm123_vm0, %v6902_v5  ;;  %v5857_v12 = vpack.c.bf16 %v2295_v2, %v2294_v63  ;;  %v5829_v17 = vpack.c.bf16 %v1847_v6, %v1846_v4 }
 0x42a   :  { %5378 = vmatmul.mubr.msk.f32.vlgmr.msra.gmra.mrb[48].mxu0 %vm123_vm0, %v6904_v7  ;;  %v5275_v18 = vpop.f32.mrb[40].mxu0  ;;  %v6920_v24 = vmax.f32 %v1347_v10, 0.0 }
 0x42b   :  { %v6918_v20 = vmax.f32 %v1342_v15, 0.0  ;;  %v5309_v22 = vpop.f32.mrb[36].mxu1  ;;  %5824 = vmatpush3.bf16.msra.mxu0 %v5821_v59  ;;  %v1220_v23 = vpop.f32.mrb[41].mxu0  ;;  %v2288_v15 = vld [vmem:[%s8001_s14] sm:$0xff] }
 0x42c   :  { %v1357_v27 = vadd.f32 %v5309_v22, %v6892_v60  ;;  %v1351_v31 = vpop.f32.mrb[37].mxu1  ;;  %5826 = vmatprep.subr.bf16.mxu0 %v5825_v13  ;;  %v5797_v37 = vpack.c.bf16 %v5275_v18, %v1220_v23  ;;  %v1848_v18 = vld [vmem:[%s7999_s12 + $0x10] sm:$0xff]  ;;  %v1849_v22 = vld [vmem:[%s7999_s12 + $0x18] sm:$0xff]  ;;  %v5861_v23 = vpack.c.bf16 %v2289_v16, %v2288_v15 }
 0x42d   :  { %v1352_v39 = vadd.f32 %v6892_v60, %v1351_v31  ;;  %5380 = vmatprep.mubr.msk.f32.mxu0 %vm123_vm0, %v6918_v20  ;;  %v2290_v31 = vld [vmem:[%s8001_s14 + $0x10] sm:$0xff] }
 0x42e   :  { %5381 = vmatmul.mubr.msk.f32.gmra.mrb[50].mxu0 %vm123_vm0, %v6920_v24  ;;  %v5278_v41 = vpop.f32.mrb[42].mxu0  ;;  %5798 = vmatprep.subr.bf16.mxu1 %v5797_v37  ;;  %v6930_v53 = vmax.f32 %v1357_v27, 0.0  ;;  %v5833_v27 = vpack.c.bf16 %v1849_v22, %v1848_v18 }
 0x42f   :  { %v6928_v43 = vmax.f32 %v1352_v39, 0.0  ;;  %v5312_v47 = vpop.f32.mrb[38].mxu1  ;;  %5828 = vmatpush3.bf16.msra.mxu0 %v5825_v13  ;;  %v1230_v50 = vpop.f32.mrb[43].mxu0  ;;  %5800 = vmatpush3.bf16.msra.mxu1 %v5797_v37 }
 0x430   :  { %v1367_v55 = vadd.f32 %v5312_v47, %v6892_v60  ;;  %v1361_v56 = vpop.f32.mrb[39].mxu1  ;;  %5854 = vmatprep.subr.bf16.mxu0 %v5853_v33  ;;  %v5801_v57 = vpack.c.bf16 %v5278_v41, %v1230_v50 }
 0x431   :  { %v1362_v1 = vadd.f32 %v6892_v60, %v1361_v56  ;;  %5383 = vmatprep.mubr.msk.f32.mxu0 %vm123_vm0, %v6928_v43 }
 0x432   :  { %5384 = vmatmul.mubr.msk.f32.gmra.mrb[52].mxu0 %vm123_vm0, %v6930_v53  ;;  %v5281_v0 = vpop.f32.mrb[44].mxu0  ;;  %5802 = vmatprep.subr.bf16.mxu1 %v5801_v57  ;;  %v6940_v61 = vmax.f32 %v1367_v55, 0.0 }
 0x433   :  { %v6938_v58 = vmax.f32 %v1362_v1, 0.0  ;;  %v1240_v59 = vpop.f32.mrb[45].mxu0  ;;  %5804 = vmatpush3.bf16.msra.mxu1 %v5801_v57 }
 0x434   :  { %v5805_v62 = vpack.c.bf16 %v5281_v0, %v1240_v59 }
 0x435   :  { %5386 = vmatprep.mubr.msk.f32.mxu0 %vm123_vm0, %v6938_v58 }
 0x436   :  { %5387 = vmatmul.mubr.msk.f32.gmra.mrb[54].mxu0 %vm123_vm0, %v6940_v61  ;;  %v5284_v3 = vpop.f32.mrb[46].mxu0  ;;  %5806 = vmatprep.subr.bf16.mxu1 %v5805_v62 }
 0x437   :  { %5397 = vmatprep.mubr.msk.f32.mxu0 %vm123_vm0, %v6753_v11  ;;  %v1250_v10 = vpop.f32.mrb[47].mxu0  ;;  %5808 = vmatpush3.bf16.msra.mxu1 %v5805_v62 }
 0x438   :  { %v5809_v13 = vpack.c.bf16 %v5284_v3, %v1250_v10 }
 0x43a   :  { %5398 = vmatmul.mubr.msk.f32.vlgmr.msra.gmra.mrb[48].mxu0 %vm123_vm0, %v6755_v14  ;;  %5810 = vmatprep.subr.bf16.mxu1 %v5809_v13 }
 0x43b   :  { %5400 = vmatprep.mubr.msk.f32.mxu0 %vm123_vm0, %v6763_v19  ;;  %5856 = vmatpush3.bf16.msra.mxu0 %v5853_v33 }
 0x43c   :  { %5858 = vmatprep.subr.bf16.mxu0 %v5857_v12  ;;  %5812 = vmatpush3.bf16.msra.mxu1 %v5809_v13 }
 0x43d   :  { %5830 = vmatprep.subr.bf16.mxu1 %v5829_v17 }
 0x43e   :  { %5401 = vmatmul.mubr.msk.f32.gmra.mrb[50].mxu0 %vm123_vm0, %v6765_v21 }
 0x43f   :  { %5403 = vmatprep.mubr.msk.f32.mxu0 %vm123_vm0, %v6773_v30  ;;  %5860 = vmatpush3.bf16.msra.mxu0 %v5857_v12 }
 0x440   :  { %5862 = vmatprep.subr.bf16.mxu0 %v5861_v23  ;;  %5358 = vmatmul.mubr.msk.f32.vlgmr.msra.gmra.mrb[48].mxu1 %vm237_vm11, %v6662_v26  ;;  %v2291_v26 = vld [vmem:[%s8001_s14 + $0x18] sm:$0xff] }
 0x441   :  { %5832 = vmatpush3.bf16.msra.mxu1 %v5829_v17  ;;  %5360 = vmatprep.mubr.msk.f32.mxu1 %vm237_vm11, %v6668_v29  ;;  %v5865_v29 = vpack.c.bf16 %v2291_v26, %v2290_v31 }
 0x442   :  { %5404 = vmatmul.mubr.msk.f32.gmra.mrb[52].mxu0 %vm123_vm0, %v6775_v35  ;;  %5834 = vmatprep.subr.bf16.mxu1 %v5833_v27 }
 0x443   :  { %5406 = vmatprep.mubr.msk.f32.mxu0 %vm123_vm0, %v6783_v46 }
 0x444   :  { %5361 = vmatmul.mubr.msk.f32.gmra.mrb[50].mxu1 %vm237_vm11, %v6678_v34  ;;  %v2854_v34 = vpop.permute.xlu1 %2853 }
 0x445   :  { %5363 = vmatprep.mubr.msk.f32.mxu1 %vm237_vm11, %v6683_v38  ;;  %5836 = vmatpush3.bf16.msra.mxu1 %v5833_v27  ;;  %vm2900_vm4 = vcmp.eq.s32.totalorder %v6604_v52, %v2854_v34 }
 0x446   :  { %5407 = vmatmul.mubr.msk.f32.gmra.mrb[54].mxu0 %vm123_vm0, %v6785_v49  ;;  %v4648_v38 = vsel %vm2900_vm4, 1.0, %v8021_v8 }
 0x447   :  { %5465 = vmatprep.mubr.msk.f32.mxu0 %vm123_vm0, %v6902_v5 }
 0x448   :  { %5364 = vmatmul.mubr.msk.f32.gmra.mrb[52].mxu1 %vm237_vm11, %v6694_v42  ;;  %v5331_v42 = vpop.f32.mrb[40].mxu1 }
 0x449   :  { %5366 = vmatprep.mubr.msk.f32.mxu1 %vm237_vm11, %v6699_v45  ;;  %v1444_v45 = vpop.f32.mrb[41].mxu1  ;;  %v7044_v56 = vadd.f32 %v5331_v42, %v6892_v60 }
 0x44a   :  { %5466 = vmatmul.mubr.msk.f32.vlgmr.msra.gmra.mrb[56].mxu0 %vm123_vm0, %v6904_v7  ;;  %v7047_v57 = vadd.f32 %v6892_v60, %v1444_v45 }
 0x44b   :  { %5468 = vmatprep.mubr.msk.f32.mxu0 %vm123_vm0, %v6918_v20  ;;  %5864 = vmatpush3.bf16.msra.mxu0 %v5861_v23  ;;  %8063 = vst [vmem:[#allocation18_spill] sm:$0xff] %v7044_v56  ;;  %v8019_v62 = vmax.f32 %v7044_v56, 0.0  ;;  %v3406_v56 = vld [vmem:[%s8003_s16 + $0x8] sm:$0xff] }
 0x44c   :  { %5866 = vmatprep.subr.bf16.mxu0 %v5865_v29  ;;  %5367 = vmatmul.mubr.msk.f32.gmra.mrb[54].mxu1 %vm237_vm11, %v6714_v54  ;;  %v5334_v54 = vpop.f32.mrb[42].mxu1  ;;  %8064 = vst [vmem:[#allocation19_spill] sm:$0xff] %v7047_v57  ;;  %v8020_v63 = vmax.f32 %v7047_v57, 0.0 }
 0x44d   :  { %v1454_v33 = vpop.f32.mrb[43].mxu1  ;;  %v3887_v12 = vsel %vm123_vm0, %v8019_v62, 0.0  ;;  %v7071_v15 = vadd.f32 %v5334_v54, %v6892_v60 }
 0x44e   :  { %5469 = vmatmul.mubr.msk.f32.gmra.mrb[58].mxu0 %vm123_vm0, %v6920_v24  ;;  %v5337_v37 = vpop.f32.mrb[44].mxu1  ;;  %v7056_v2 = vadd.f32 %v6892_v60, %v1454_v33  ;;  %v3886_v13 = vsel %vm123_vm0, %v8020_v63, 0.0 }
 0x44f   :  { %5471 = vmatprep.mubr.msk.f32.mxu0 %vm123_vm0, %v6928_v43  ;;  %5868 = vmatpush3.bf16.msra.mxu0 %v5865_v29  ;;  %v1464_v39 = vpop.f32.mrb[45].mxu1  ;;  %8069 = vst [vmem:[#allocation24_spill] sm:$0xff] %v7071_v15  ;;  %v3888_v23 = vadd.f32 %v3887_v12, %v3886_v13  ;;  %v8016_v31 = vmax.f32 %v7071_v15, 0.0  ;;  %v7097_v54 = vadd.f32 %v5337_v37, %v6892_v60 }
 0x450   :  { %v5340_v41 = vpop.f32.mrb[46].mxu1  ;;  %8066 = vst [vmem:[#allocation21_spill] sm:$0xff] %v7056_v2  ;;  %v8017_v16 = vmax.f32 %v7056_v2, 0.0  ;;  %v7085_v29 = vadd.f32 %v6892_v60, %v1464_v39 }
 0x451   :  { %v1474_v47 = vpop.f32.mrb[47].mxu1  ;;  %v3891_v45 = vsel %vm123_vm0, %v8016_v31, 0.0  ;;  %8075 = vst [vmem:[#allocation30_spill] sm:$0xff] %v7097_v54 }
 0x452   :  { %5472 = vmatmul.mubr.msk.f32.gmra.mrb[60].mxu0 %vm123_vm0, %v6930_v53  ;;  %v3889_v26 = vsel %vm123_vm0, %v8017_v16, 0.0  ;;  %8072 = vst [vmem:[#allocation27_spill] sm:$0xff] %v7085_v29  ;;  %v8015_v33 = vmax.f32 %v7085_v29, 0.0 }
 0x453   :  { %5474 = vmatprep.mubr.msk.f32.mxu0 %vm123_vm0, %v6938_v58 }
 0x456   :  { %5475 = vmatmul.mubr.msk.f32.gmra.mrb[62].mxu0 %vm123_vm0, %v6940_v61 }
 0x457   :  { %5485 = vmatprep.mubr.msk.f32.mxu0 %vm123_vm0, %v6753_v11 }
 0x45a   :  { %5486 = vmatmul.mubr.msk.f32.vlgmr.msra.gmra.mrb[56].mxu0 %vm123_vm0, %v6755_v14 }
 0x45b   :  { %5488 = vmatprep.mubr.msk.f32.mxu0 %vm123_vm0, %v6763_v19 }
 0x45e   :  { %5489 = vmatmul.mubr.msk.f32.gmra.mrb[58].mxu0 %vm123_vm0, %v6765_v21 }
 0x45f   :  { %5491 = vmatprep.mubr.msk.f32.mxu0 %vm123_vm0, %v6773_v30 }
 0x462   :  { %5492 = vmatmul.mubr.msk.f32.gmra.mrb[60].mxu0 %vm123_vm0, %v6775_v35 }
 0x463   :  { %5494 = vmatprep.mubr.msk.f32.mxu0 %vm123_vm0, %v6783_v46 }
 0x466   :  { %5495 = vmatmul.mubr.msk.f32.gmra.mrb[62].mxu0 %vm123_vm0, %v6785_v49 }
 0x467   :  { %5553 = vmatprep.mubr.msk.f32.mxu0 %vm237_vm11, %v4648_v38  ;;  %v3890_v38 = vadd.f32 %v3889_v26, %v3888_v23 }
 0x469   :  { %v3892_v39 = vadd.f32 %v3891_v45, %v3890_v38 }
 0x50d   :  { %v5399_v50 = vpop.f32.mrb[48].mxu0 }
 0x50e   :  { %v1807_v55 = vpop.f32.mrb[49].mxu0 }
 0x50f   :  { %5417 = vmatprep.mubr.msk.f32.mxu1 %vm123_vm0, %v1807_v55  ;;  %v8013_v55 = vmax.f32 %v7097_v54, 0.0 }
 0x510   :  { %5418 = vmatmul.mubr.msk.f32.vlgmr.msra.gmra.mrb[56].mxu1 %vm123_vm0, %v5399_v50 }
 0x511   :  { %v5402_v1 = vpop.f32.mrb[50].mxu0  ;;  %v3895_v37 = vsel %vm123_vm0, %v8013_v55, 0.0 }
 0x512   :  { %v1817_v0 = vpop.f32.mrb[51].mxu0 }
 0x513   :  { %5420 = vmatprep.mubr.msk.f32.mxu1 %vm123_vm0, %v1817_v0  ;;  %v7050_v59 = vpop.f32.mrb[48].mxu1 }
 0x514   :  { %8065 = vst [vmem:[#allocation20_spill] sm:$0xff] %v7050_v59  ;;  %5421 = vmatmul.mubr.msk.f32.gmra.mrb[58].mxu1 %vm123_vm0, %v5402_v1  ;;  %v7058_v3 = vpop.f32.mrb[49].mxu1  ;;  %v7107_v1 = vadd.f32 %v6892_v60, %v1474_v47 }
 0x515   :  { %8067 = vst [vmem:[#allocation22_spill] sm:$0xff] %v7058_v3  ;;  %v5405_v4 = vpop.f32.mrb[52].mxu0  ;;  %v2300_v3 = vld [vmem:[%s8001_s14 + $0x60] sm:$0xff] }
 0x516   :  { %v1827_v6 = vpop.f32.mrb[53].mxu0  ;;  %8077 = vst [vmem:[#allocation32_spill] sm:$0xff] %v7107_v1 }
 0x517   :  { %5423 = vmatprep.mubr.msk.f32.mxu1 %vm123_vm0, %v1827_v6  ;;  %v7061_v10 = vpop.f32.mrb[50].mxu1  ;;  %v8014_v6 = vmax.f32 %v7107_v1, 0.0 }
 0x518   :  { %8068 = vst [vmem:[#allocation23_spill] sm:$0xff] %v7061_v10  ;;  %5424 = vmatmul.mubr.msk.f32.gmra.mrb[60].mxu1 %vm123_vm0, %v5405_v4  ;;  %v7074_v17 = vpop.f32.mrb[51].mxu1  ;;  %v7113_v4 = vadd.f32 %v5340_v41, %v6892_v60 }
 0x519   :  { %8070 = vst [vmem:[#allocation25_spill] sm:$0xff] %v7074_v17  ;;  %v5408_v18 = vpop.f32.mrb[54].mxu0 }
 0x51a   :  { %v1837_v22 = vpop.f32.mrb[55].mxu0  ;;  %8078 = vst [vmem:[#allocation33_spill] sm:$0xff] %v7113_v4  ;;  %v8018_v13 = vmax.f32 %v7113_v4, 0.0 }
 0x51b   :  { %5426 = vmatprep.mubr.msk.f32.mxu1 %vm123_vm0, %v1837_v22  ;;  %v7077_v27 = vpop.f32.mrb[52].mxu1 }
 0x51c   :  { %8071 = vst [vmem:[#allocation26_spill] sm:$0xff] %v7077_v27  ;;  %5427 = vmatmul.mubr.msk.f32.gmra.mrb[62].mxu1 %vm123_vm0, %v5408_v18  ;;  %v7087_v34 = vpop.f32.mrb[53].mxu1  ;;  %v3897_v18 = vsel %vm123_vm0, %v8014_v6, 0.0  ;;  %v3899_v38 = vsel %vm123_vm0, %v8018_v13, 0.0 }
 0x51d   :  { %8073 = vst [vmem:[#allocation28_spill] sm:$0xff] %v7087_v34  ;;  %5445 = vmatprep.mubr.msk.f32.mxu1 %vm237_vm11, %v6655_v9  ;;  %v3893_v9 = vsel %vm123_vm0, %v8015_v33, 0.0 }
 0x51e   :  { %v3894_v0 = vadd.f32 %v3893_v9, %v3892_v39 }
 0x51f   :  { %v7091_v42 = vpop.f32.mrb[54].mxu1 }
 0x520   :  { %8074 = vst [vmem:[#allocation29_spill] sm:$0xff] %v7091_v42  ;;  %v7100_v50 = vpop.f32.mrb[55].mxu1  ;;  %v3896_v12 = vadd.f32 %v3895_v37, %v3894_v0 }
 0x521   :  { %8076 = vst [vmem:[#allocation31_spill] sm:$0xff] %v7100_v50 }
 0x522   :  { %v3898_v26 = vadd.f32 %v3897_v18, %v3896_v12 }
 0x524   :  { %v3900_v39 = vadd.f32 %v3899_v38, %v3898_v26  ;;  %v3916_v38 = vld [vmem:[%s8005_s18 + $0x8] sm:$0xff] }
 0x526   :  { %v3901_v55 = vrot.slane %v3900_v39, 4 }
 0x52d   :  { %v5487_v22 = vpop.f32.mrb[56].mxu0 }
 0x52e   :  { %v2475_v47 = vpop.f32.mrb[57].mxu0 }
 0x52f   :  { %v7120_v23 = vpack.c.bf16 %v5487_v22, %v2475_v47  ;;  %v3902_v22 = vadd.f32 %v3901_v55, %v3900_v39 }
 0x531   :  { %v5490_v60 = vpop.f32.mrb[58].mxu0  ;;  %v3903_v12 = vrot.slane %v3902_v22, 2 }
 0x532   :  { %v2485_v41 = vpop.f32.mrb[59].mxu0 }
 0x533   :  { %v7125_v45 = vpack.c.bf16 %v5490_v60, %v2485_v41  ;;  %v3904_v18 = vadd.f32 %v3903_v12, %v3902_v22 }
 0x535   :  { %v5493_v9 = vpop.f32.mrb[60].mxu0  ;;  %v3905_v47 = vrot.slane %v3904_v18, 1 }
 0x536   :  { %v2495_v0 = vpop.f32.mrb[61].mxu0 }
 0x537   :  { %v7127_v37 = vpack.c.bf16 %v5493_v9, %v2495_v0  ;;  %v3906_v16 = vadd.f32 %v3905_v47, %v3904_v18  ;;  %v7150_v18 = vld [vmem:[%s8052_s29 + $0x8] sm:$0xff] }
 0x538   :  { %v2148_v47 = vmul.f32 %v7150_v18, %v7150_v18 }
 0x539   :  { %v5496_v6 = vpop.f32.mrb[62].mxu0  ;;  %v4714_v13 = vmul.f32 -0.015625, %v3906_v16 }
 0x53a   :  { %v2505_v33 = vpop.f32.mrb[63].mxu0 }
 0x53b   :  { %v7129_v31 = vpack.c.bf16 %v5496_v6, %v2505_v33  ;;  %v3910_v62 = vmul.f32 1.442695, %v4714_v13  ;;  %v3915_v33 = vld [vmem:[%s8005_s18] sm:$0xff]  ;;  %v3918_v13 = vld [vmem:[%s8005_s18 + $0x18] sm:$0xff] }
 0x53d   :  { %5996 = vpow2.f32 %v3910_v62  ;;  %v3917_v62 = vld [vmem:[%s8005_s18 + $0x10] sm:$0xff] }
 0x547   :  { %v5997_v60 = vpop.eup %5996 }
 0x548   :  { %v3912_v41 = vadd.f32 1.0, %v5997_v60  ;;  %v7157_v60 = vld [vmem:[%s8052_s29 + $0x10] sm:$0xff] }
 0x54a   :  { %5998 = vrcp.f32 %v3912_v41  ;;  %v2149_v41 = vmul.f32 %v7157_v60, %v7157_v60 }
 0x554   :  { %v5999_v26 = vpop.eup %5998 }
 0x555   :  { %v3920_v55 = vmul.f32 %v5999_v26, %v3916_v38  ;;  %v3919_v6 = vmul.f32 %v5999_v26, %v3915_v33  ;;  %v3921_v9 = vmul.f32 %v5999_v26, %v3917_v62  ;;  %v3922_v0 = vmul.f32 %v5999_v26, %v3918_v13  ;;  %v7166_v33 = vld [vmem:[%s8052_s29 + $0x18] sm:$0xff]  ;;  %v7175_v62 = vpop.permute.xlu1 %2859 }
 0x556   :  { %v2158_v26 = vsel %vm371_vm9, %v2148_v47, 0.0  ;;  %v2161_v38 = vsel %vm371_vm9, %v2149_v41, 0.0  ;;  %vm2902_vm6 = vcmp.eq.s32.totalorder %v6604_v52, %v7175_v62 }
 0x557   :  { %v3926_v39 = vsel %vm123_vm0, %v3920_v55, 0.0  ;;  %v3923_v16 = vsel %vm123_vm0, %v3919_v6, 0.0  ;;  %v3929_v22 = vsel %vm123_vm0, %v3921_v9, 0.0  ;;  %v3932_v12 = vsel %vm123_vm0, %v3922_v0, 0.0 }
 0x558   :  { %3927 = vadd.xlane.f32.xlu0 %v3926_v39  ;;  %3924 = vadd.xlane.f32.xlu1 %v3923_v16  ;;  %v2150_v55 = vmul.f32 %v7166_v33, %v7166_v33  ;;  %v7171_v39 = vpop.permute.xlu0 %2856 }
 0x559   :  { %v7179_v9 = vpop.permute.xlu1 %2865  ;;  %vm2901_vm5 = vcmp.eq.s32.totalorder %v6604_v52, %v7171_v39 }
 0x55a   :  { %v2164_v6 = vsel %vm371_vm9, %v2150_v55, 0.0  ;;  %vm2904_vm8 = vcmp.eq.s32.totalorder %v6604_v52, %v7179_v9 }
 0x55c   :  { %3930 = vadd.xlane.f32.xlu0 %v3929_v22  ;;  %3933 = vadd.xlane.f32.xlu1 %v3932_v12  ;;  %v7173_v16 = vpop.permute.xlu0 %2862 }
 0x55d   :  { %v7183_v22 = vpop.permute.xlu1 %2871  ;;  %vm2903_vm7 = vcmp.eq.s32.totalorder %v6604_v52, %v7173_v16 }
 0x55e   :  { %vm2906_vm12 = vcmp.eq.s32.totalorder %v6604_v52, %v7183_v22 }
 0x560   :  { %2159 = vadd.xlane.f32.xlu1 %v2158_v26  ;;  %v7177_v13 = vpop.permute.xlu0 %2868 }
 0x561   :  { %v7187_v47 = vpop.permute.xlu1 %2877  ;;  %vm2905_vm10 = vcmp.eq.s32.totalorder %v6604_v52, %v7177_v13 }
 0x562   :  { %vm2908_vm14 = vcmp.eq.s32.totalorder %v6604_v52, %v7187_v47 }
 0x564   :  { %2162 = vadd.xlane.f32.xlu1 %v2161_v38  ;;  %v7181_v0 = vpop.permute.xlu0 %2874 }
 0x565   :  { %v7191_v26 = vpop.permute.xlu1 %2883  ;;  %vm2907_vm13 = vcmp.eq.s32.totalorder %v6604_v52, %v7181_v0 }
 0x566   :  { %vm2910_vm1 = vcmp.eq.s32.totalorder %v6604_v52, %v7191_v26 }
 0x568   :  { %2165 = vadd.xlane.f32.xlu1 %v2164_v6  ;;  %v7185_v12 = vpop.permute.xlu0 %2880 }
 0x569   :  { %v7195_v55 = vpop.permute.xlu1 %2889  ;;  %vm2909_vm15 = vcmp.eq.s32.totalorder %v6604_v52, %v7185_v12 }
 0x56a   :  { %vm2912_vm3 = vcmp.eq.s32.totalorder %v6604_v52, %v7195_v55 }
 0x56c   :  { %v7189_v41 = vpop.permute.xlu0 %2886 }
 0x56d   :  { %v7199_v8 = vpop.permute.xlu1 %2895  ;;  %vm2911_vm2 = vcmp.eq.s32.totalorder %v6604_v52, %v7189_v41 }
 0x570   :  { %v7193_v38 = vpop.permute.xlu0 %2892 }
 0x571   :  { %v7203_v17 = vpop.permute.xlu1 %2741  ;;  %vm2913_vm4 = vcmp.eq.s32.totalorder %v6604_v52, %v7193_v38 }
 0x574   :  { %v7197_v6 = vpop.permute.xlu0 %2898 }
 0x578   :  { %v7201_v10 = vpop.permute.xlu0 %2744 }
 0x5e3   :  { %v5419_v63 = vpop.f32.mrb[56].mxu1 }
 0x5e4   :  { %v1940_v42 = vpop.f32.mrb[57].mxu1 }
 0x5e5   :  { %v5837_v50 = vpack.c.bf16 %v5419_v63, %v1940_v42  ;;  %v2301_v63 = vld [vmem:[%s8001_s14 + $0x68] sm:$0xff]  ;;  %v7211_v42 = vpop.permute.xlu0 %2750 }
 0x5e6   :  { %v5869_v15 = vpack.c.bf16 %v2301_v63, %v2300_v3  ;;  %v2296_v3 = vld [vmem:[%s8001_s14 + $0x40] sm:$0xff]  ;;  %v6163_v63 = vld [vmem:[%s8062_s23 + $0x8] sm:$0xff] }
 0x5e7   :  { %v5422_v27 = vpop.f32.mrb[58].mxu1  ;;  %5838 = vmatprep.subr.bf16.mxu1 %v5837_v50 }
 0x5e8   :  { %v1950_v34 = vpop.f32.mrb[59].mxu1  ;;  %5840 = vmatpush3.bf16.msra.mxu1 %v5837_v50 }
 0x5e9   :  { %v5841_v4 = vpack.c.bf16 %v5422_v27, %v1950_v34  ;;  %v7213_v27 = vpop.permute.xlu1 %2747  ;;  %v7221_v51 = vpop.permute.xlu0 %2756 }
 0x5eb   :  { %v5425_v59 = vpop.f32.mrb[60].mxu1  ;;  %5842 = vmatprep.subr.bf16.mxu1 %v5841_v4 }
 0x5ec   :  { %v1960_v1 = vpop.f32.mrb[61].mxu1  ;;  %5844 = vmatpush3.bf16.msra.mxu1 %v5841_v4 }
 0x5ed   :  { %v5845_v54 = vpack.c.bf16 %v5425_v59, %v1960_v1  ;;  %v2302_v59 = vld [vmem:[%s8001_s14 + $0x70] sm:$0xff]  ;;  %v2303_v1 = vld [vmem:[%s8001_s14 + $0x78] sm:$0xff]  ;;  %v7223_v2 = vpop.permute.xlu1 %2753 }
 0x5ee   :  { %v5873_v4 = vpack.c.bf16 %v2303_v1, %v2302_v59  ;;  %v7243_v59 = vpop.permute.xlu0 %2762 }
 0x5ef   :  { %v5428_v50 = vpop.f32.mrb[62].mxu1  ;;  %5846 = vmatprep.subr.bf16.mxu1 %v5845_v54 }
 0x5f0   :  { %v1970_v34 = vpop.f32.mrb[63].mxu1  ;;  %5848 = vmatpush3.bf16.msra.mxu1 %v5845_v54  ;;  %v2297_v54 = vld [vmem:[%s8001_s14 + $0x48] sm:$0xff] }
 0x5f1   :  { %v5849_v29 = vpack.c.bf16 %v5428_v50, %v1970_v34  ;;  %v5877_v50 = vpack.c.bf16 %v2297_v54, %v2296_v3  ;;  %v6165_v34 = vld [vmem:[%s8062_s23 + $0x18] sm:$0xff]  ;;  %v7245_v1 = vpop.permute.xlu1 %2759  ;;  %v6167_v3 = vld [vmem:[%s8062_s23 + $0x28] sm:$0xff]  ;;  %v6168_v54 = vld [vmem:[%s8062_s23 + $0x30] sm:$0xff] }
 0x5f3   :  { %5850 = vmatprep.subr.bf16.mxu1 %v5849_v29 }
 0x5f4   :  { %5852 = vmatpush3.bf16.msra.mxu1 %v5849_v29  ;;  %v6164_v29 = vld [vmem:[%s8062_s23 + $0x10] sm:$0xff] }
 0x5f5   :  { %5870 = vmatprep.subr.bf16.mxu1 %v5869_v15 }
 0x5f7   :  { %5446 = vmatmul.mubr.msk.f32.vlgmr.msra.gmra.mrb[64].mxu1 %vm237_vm11, %v6163_v63  ;;  %v7259_v63 = vpop.permute.xlu0 %2768 }
 0x5f8   :  { %5872 = vmatpush3.bf16.msra.mxu1 %v5869_v15  ;;  %5448 = vmatprep.mubr.msk.f32.mxu1 %vm237_vm11, %v6164_v29  ;;  %v6166_v15 = vld [vmem:[%s8062_s23 + $0x20] sm:$0xff]  ;;  %v7261_v29 = vpop.permute.xlu1 %2765 }
 0x5f9   :  { %5874 = vmatprep.subr.bf16.mxu1 %v5873_v4 }
 0x5fb   :  { %5449 = vmatmul.mubr.msk.f32.gmra.mrb[66].mxu1 %vm237_vm11, %v6165_v34  ;;  %v2299_v34 = vld [vmem:[%s8001_s14 + $0x58] sm:$0xff]  ;;  %v7283_v48 = vpop.permute.xlu0 %2774 }
 0x5fc   :  { %5451 = vmatprep.mubr.msk.f32.mxu1 %vm237_vm11, %v6166_v15  ;;  %5876 = vmatpush3.bf16.msra.mxu1 %v5873_v4  ;;  %v2298_v4 = vld [vmem:[%s8001_s14 + $0x50] sm:$0xff]  ;;  %v6169_v15 = vld [vmem:[%s8062_s23 + $0x38] sm:$0xff]  ;;  %v7285_v57 = vpop.permute.xlu1 %2771 }
 0x5fd   :  { %5878 = vmatprep.subr.bf16.mxu1 %v5877_v50 }
 0x5ff   :  { %5452 = vmatmul.mubr.msk.f32.gmra.mrb[68].mxu1 %vm237_vm11, %v6167_v3  ;;  %v5881_v3 = vpack.c.bf16 %v2299_v34, %v2298_v4  ;;  %v7293_v4 = vpop.permute.xlu0 %2780 }
 0x600   :  { %5454 = vmatprep.mubr.msk.f32.mxu1 %vm237_vm11, %v6168_v54  ;;  %v3405_v54 = vld [vmem:[%s8003_s16] sm:$0xff] }
 0x603   :  { %5455 = vmatmul.mubr.msk.f32.gmra.mrb[70].mxu1 %vm237_vm11, %v6169_v15 }
 0x604   :  { %5505 = vmatprep.mubr.msk.f32.mxu1 %vm123_vm0, %v6902_v5  ;;  %v5917_v5 = vpack.c.bf16 %v3406_v56, %v3405_v54 }
 0x607   :  { %5506 = vmatmul.mubr.msk.f32.vlgmr.msra.gmra.mrb[72].mxu1 %vm123_vm0, %v6904_v7  ;;  %v7295_v7 = vpop.permute.xlu1 %2777 }
 0x608   :  { %5508 = vmatprep.mubr.msk.f32.mxu1 %vm123_vm0, %v6918_v20  ;;  %5880 = vmatpush3.bf16.msra.mxu1 %v5877_v50  ;;  %v3407_v20 = vld [vmem:[%s8003_s16 + $0x10] sm:$0xff] }
 0x609   :  { %5882 = vmatprep.subr.bf16.mxu1 %v5881_v3 }
 0x60b   :  { %5509 = vmatmul.mubr.msk.f32.gmra.mrb[74].mxu1 %vm123_vm0, %v6920_v24  ;;  %v3408_v24 = vld [vmem:[%s8003_s16 + $0x18] sm:$0xff]  ;;  %v7311_v56 = vpop.permute.xlu1 %2783 }
 0x60c   :  { %5511 = vmatprep.mubr.msk.f32.mxu1 %vm123_vm0, %v6928_v43  ;;  %5884 = vmatpush3.bf16.msra.mxu1 %v5881_v3  ;;  %v7309_v43 = vpop.permute.xlu0 %2786 }
 0x60d   :  { %5918 = vmatprep.subr.bf16.mxu1 %v5917_v5 }
 0x60f   :  { %5512 = vmatmul.mubr.msk.f32.gmra.mrb[76].mxu1 %vm123_vm0, %v6930_v53  ;;  %v5921_v53 = vpack.c.bf16 %v3408_v24, %v3407_v20  ;;  %v3925_v50 = vpop.xlane.xlu1 %3924 }
 0x610   :  { %5514 = vmatprep.mubr.msk.f32.mxu1 %vm123_vm0, %v6938_v58  ;;  %v3928_v58 = vpop.xlane.xlu0 %3927 }
 0x611   :  { %v7319_v34 = vpack.c.bf16 %v3928_v58, %v3925_v50 }
 0x613   :  { %5515 = vmatmul.mubr.msk.f32.gmra.mrb[78].mxu1 %vm123_vm0, %v6940_v61  ;;  %8079 = vst [vmem:[#allocation34_spill] sm:$0xff] %v7319_v34 }
 0x614   :  { %5525 = vmatprep.mubr.msk.f32.mxu1 %vm123_vm0, %v6753_v11  ;;  %v7335_v11 = vld [vmem:[%s8052_s29 + $0x20] sm:$0xff] }
 0x617   :  { %5526 = vmatmul.mubr.msk.f32.vlgmr.msra.gmra.mrb[72].mxu1 %vm123_vm0, %v6755_v14  ;;  %v2151_v14 = vmul.f32 %v7335_v11, %v7335_v11 }
 0x618   :  { %5528 = vmatprep.mubr.msk.f32.mxu1 %vm123_vm0, %v6763_v19  ;;  %5920 = vmatpush3.bf16.msra.mxu1 %v5917_v5  ;;  %v7342_v19 = vld [vmem:[%s8052_s29] sm:$0xff]  ;;  %v7360_v5 = vld [vmem:[%s8052_s29 + $0x28] sm:$0xff] }
 0x619   :  { %5922 = vmatprep.subr.bf16.mxu1 %v5921_v53  ;;  %v2152_v20 = vmul.f32 %v7360_v5, %v7360_v5 }
 0x61b   :  { %5529 = vmatmul.mubr.msk.f32.gmra.mrb[74].mxu1 %vm123_vm0, %v6765_v21  ;;  %v2147_v21 = vmul.f32 %v7342_v19, %v7342_v19 }
 0x61c   :  { %5531 = vmatprep.mubr.msk.f32.mxu1 %vm123_vm0, %v6773_v30  ;;  %5924 = vmatpush3.bf16.msra.mxu1 %v5921_v53  ;;  %v2167_v30 = vsel %vm371_vm9, %v2151_v14, 0.0 }
 0x61d   :  { %5926 = vmatprep.subr.bf16.mxu1 %v7319_v34  ;;  %2168 = vadd.xlane.f32.xlu1 %v2167_v30 }
 0x61f   :  { %5532 = vmatmul.mubr.msk.f32.gmra.mrb[76].mxu1 %vm123_vm0, %v6775_v35  ;;  %v2155_v35 = vsel %vm371_vm9, %v2147_v21, 0.0 }
 0x620   :  { %5534 = vmatprep.mubr.msk.f32.mxu1 %vm123_vm0, %v6783_v46  ;;  %2156 = vadd.xlane.f32.xlu0 %v2155_v35  ;;  %v4591_v46 = vld [vmem:[%s8000_s13] ss:$0 sm:$0xff] }
 0x623   :  { %5535 = vmatmul.mubr.msk.f32.gmra.mrb[78].mxu1 %vm123_vm0, %v6785_v49 }
 0x6ca   :  { %v5447_v49 = vpop.f32.mrb[64].mxu1 }
 0x6cb   :  { %v7351_v61 = vadd.f32 %v5447_v49, %v4591_v46  ;;  %v2052_v15 = vpop.f32.mrb[65].mxu1  ;;  %v2170_v49 = vsel %vm371_vm9, %v2152_v20, 0.0 }
 0x6cc   :  { %v7353_v3 = vadd.f32 %v4591_v46, %v2052_v15  ;;  %v7378_v15 = vld [vmem:[%s8052_s29 + $0x30] sm:$0xff] }
 0x6cd   :  { %v2092_v54 = vmul.f32 %v7351_v61, %v7351_v61 }
 0x6ce   :  { %v5450_v24 = vpop.f32.mrb[66].mxu1  ;;  %v2091_v53 = vmul.f32 %v7353_v3, %v7353_v3 }
 0x6cf   :  { %v7366_v58 = vadd.f32 %v5450_v24, %v4591_v46  ;;  %v2062_v50 = vpop.f32.mrb[67].mxu1  ;;  %v2102_v14 = vsel %vm371_vm9, %v2092_v54, 0.0  ;;  %v2153_v24 = vmul.f32 %v7378_v15, %v7378_v15 }
 0x6d0   :  { %v7369_v21 = vadd.f32 %v4591_v46, %v2062_v50  ;;  %2103 = vadd.xlane.f32.xlu1 %v2102_v14  ;;  %v2099_v30 = vsel %vm371_vm9, %v2091_v53, 0.0 }
 0x6d1   :  { %2100 = vadd.xlane.f32.xlu0 %v2099_v30  ;;  %v2094_v35 = vmul.f32 %v7366_v58, %v7366_v58  ;;  %v2173_v20 = vsel %vm371_vm9, %v2153_v24, 0.0  ;;  %v7391_v30 = vld [vmem:[%s8052_s29 + $0x38] sm:$0xff] }
 0x6d2   :  { %v5453_v54 = vpop.f32.mrb[68].mxu1  ;;  %v2093_v53 = vmul.f32 %v7369_v21, %v7369_v21  ;;  %8080 = vst [vmem:[#allocation35_spill] sm:$0xff] %v7391_v30  ;;  %v2154_v44 = vmul.f32 %v7391_v30, %v7391_v30 }
 0x6d3   :  { %v2072_v50 = vpop.f32.mrb[69].mxu1  ;;  %v2108_v14 = vsel %vm371_vm9, %v2094_v35, 0.0  ;;  %v7383_v40 = vadd.f32 %v5453_v54, %v4591_v46 }
 0x6d4   :  { %2171 = vadd.xlane.f32.xlu1 %v2170_v49  ;;  %v7395_v35 = vadd.f32 %v4591_v46, %v2072_v50  ;;  %v2105_v54 = vsel %vm371_vm9, %v2093_v53, 0.0  ;;  %v2176_v24 = vsel %vm371_vm9, %v2154_v44, 0.0 }
 0x6d5   :  { %2109 = vadd.xlane.f32.xlu0 %v2108_v14  ;;  %v2096_v49 = vmul.f32 %v7383_v40, %v7383_v40 }
 0x6d6   :  { %v5456_v36 = vpop.f32.mrb[70].mxu1  ;;  %v2095_v32 = vmul.f32 %v7395_v35, %v7395_v35 }
 0x6d7   :  { %v2082_v28 = vpop.f32.mrb[71].mxu1  ;;  %v2114_v25 = vsel %vm371_vm9, %v2096_v49, 0.0  ;;  %v7406_v50 = vadd.f32 %v5456_v36, %v4591_v46 }
 0x6d8   :  { %2174 = vadd.xlane.f32.xlu1 %v2173_v20  ;;  %v7401_v14 = vadd.f32 %v4591_v46, %v2082_v28  ;;  %v2111_v53 = vsel %vm371_vm9, %v2095_v32, 0.0 }
 0x6d9   :  { %2106 = vadd.xlane.f32.xlu0 %v2105_v54  ;;  %8081 = vst [vmem:[#allocation36_spill] sm:$0xff] %v7406_v50  ;;  %v2098_v28 = vmul.f32 %v7406_v50, %v7406_v50 }
 0x6da   :  { %v2097_v34 = vmul.f32 %v7401_v14, %v7401_v14 }
 0x6db   :  { %v2120_v44 = vsel %vm371_vm9, %v2098_v28, 0.0  ;;  %v8082_v28 = vmov 0.0  }
 0x6dc   :  { %2177 = vadd.xlane.f32.xlu1 %v2176_v24  ;;  %v2117_v20 = vsel %vm371_vm9, %v2097_v34, 0.0  ;;  %v4651_v39 = vsel %vm2903_vm7, 1.0, %v8082_v28  ;;  %v4652_v16 = vsel %vm2904_vm8, 1.0, %v8082_v28  ;;  %v4654_v62 = vsel %vm2906_vm12, 1.0, %v8082_v28 }
 0x6dd   :  { %2115 = vadd.xlane.f32.xlu0 %v2114_v25  ;;  %v4656_v13 = vsel %vm2908_vm14, 1.0, %v8082_v28  ;;  %v4658_v9 = vsel %vm2910_vm1, 1.0, %v8082_v28  ;;  %v4659_v0 = vsel %vm2911_vm2, 1.0, %v8082_v28  ;;  %v4661_v22 = vsel %vm2913_vm4, 1.0, %v8082_v28 }
 0x6de   :  { %vm2788_vm7 = vcmp.eq.s32.totalorder %v6604_v52, %v7203_v17  ;;  %vm2789_vm8 = vcmp.eq.s32.totalorder %v6604_v52, %v7201_v10  ;;  %vm2791_vm12 = vcmp.eq.s32.totalorder %v6604_v52, %v7211_v42  ;;  %vm2793_vm14 = vcmp.eq.s32.totalorder %v6604_v52, %v7221_v51 }
 0x6df   :  { %v4633_v41 = vsel %vm2789_vm8, 1.0, %v8082_v28  ;;  %v4635_v10 = vsel %vm2791_vm12, 1.0, %v8082_v28  ;;  %v4637_v38 = vsel %vm2793_vm14, 1.0, %v8082_v28  ;;  %vm2795_vm1 = vcmp.eq.s32.totalorder %v6604_v52, %v7243_v59 }
 0x6e0   :  { %vm2796_vm2 = vcmp.eq.s32.totalorder %v6604_v52, %v7261_v29  ;;  %v4639_v51 = vsel %vm2795_vm1, 1.0, %v8082_v28  ;;  %vm2798_vm4 = vcmp.eq.s32.totalorder %v6604_v52, %v7285_v57  ;;  %vm2802_vm8 = vcmp.eq.s32.totalorder %v6604_v52, %v7311_v56  ;;  %v7549_v56 = vpop.xlane.xlu0 %3930 }
 0x6e1   :  { %2112 = vadd.xlane.f32.xlu0 %v2111_v53  ;;  %v4640_v55 = vsel %vm2796_vm2, 1.0, %v8082_v28  ;;  %v4642_v42 = vsel %vm2798_vm4, 1.0, %v8082_v28  ;;  %v4646_v59 = vsel %vm2802_vm8, 1.0, %v8082_v28 }
 0x6e5   :  { %2118 = vadd.xlane.f32.xlu0 %v2117_v20 }
 0x6e9   :  { %2121 = vadd.xlane.f32.xlu0 %v2120_v44  ;;  %v4649_v44 = vsel %vm2901_vm5, 1.0, %v8082_v28  ;;  %vm2914_vm5 = vcmp.eq.s32.totalorder %v6604_v52, %v7199_v8  ;;  %v4632_v8 = vsel %vm2788_vm7, 1.0, %v8082_v28  ;;  %vm2801_vm7 = vcmp.eq.s32.totalorder %v6604_v52, %v7293_v4 }
 0x6ea   :  { %v5527_v54 = vpop.f32.mrb[72].mxu1  ;;  %v4662_v12 = vsel %vm2914_vm5, 1.0, %v8082_v28  ;;  %vm2799_vm5 = vcmp.eq.s32.totalorder %v6604_v52, %v7283_v48  ;;  %v4645_v48 = vsel %vm2801_vm7, 1.0, %v8082_v28 }
 0x6eb   :  { %v2685_v49 = vpop.f32.mrb[73].mxu1 }
 0x6ec   :  { %v5885_v25 = vpack.c.bf16 %v5527_v54, %v2685_v49  ;;  %v4650_v54 = vsel %vm2902_vm6, 1.0, %v8082_v28  ;;  %vm2915_vm6 = vcmp.eq.s32.totalorder %v6604_v52, %v7197_v6 }
 0x6ed   :  { %v4663_v47 = vsel %vm2915_vm6, 1.0, %v8082_v28  ;;  %vm2800_vm6 = vcmp.eq.s32.totalorder %v6604_v52, %v7295_v7 }
 0x6ee   :  { %v5530_v36 = vpop.f32.mrb[74].mxu1  ;;  %5886 = vmatprep.subr.bf16.mxu0 %v5885_v25  ;;  %v4644_v57 = vsel %vm2800_vm6, 1.0, %v8082_v28 }
 0x6ef   :  { %v2695_v46 = vpop.f32.mrb[75].mxu1  ;;  %5888 = vmatpush3.bf16.msra.mxu0 %v5885_v25 }
 0x6f0   :  { %v5889_v32 = vpack.c.bf16 %v5530_v36, %v2695_v46 }
 0x6f2   :  { %v5533_v24 = vpop.f32.mrb[76].mxu1  ;;  %5890 = vmatprep.subr.bf16.mxu0 %v5889_v32 }
 0x6f3   :  { %v2705_v53 = vpop.f32.mrb[77].mxu1  ;;  %5892 = vmatpush3.bf16.msra.mxu0 %v5889_v32 }
 0x6f4   :  { %v5893_v34 = vpack.c.bf16 %v5533_v24, %v2705_v53 }
 0x6f6   :  { %v5536_v30 = vpop.f32.mrb[78].mxu1  ;;  %5894 = vmatprep.subr.bf16.mxu0 %v5893_v34 }
 0x6f7   :  { %v2715_v50 = vpop.f32.mrb[79].mxu1  ;;  %5896 = vmatpush3.bf16.msra.mxu0 %v5893_v34 }
 0x6f8   :  { %v5897_v20 = vpack.c.bf16 %v5536_v30, %v2715_v50 }
 0x6fa   :  { %5898 = vmatprep.subr.bf16.mxu0 %v5897_v20 }
 0x6fb   :  { %5900 = vmatpush3.bf16.msra.mxu0 %v5897_v20 }
 0x6fc   :  { %5902 = vmatprep.subr.bf16.mxu0 %v7120_v23 }
 0x6fe   :  { %5554 = vmatmul.mubr.msk.f32.vlgmr.msra.gmra.mrb[64].mxu0 %vm237_vm11, %v4649_v44 }
 0x6ff   :  { %5556 = vmatprep.mubr.msk.f32.mxu0 %vm237_vm11, %v4650_v54  ;;  %5904 = vmatpush3.bf16.msra.mxu0 %v7120_v23  ;;  %v4653_v23 = vsel %vm2905_vm10, 1.0, %v8082_v28  ;;  %vm2790_vm10 = vcmp.eq.s32.totalorder %v6604_v52, %v7213_v27  ;;  %v4643_v27 = vsel %vm2799_vm5, 1.0, %v8082_v28  ;;  %vm2259_vm5 = vcmask 7168  }
 0x700   :  { %5906 = vmatprep.subr.bf16.mxu0 %v7125_v45  ;;  %v4634_v17 = vsel %vm2790_vm10, 1.0, %v8082_v28  ;;  %vm2803_vm10 = vcmp.eq.s32.totalorder %v6604_v52, %v7309_v43 }
 0x702   :  { %5557 = vmatmul.mubr.msk.f32.gmra.mrb[66].mxu0 %vm237_vm11, %v4651_v39 }
 0x703   :  { %5559 = vmatprep.mubr.msk.f32.mxu0 %vm237_vm11, %v4652_v16  ;;  %5908 = vmatpush3.bf16.msra.mxu0 %v7125_v45  ;;  %v4655_v45 = vsel %vm2907_vm13, 1.0, %v8082_v28  ;;  %vm2792_vm13 = vcmp.eq.s32.totalorder %v6604_v52, %v7223_v2 }
 0x704   :  { %5910 = vmatprep.subr.bf16.mxu0 %v7127_v37  ;;  %v4636_v26 = vsel %vm2792_vm13, 1.0, %v8082_v28 }
 0x706   :  { %5560 = vmatmul.mubr.msk.f32.gmra.mrb[68].mxu0 %vm237_vm11, %v4653_v23 }
 0x707   :  { %5562 = vmatprep.mubr.msk.f32.mxu0 %vm237_vm11, %v4654_v62  ;;  %5912 = vmatpush3.bf16.msra.mxu0 %v7127_v37  ;;  %v4657_v37 = vsel %vm2909_vm15, 1.0, %v8082_v28  ;;  %vm2794_vm15 = vcmp.eq.s32.totalorder %v6604_v52, %v7245_v1  ;;  %v4647_v1 = vsel %vm2803_vm10, 1.0, %v8082_v28 }
 0x708   :  { %5914 = vmatprep.subr.bf16.mxu0 %v7129_v31  ;;  %v4638_v2 = vsel %vm2794_vm15, 1.0, %v8082_v28 }
 0x70a   :  { %5563 = vmatmul.mubr.msk.f32.gmra.mrb[70].mxu0 %vm237_vm11, %v4655_v45 }
 0x70b   :  { %5565 = vmatprep.mubr.msk.f32.mxu0 %vm237_vm11, %v4656_v13  ;;  %5916 = vmatpush3.bf16.msra.mxu0 %v7129_v31  ;;  %v4660_v31 = vsel %vm2912_vm3, 1.0, %v8082_v28  ;;  %vm2797_vm3 = vcmp.eq.s32.totalorder %v6604_v52, %v7259_v63  ;;  %v7547_v63 = vpop.xlane.xlu1 %3933  ;;  %v2157_v52 = vpop.xlane.xlu0 %2156 }
 0x70c   :  { %v4641_v6 = vsel %vm2797_vm3, 1.0, %v8082_v28  ;;  %v2179_v43 = vmax.f32 %v2157_v52, 1e-24 }
 0x70e   :  { %5566 = vmatmul.mubr.msk.f32.gmra.mrb[72].mxu0 %vm237_vm11, %v4657_v37 }
 0x70f   :  { %5568 = vmatprep.mubr.msk.f32.mxu0 %vm237_vm11, %v4658_v9  ;;  %v2160_v29 = vpop.xlane.xlu1 %2159 }
 0x710   :  { %v2180_v50 = vmax.f32 %v2160_v29, 1e-24 }
 0x712   :  { %5569 = vmatmul.mubr.msk.f32.gmra.mrb[74].mxu0 %vm237_vm11, %v4659_v0  ;;  %6000 = vrsqrt.f32 %v2180_v50 }
 0x713   :  { %5571 = vmatprep.mubr.msk.f32.mxu0 %vm237_vm11, %v4660_v31  ;;  %v2163_v4 = vpop.xlane.xlu1 %2162  ;;  %6002 = vrsqrt.f32 %v2179_v43 }
 0x714   :  { %v2181_v24 = vmax.f32 %v2163_v4, 1e-24 }
 0x716   :  { %5572 = vmatmul.mubr.msk.f32.gmra.mrb[76].mxu0 %vm237_vm11, %v4661_v22 }
 0x717   :  { %5574 = vmatprep.mubr.msk.f32.mxu0 %vm237_vm11, %v4662_v12  ;;  %v2166_v7 = vpop.xlane.xlu1 %2165 }
 0x718   :  { %v2182_v49 = vmax.f32 %v2166_v7, 1e-24 }
 0x71a   :  { %5575 = vmatmul.mubr.msk.f32.gmra.mrb[78].mxu0 %vm237_vm11, %v4663_v47  ;;  %6004 = vrsqrt.f32 %v2182_v49 }
 0x71b   :  { %5593 = vmatprep.mubr.msk.f32.mxu0 %vm237_vm11, %v4632_v8  ;;  %v2169_v30 = vpop.xlane.xlu1 %2168 }
 0x71c   :  { %v6001_v44 = vpop.eup %6000  ;;  %v2183_v62 = vmax.f32 %v2169_v30, 1e-24 }
 0x71d   :  { %v6003_v39 = vpop.eup %6002  ;;  %v2196_v13 = vmul.f32 %v7150_v18, %v6001_v44 }
 0x71e   :  { %5594 = vmatmul.mubr.msk.f32.vlgmr.msra.gmra.mrb[64].mxu0 %vm237_vm11, %v4633_v41  ;;  %v2195_v0 = vmul.f32 %v7342_v19, %v6003_v39  ;;  %v8084_v39 = vld [vmem:[#allocation36_spill] sm:$0xff] }
 0x71f   :  { %5596 = vmatprep.mubr.msk.f32.mxu0 %vm237_vm11, %v4634_v17 }
 0x722   :  { %5597 = vmatmul.mubr.msk.f32.gmra.mrb[66].mxu0 %vm237_vm11, %v4635_v10 }
 0x723   :  { %5599 = vmatprep.mubr.msk.f32.mxu0 %vm237_vm11, %v4636_v26 }
 0x724   :  { %v6005_v45 = vpop.eup %6004 }
 0x725   :  { %v2198_v18 = vmul.f32 %v7166_v33, %v6005_v45 }
 0x726   :  { %5600 = vmatmul.mubr.msk.f32.gmra.mrb[68].mxu0 %vm237_vm11, %v4637_v38 }
 0x727   :  { %5602 = vmatprep.mubr.msk.f32.mxu0 %vm237_vm11, %v4638_v2 }
 0x72a   :  { %5603 = vmatmul.mubr.msk.f32.gmra.mrb[70].mxu0 %vm237_vm11, %v4639_v51 }
 0x72b   :  { %5605 = vmatprep.mubr.msk.f32.mxu0 %vm237_vm11, %v4640_v55 }
 0x72e   :  { %5606 = vmatmul.mubr.msk.f32.gmra.mrb[72].mxu0 %vm237_vm11, %v4641_v6 }
 0x72f   :  { %5608 = vmatprep.mubr.msk.f32.mxu0 %vm237_vm11, %v4642_v42 }
 0x732   :  { %5609 = vmatmul.mubr.msk.f32.gmra.mrb[74].mxu0 %vm237_vm11, %v4643_v27 }
 0x733   :  { %5611 = vmatprep.mubr.msk.f32.mxu0 %vm237_vm11, %v4644_v57 }
 0x736   :  { %5612 = vmatmul.mubr.msk.f32.gmra.mrb[76].mxu0 %vm237_vm11, %v4645_v48 }
 0x737   :  { %5614 = vmatprep.mubr.msk.f32.mxu0 %vm237_vm11, %v4646_v59 }
 0x73a   :  { %5615 = vmatmul.mubr.msk.f32.gmra.mrb[78].mxu0 %vm237_vm11, %v4647_v1 }
 0x75d   :  { %v2104_v25 = vpop.xlane.xlu1 %2103 }
 0x75e   :  { %v2124_v36 = vmax.f32 %v2104_v25, 1e-24  ;;  %v2101_v46 = vpop.xlane.xlu0 %2100 }
 0x75f   :  { %v2123_v32 = vmax.f32 %v2101_v46, 1e-24 }
 0x760   :  { %6006 = vrsqrt.f32 %v2124_v36 }
 0x761   :  { %6008 = vrsqrt.f32 %v2123_v32  ;;  %v2172_v53 = vpop.xlane.xlu1 %2171 }
 0x762   :  { %v2110_v34 = vpop.xlane.xlu0 %2109  ;;  %6010 = vrsqrt.f32 %v2181_v24  ;;  %v2184_v28 = vmax.f32 %v2172_v53, 1e-24 }
 0x763   :  { %v2126_v20 = vmax.f32 %v2110_v34, 1e-24 }
 0x765   :  { %6012 = vrsqrt.f32 %v2126_v20  ;;  %v2175_v23 = vpop.xlane.xlu1 %2174 }
 0x766   :  { %v2107_v54 = vpop.xlane.xlu0 %2106  ;;  %6014 = vrsqrt.f32 %v2184_v28  ;;  %v2185_v8 = vmax.f32 %v2175_v23, 1e-24  ;;  %v8083_v28 = vld [vmem:[#allocation35_spill] sm:$0xff] }
 0x767   :  { %v2125_v16 = vmax.f32 %v2107_v54, 1e-24 }
 0x769   :  { %6016 = vrsqrt.f32 %v2125_v16  ;;  %v2178_v17 = vpop.xlane.xlu1 %2177 }
 0x76a   :  { %v6007_v37 = vpop.eup %6006  ;;  %v2116_v9 = vpop.xlane.xlu0 %2115  ;;  %6018 = vrsqrt.f32 %v2183_v62 }
 0x76b   :  { %v6009_v31 = vpop.eup %6008  ;;  %v2128_v22 = vmax.f32 %v2116_v9, 1e-24  ;;  %v2140_v12 = vmul.f32 %v6007_v37, %v7351_v61 }
 0x76c   :  { %v2139_v47 = vmul.f32 %v6009_v31, %v7353_v3  ;;  %v6011_v10 = vpop.eup %6010  ;;  %v2186_v3 = vmax.f32 %v2178_v17, 1e-24  ;;  %v7587_v17 = vpack.c.bf16 %v7547_v63, %v7549_v56 }
 0x76d   :  { %6020 = vrsqrt.f32 %v2128_v22  ;;  %v2204_v41 = vmul.f32 %v2196_v13, %v2140_v12  ;;  %v2197_v57 = vmul.f32 %v7157_v60, %v6011_v10 }
 0x76e   :  { %v2113_v26 = vpop.xlane.xlu0 %2112  ;;  %v2203_v38 = vmul.f32 %v2195_v0, %v2139_v47  ;;  %6022 = vrsqrt.f32 %v2185_v8 }
 0x76f   :  { %v6013_v2 = vpop.eup %6012  ;;  %v2127_v51 = vmax.f32 %v2113_v26, 1e-24  ;;  %v2214_v19 = vsel %vm371_vm9, %v2204_v41, 0.0 }
 0x770   :  { %2215 = vadd.xlane.f32.xlu1 %v2214_v19  ;;  %v2211_v55 = vsel %vm371_vm9, %v2203_v38, 0.0  ;;  %v2142_v61 = vmul.f32 %v6013_v2, %v7366_v58  ;;  %v6015_v6 = vpop.eup %6014 }
 0x771   :  { %6024 = vrsqrt.f32 %v2127_v51  ;;  %2212 = vadd.xlane.f32.xlu0 %v2211_v55  ;;  %v2200_v7 = vmul.f32 %v7360_v5, %v6015_v6 }
 0x772   :  { %v2119_v42 = vpop.xlane.xlu0 %2118  ;;  %v2206_v27 = vmul.f32 %v2198_v18, %v2142_v61  ;;  %6026 = vrsqrt.f32 %v2186_v3  ;;  %v8085_v18 = vld [vmem:[#allocation34_spill] sm:$0xff] }
 0x773   :  { %v6017_v48 = vpop.eup %6016  ;;  %v2129_v33 = vmax.f32 %v2119_v42, 1e-24 }
 0x774   :  { %v2220_v59 = vsel %vm371_vm9, %v2206_v27, 0.0  ;;  %v2141_v1 = vmul.f32 %v6017_v48, %v7369_v21  ;;  %v6019_v29 = vpop.eup %6018 }
 0x775   :  { %6028 = vrsqrt.f32 %v2129_v33  ;;  %2221 = vadd.xlane.f32.xlu1 %v2220_v59  ;;  %v2199_v25 = vmul.f32 %v7335_v11, %v6019_v29 }
 0x776   :  { %v2122_v4 = vpop.xlane.xlu0 %2121  ;;  %v2205_v58 = vmul.f32 %v2197_v57, %v2141_v1 }
 0x777   :  { %v6021_v30 = vpop.eup %6020  ;;  %v2130_v50 = vmax.f32 %v2122_v4, 1e-24 }
 0x778   :  { %v2217_v52 = vsel %vm371_vm9, %v2205_v58, 0.0  ;;  %v2144_v60 = vmul.f32 %v6021_v30, %v7383_v40  ;;  %v6023_v43 = vpop.eup %6022 }
 0x779   :  { %6030 = vrsqrt.f32 %v2130_v50  ;;  %2218 = vadd.xlane.f32.xlu0 %v2217_v52  ;;  %v2201_v24 = vmul.f32 %v7378_v15, %v6023_v43  ;;  %v7578_v15 = vld [vmem:[%s8002_s15] ss:$0 sm:$0xff] }
 0x77a   :  { %v2208_v49 = vmul.f32 %v2200_v7, %v2144_v60 }
 0x77b   :  { %v6025_v21 = vpop.eup %6024 }
 0x77c   :  { %v2226_v36 = vsel %vm371_vm9, %v2208_v49, 0.0  ;;  %v2143_v46 = vmul.f32 %v6025_v21, %v7395_v35  ;;  %v6027_v32 = vpop.eup %6026 }
 0x77d   :  { %2227 = vadd.xlane.f32.xlu1 %v2226_v36  ;;  %v2202_v44 = vmul.f32 %v8083_v28, %v6027_v32  ;;  %v8086_v32 = vld [vmem:[#allocation12_spill] sm:$0xff] }
 0x77e   :  { %v2207_v5 = vmul.f32 %v2199_v25, %v2143_v46 }
 0x77f   :  { %v6029_v53 = vpop.eup %6028 }
 0x780   :  { %v2223_v34 = vsel %vm371_vm9, %v2207_v5, 0.0  ;;  %v2145_v40 = vmul.f32 %v6029_v53, %v7401_v14 }
 0x781   :  { %2224 = vadd.xlane.f32.xlu0 %v2223_v34 }
 0x782   :  { %v2209_v20 = vmul.f32 %v2201_v24, %v2145_v40  ;;  %v8087_v24 = vld [vmem:[#allocation10_spill] sm:$0xff] }
 0x783   :  { %v6031_v11 = vpop.eup %6030 }
 0x784   :  { %v2229_v54 = vsel %vm371_vm9, %v2209_v20, 0.0  ;;  %v2146_v16 = vmul.f32 %v6031_v11, %v8084_v39 }
 0x785   :  { %2230 = vadd.xlane.f32.xlu0 %v2229_v54 }
 0x786   :  { %v2210_v35 = vmul.f32 %v2202_v44, %v2146_v16 }
 0x788   :  { %v2232_v23 = vsel %vm371_vm9, %v2210_v35, 0.0 }
 0x789   :  { %2233 = vadd.xlane.f32.xlu1 %v2232_v23 }
 0x7f1   :  { %v5595_v14 = vpop.f32.mrb[64].mxu0 }
 0x7f2   :  { %v3342_v62 = vadd.f32 %v5595_v14, %v7578_v15  ;;  %v3255_v45 = vpop.f32.mrb[65].mxu0 }
 0x7f3   :  { %v3341_v13 = vadd.f32 %v7578_v15, %v3255_v45 }
 0x7f4   :  { %v3374_v37 = vmul.f32 0.2, %v3342_v62  ;;  %vm3358_vm11 = vcmp.gt.f32.partialorder %v3342_v62, 0.0 }
 0x7f5   :  { %vm3357_vm12 = vcmp.gt.f32.partialorder %v3341_v13, 0.0  ;;  %v3373_v9 = vmul.f32 0.2, %v3341_v13  ;;  %v5598_v0 = vpop.f32.mrb[66].mxu0 }
 0x7f6   :  { %v3344_v31 = vadd.f32 %v5598_v0, %v7578_v15  ;;  %v3265_v22 = vpop.f32.mrb[67].mxu0  ;;  %v3390_v8 = vsel %vm3358_vm11, %v3342_v62, %v3374_v37 }
 0x7f7   :  { %v3343_v12 = vadd.f32 %v7578_v15, %v3265_v22  ;;  %v3389_v47 = vsel %vm3357_vm12, %v3341_v13, %v3373_v9 }
 0x7f8   :  { %v3376_v41 = vmul.f32 0.2, %v3344_v31  ;;  %5625 = vmatprep.mubr.msk.f32.mxu1 %vm123_vm0, %v3389_v47  ;;  %vm3360_vm9 = vcmp.gt.f32.partialorder %v3344_v31, 0.0 }
 0x7f9   :  { %vm3359_vm13 = vcmp.gt.f32.partialorder %v3343_v12, 0.0  ;;  %v3375_v10 = vmul.f32 0.2, %v3343_v12  ;;  %v5601_v26 = vpop.f32.mrb[68].mxu0  ;;  %5626 = vmatmul.mubr.msk.f32.vlgmr.msra.gmra.mrb[80].mxu1 %vm123_vm0, %v3390_v8 }
 0x7fa   :  { %v3346_v38 = vadd.f32 %v5601_v26, %v7578_v15  ;;  %5928 = vmatpush3.bf16.msra.mxu1 %v8085_v18  ;;  %v3275_v2 = vpop.f32.mrb[69].mxu0  ;;  %v3392_v63 = vsel %vm3360_vm9, %v3344_v31, %v3376_v41  ;;  %v8088_v31 = vld [vmem:[#allocation11_spill] sm:$0xff] }
 0x7fb   :  { %v3345_v51 = vadd.f32 %v7578_v15, %v3275_v2  ;;  %5930 = vmatprep.subr.bf16.mxu1 %v7587_v17  ;;  %v3391_v19 = vsel %vm3359_vm13, %v3343_v12, %v3375_v10 }
 0x7fc   :  { %v3378_v55 = vmul.f32 0.2, %v3346_v38  ;;  %5628 = vmatprep.mubr.msk.f32.mxu1 %vm123_vm0, %v3391_v19  ;;  %vm3362_vm14 = vcmp.gt.f32.partialorder %v3346_v38, 0.0  ;;  %v8089_v19 = vld [vmem:[#allocation13_spill] sm:$0xff] }
 0x7fd   :  { %vm3361_vm15 = vcmp.gt.f32.partialorder %v3345_v51, 0.0  ;;  %v3377_v56 = vmul.f32 0.2, %v3345_v51  ;;  %v2216_v61 = vpop.xlane.xlu1 %2215  ;;  %v5604_v3 = vpop.f32.mrb[70].mxu0  ;;  %5629 = vmatmul.mubr.msk.f32.gmra.mrb[82].mxu1 %vm123_vm0, %v3392_v63 }
 0x7fe   :  { %v2236_v6 = vsub.f32 1.0, %v2216_v61  ;;  %v3348_v42 = vadd.f32 %v5604_v3, %v7578_v15  ;;  %5932 = vmatpush3.bf16.msra.mxu1 %v7587_v17  ;;  %v3285_v27 = vpop.f32.mrb[71].mxu0  ;;  %v2213_v57 = vpop.xlane.xlu0 %2212  ;;  %v3394_v29 = vsel %vm3362_vm14, %v3346_v38, %v3378_v55 }
 0x7ff   :  { %v3347_v48 = vadd.f32 %v7578_v15, %v3285_v27  ;;  %5934 = vmatprep.subr.bf16.mxu1 %v8085_v18  ;;  %v2235_v33 = vsub.f32 1.0, %v2213_v57  ;;  %v3393_v59 = vsel %vm3361_vm15, %v3345_v51, %v3377_v56 }
 0x800   :  { %v3380_v1 = vmul.f32 0.2, %v3348_v42  ;;  %5631 = vmatprep.mubr.msk.f32.mxu1 %vm123_vm0, %v3393_v59  ;;  %vm3364_vm1 = vcmp.gt.f32.partialorder %v3348_v42, 0.0  ;;  %v2244_v7 = vmul.f32 %v2236_v6, %v2236_v6 }
 0x801   :  { %vm3363_vm2 = vcmp.gt.f32.partialorder %v3347_v48, 0.0  ;;  %v3379_v4 = vmul.f32 0.2, %v3347_v48  ;;  %v5607_v58 = vpop.f32.mrb[72].mxu0  ;;  %5632 = vmatmul.mubr.msk.f32.gmra.mrb[84].mxu1 %vm123_vm0, %v3394_v29  ;;  %v2243_v30 = vmul.f32 %v2235_v33, %v2235_v33 }
 0x802   :  { %v3350_v50 = vadd.f32 %v5607_v58, %v7578_v15  ;;  %v3295_v52 = vpop.f32.mrb[73].mxu0  ;;  %v2222_v43 = vpop.xlane.xlu1 %2221  ;;  %v3396_v21 = vsel %vm3364_vm1, %v3348_v42, %v3380_v1  ;;  %v2252_v5 = vmul.f32 %v2244_v7, %v8086_v32  ;;  %v8090_v58 = vld [vmem:[#allocation15_spill] sm:$0xff] }
 0x803   :  { %v3349_v60 = vadd.f32 %v7578_v15, %v3295_v52  ;;  %v3395_v49 = vsel %vm3363_vm2, %v3347_v48, %v3379_v4  ;;  %v2251_v53 = vmul.f32 %v2243_v30, %v8087_v24  ;;  %v2238_v34 = vsub.f32 1.0, %v2222_v43  ;;  %v8094_v24 = vld [vmem:[#allocation16_spill] sm:$0xff] }
 0x804   :  { %v3382_v25 = vmul.f32 0.2, %v3350_v50  ;;  %5634 = vmatprep.mubr.msk.f32.mxu1 %vm123_vm0, %v3395_v49  ;;  %vm3366_vm3 = vcmp.gt.f32.partialorder %v3350_v50, 0.0  ;;  %v2261_v62 = vsel %vm2259_vm5, %v2252_v5, 0.0 }
 0x805   :  { %vm3365_vm4 = vcmp.gt.f32.partialorder %v3349_v60, 0.0  ;;  %v3381_v36 = vmul.f32 0.2, %v3349_v60  ;;  %v5610_v46 = vpop.f32.mrb[74].mxu0  ;;  %5635 = vmatmul.mubr.msk.f32.gmra.mrb[86].mxu1 %vm123_vm0, %v3396_v21  ;;  %v2260_v45 = vsel %vm2259_vm5, %v2251_v53, 0.0  ;;  %v2246_v13 = vmul.f32 %v2238_v34, %v2238_v34 }
 0x806   :  { %v3352_v40 = vadd.f32 %v5610_v46, %v7578_v15  ;;  %v3305_v20 = vpop.f32.mrb[75].mxu0  ;;  %v2219_v28 = vpop.xlane.xlu0 %2218  ;;  %v3398_v16 = vsel %vm3366_vm3, %v3350_v50, %v3382_v25  ;;  %v2262_v51 = vadd.f32 %v2261_v62, %v2260_v45 }
 0x807   :  { %v3351_v44 = vadd.f32 %v7578_v15, %v3305_v20  ;;  %v2237_v11 = vsub.f32 1.0, %v2219_v28  ;;  %v3397_v54 = vsel %vm3365_vm4, %v3349_v60, %v3381_v36  ;;  %v2254_v55 = vmul.f32 %v2246_v13, %v8089_v19  ;;  %v8092_v36 = vld [vmem:[#allocation19_spill] sm:$0xff]  ;;  %v8095_v28 = vld [vmem:[#allocation18_spill] sm:$0xff] }
 0x808   :  { %v3384_v39 = vmul.f32 0.2, %v3352_v40  ;;  %5637 = vmatprep.mubr.msk.f32.mxu1 %vm123_vm0, %v3397_v54  ;;  %vm3368_vm6 = vcmp.gt.f32.partialorder %v3352_v40, 0.0  ;;  %v8093_v46 = vmax.f32 %v8092_v36, 0.0  ;;  %v8097_v54 = vld [vmem:[#allocation21_spill] sm:$0xff]  ;;  %v8102_v13 = vld [vmem:[#allocation27_spill] sm:$0xff] }
 0x809   :  { %vm3367_vm7 = vcmp.gt.f32.partialorder %v3351_v44, 0.0  ;;  %v3383_v35 = vmul.f32 0.2, %v3351_v44  ;;  %v2245_v23 = vmul.f32 %v2237_v11, %v2237_v11  ;;  %v5613_v14 = vpop.f32.mrb[76].mxu0  ;;  %5638 = vmatmul.mubr.msk.f32.gmra.mrb[88].mxu1 %vm123_vm0, %v3398_v16  ;;  %v2265_v29 = vsel %vm2259_vm5, %v2254_v55, 0.0  ;;  %v8099_v16 = vld [vmem:[#allocation17_spill] sm:$0xff] }
 0x80a   :  { %v3354_v37 = vadd.f32 %v5613_v14, %v7578_v15  ;;  %v3315_v9 = vpop.f32.mrb[77].mxu0  ;;  %v2228_v0 = vpop.xlane.xlu1 %2227  ;;  %v3400_v10 = vsel %vm3368_vm6, %v3352_v40, %v3384_v39  ;;  %v8098_v39 = vmax.f32 %v8097_v54, 0.0  ;;  %v8100_v14 = vld [vmem:[#allocation24_spill] sm:$0xff]  ;;  %v8113_v55 = vld [vmem:[#allocation23_spill] sm:$0xff] }
 0x80b   :  { %v2253_v22 = vmul.f32 %v2245_v23, %v8088_v31  ;;  %v3353_v12 = vadd.f32 %v7578_v15, %v3315_v9  ;;  %v2240_v47 = vsub.f32 1.0, %v2228_v0  ;;  %v3399_v8 = vsel %vm3367_vm7, %v3351_v44, %v3383_v35  ;;  %v6175_v9 = vld [vmem:[%s7997_s10] ss:$0 sm:$0xff]  ;;  %v8104_v0 = vld [vmem:[#allocation22_spill] sm:$0xff] }
 0x80c   :  { %v3386_v41 = vmul.f32 0.2, %v3354_v37  ;;  %5640 = vmatprep.mubr.msk.f32.mxu1 %vm123_vm0, %v3399_v8  ;;  %vm3370_vm8 = vcmp.gt.f32.partialorder %v3354_v37, 0.0  ;;  %v8096_v44 = vmax.f32 %v8095_v28, 0.0  ;;  %v8101_v62 = vmax.f32 %v8100_v14, 0.0 }
 0x80d   :  { %v2263_v26 = vsel %vm2259_vm5, %v2253_v22, 0.0  ;;  %vm3369_vm10 = vcmp.gt.f32.partialorder %v3353_v12, 0.0  ;;  %v3385_v38 = vmul.f32 0.2, %v3353_v12  ;;  %v5616_v2 = vpop.f32.mrb[78].mxu0  ;;  %5641 = vmatmul.mubr.msk.f32.gmra.mrb[90].mxu1 %vm123_vm0, %v3400_v10  ;;  %v2248_v3 = vmul.f32 %v2240_v47, %v2240_v47  ;;  %v8105_v22 = vld [vmem:[#allocation30_spill] sm:$0xff] }
 0x80e   :  { %v3356_v63 = vadd.f32 %v5616_v2, %v7578_v15  ;;  %v3325_v56 = vpop.f32.mrb[79].mxu0  ;;  %v2225_v61 = vpop.xlane.xlu0 %2224  ;;  %v2264_v57 = vadd.f32 %v2263_v26, %v2262_v51  ;;  %v3402_v33 = vsel %vm3370_vm8, %v3354_v37, %v3386_v41  ;;  %v8103_v37 = vmax.f32 %v8102_v13, 0.0  ;;  %v8107_v47 = vld [vmem:[#allocation32_spill] sm:$0xff]  ;;  %v8110_v26 = vld [vmem:[#allocation25_spill] sm:$0xff] }
 0x80f   :  { %v3355_v6 = vadd.f32 %v7578_v15, %v3325_v56  ;;  %v2239_v42 = vsub.f32 1.0, %v2225_v61  ;;  %v3401_v27 = vsel %vm3369_vm10, %v3353_v12, %v3385_v38  ;;  %v2256_v7 = vmul.f32 %v2248_v3, %v8090_v58  ;;  %v8091_v15 = vld [vmem:[#allocation14_spill] sm:$0xff]  ;;  %v8111_v2 = vld [vmem:[#allocation33_spill] sm:$0xff]  ;;  %v8114_v61 = vld [vmem:[#allocation28_spill] sm:$0xff] }
 0x810   :  { %v3388_v48 = vmul.f32 0.2, %v3356_v63  ;;  %5643 = vmatprep.mubr.msk.f32.mxu1 %vm123_vm0, %v3401_v27  ;;  %vm3372_vm11 = vcmp.gt.f32.partialorder %v3356_v63, 0.0  ;;  %v2266_v60 = vadd.f32 %v2265_v29, %v2264_v57  ;;  %v1558_v31 = vadd.f32 %v6175_v9, %v8104_v0 }
 0x811   :  { %vm3371_vm12 = vcmp.gt.f32.partialorder %v3355_v6, 0.0  ;;  %v3387_v59 = vmul.f32 0.2, %v3355_v6  ;;  %v2247_v1 = vmul.f32 %v2239_v42, %v2239_v42  ;;  %5644 = vmatmul.mubr.msk.f32.gmra.mrb[92].mxu1 %vm123_vm0, %v3402_v33  ;;  %v2269_v5 = vsel %vm2259_vm5, %v2256_v7, 0.0  ;;  %v8115_v42 = vld [vmem:[#allocation26_spill] sm:$0xff] }
 0x812   :  { %v2231_v4 = vpop.xlane.xlu0 %2230  ;;  %v3404_v43 = vsel %vm3372_vm11, %v3356_v63, %v3388_v48  ;;  %v8106_v12 = vmax.f32 %v8105_v22, 0.0  ;;  %v8108_v8 = vmax.f32 %v8107_v47, 0.0  ;;  %v1596_v10 = vmax.f32 %v1558_v31, 0.0  ;;  %v8116_v48 = vld [vmem:[#allocation31_spill] sm:$0xff] }
 0x813   :  { %v2255_v30 = vmul.f32 %v2247_v1, %v8091_v15  ;;  %v2241_v50 = vsub.f32 1.0, %v2231_v4  ;;  %v3403_v52 = vsel %vm3371_vm12, %v3355_v6, %v3387_v59  ;;  %v1568_v38 = vadd.f32 %v6175_v9, %v8110_v26  ;;  %v8117_v1 = vld [vmem:[#allocation29_spill] sm:$0xff] }
 0x814   :  { %5646 = vmatprep.mubr.msk.f32.mxu1 %vm123_vm0, %v3403_v52  ;;  %v8112_v51 = vmax.f32 %v8111_v2, 0.0  ;;  %v1573_v63 = vadd.f32 %v6175_v9, %v8113_v55  ;;  %v1578_v3 = vadd.f32 %v6175_v9, %v8114_v61  ;;  %v1583_v27 = vadd.f32 %v6175_v9, %v8115_v42 }
 0x815   :  { %v2267_v49 = vsel %vm2259_vm5, %v2255_v30, 0.0  ;;  %v2249_v25 = vmul.f32 %v2241_v50, %v2241_v50  ;;  %5647 = vmatmul.mubr.msk.f32.gmra.mrb[94].mxu1 %vm123_vm0, %v3404_v43  ;;  %v1598_v56 = vmax.f32 %v1568_v38, 0.0  ;;  %v1588_v33 = vadd.f32 %v6175_v9, %v8116_v48 }
 0x816   :  { %v2268_v21 = vadd.f32 %v2267_v49, %v2266_v60  ;;  %5657 = vmatprep.mubr.msk.f32.mxu1 %vm123_vm0, %v8093_v46  ;;  %v2234_v32 = vpop.xlane.xlu1 %2233  ;;  %v1599_v6 = vmax.f32 %v1573_v63, 0.0  ;;  %v1600_v57 = vmax.f32 %v1578_v3, 0.0  ;;  %v1601_v59 = vmax.f32 %v1583_v27, 0.0  ;;  %v7686_v49 = vld [vmem:[#allocation2] ss:$0 sm:$0xff] }
 0x817   :  { %v2257_v53 = vmul.f32 %v2249_v25, %v8094_v24  ;;  %v2242_v34 = vsub.f32 1.0, %v2234_v32  ;;  %v1593_v29 = vadd.f32 %v6175_v9, %v8117_v1  ;;  %v1602_v4 = vmax.f32 %v1588_v33, 0.0 }
 0x818   :  { %v2270_v40 = vadd.f32 %v2269_v5, %v2268_v21 }
 0x819   :  { %v2250_v20 = vmul.f32 %v2242_v34, %v2242_v34  ;;  %5658 = vmatmul.mubr.msk.f32.vlgmr.msra.gmra.mrb[96].mxu1 %vm123_vm0, %v8096_v44  ;;  %v2271_v11 = vsel %vm2259_vm5, %v2257_v53, 0.0  ;;  %v1603_v58 = vmax.f32 %v1593_v29, 0.0 }
 0x81a   :  { %5936 = vmatpush3.bf16.msra.mxu1 %v8085_v18  ;;  %5660 = vmatprep.mubr.msk.f32.mxu1 %vm123_vm0, %v8098_v39  ;;  %v2272_v23 = vadd.f32 %v2271_v11, %v2270_v40 }
 0x81b   :  { %v2258_v35 = vmul.f32 %v2250_v20, %v8099_v16  ;;  %5938 = vmatprep.subr.bf16.mxu1 %v7587_v17 }
 0x81d   :  { %5661 = vmatmul.mubr.msk.f32.gmra.mrb[98].mxu1 %vm123_vm0, %v8101_v62  ;;  %v2273_v45 = vsel %vm2259_vm5, %v2258_v35, 0.0 }
 0x81e   :  { %5940 = vmatpush3.bf16.msra.mxu1 %v7587_v17  ;;  %5663 = vmatprep.mubr.msk.f32.mxu1 %vm123_vm0, %v8103_v37  ;;  %v2274_v18 = vadd.f32 %v2273_v45, %v2272_v23  ;;  %v8109_v17 = vld [vmem:[#allocation20_spill] sm:$0xff] }
 0x81f   :  { %v1563_v41 = vadd.f32 %v6175_v9, %v8109_v17 }
 0x820   :  { %2275 = vadd.xlane.f32.xlu0 %v2274_v18 }
 0x821   :  { %5664 = vmatmul.mubr.msk.f32.gmra.mrb[100].mxu1 %vm123_vm0, %v8106_v12  ;;  %v1597_v19 = vmax.f32 %v1563_v41, 0.0 }
 0x822   :  { %5666 = vmatprep.mubr.msk.f32.mxu1 %vm123_vm0, %v8108_v8 }
 0x825   :  { %5667 = vmatmul.mubr.msk.f32.gmra.mrb[102].mxu1 %vm123_vm0, %v8112_v51 }
 0x826   :  { %5677 = vmatprep.mubr.msk.f32.mxu1 %vm123_vm0, %v1596_v10 }
 0x829   :  { %5678 = vmatmul.mubr.msk.f32.vlgmr.msra.gmra.mrb[104].mxu1 %vm123_vm0, %v1597_v19 }
 0x82a   :  { %5680 = vmatprep.mubr.msk.f32.mxu1 %vm123_vm0, %v1598_v56 }
 0x82d   :  { %5681 = vmatmul.mubr.msk.f32.gmra.mrb[106].mxu1 %vm123_vm0, %v1599_v6 }
 0x82e   :  { %5683 = vmatprep.mubr.msk.f32.mxu1 %vm123_vm0, %v1600_v57 }
 0x831   :  { %5684 = vmatmul.mubr.msk.f32.gmra.mrb[108].mxu1 %vm123_vm0, %v1601_v59 }
 0x832   :  { %5686 = vmatprep.mubr.msk.f32.mxu1 %vm123_vm0, %v1602_v4 }
 0x835   :  { %5687 = vmatmul.mubr.msk.f32.gmra.mrb[110].mxu1 %vm123_vm0, %v1603_v58  ;;  %vm2286_vm0 = vcmask 0  }
 0x8ad   :  { %v2276_v7 = vpop.xlane.xlu0 %2275 }
 0x8ae   :  { %v2277_v15 = vrot.slane %v2276_v7, 4 }
 0x8b0   :  { %v2278_v30 = vadd.f32 %v2277_v15, %v2276_v7 }
 0x8b2   :  { %v2279_v50 = vrot.slane %v2278_v30, 2 }
 0x8b4   :  { %v2280_v52 = vadd.f32 %v2279_v50, %v2278_v30 }
 0x8b6   :  { %v2281_v60 = vrot.slane %v2280_v52, 1 }
 0x8b8   :  { %v2282_v43 = vadd.f32 %v2281_v60, %v2280_v52 }
 0x8ba   :  { %5981 = vpush %v2282_v43 }
 0x8cc   :  { %v5627_v25 = vpop.f32.mrb[80].mxu1 }
 0x8cd   :  { %v7689_v21 = vadd.f32 %v5627_v25, %v7686_v49  ;;  %v3530_v36 = vpop.f32.mrb[81].mxu1 }
 0x8ce   :  { %v7692_v46 = vadd.f32 %v7686_v49, %v3530_v36 }
 0x8cf   :  { %v3714_v32 = vand.u32 2147483647, %v7689_v21  ;;  %v3666_v61 = vmax.f32 %v7689_v21, 0.0 }
 0x8d0   :  { %v3713_v5 = vand.u32 2147483647, %v7692_v46  ;;  %v5630_v24 = vpop.f32.mrb[82].mxu1  ;;  %v3665_v57 = vmax.f32 %v7692_v46, 0.0 }
 0x8d1   :  { %v3730_v53 = vsub.f32 0.0, %v3714_v32  ;;  %v7697_v34 = vadd.f32 %v5630_v24, %v7686_v49  ;;  %v3540_v40 = vpop.f32.mrb[83].mxu1  ;;  %v7734_v15 = vsub.f32 %v3666_v61, %v7689_v21 }
 0x8d2   :  { %v3729_v20 = vsub.f32 0.0, %v3713_v5  ;;  %v7700_v28 = vadd.f32 %v7686_v49, %v3540_v40  ;;  %v7740_v60 = vsub.f32 %v3665_v57, %v7692_v46 }
 0x8d3   :  { %v3747_v44 = vmul.f32 1.442695, %v3730_v53  ;;  %v3716_v11 = vand.u32 2147483647, %v7697_v34  ;;  %v3668_v32 = vmax.f32 %v7697_v34, 0.0 }
 0x8d4   :  { %v3745_v54 = vmul.f32 1.442695, %v3729_v20  ;;  %v3715_v39 = vand.u32 2147483647, %v7700_v28  ;;  %v5633_v16 = vpop.f32.mrb[84].mxu1  ;;  %v3667_v53 = vmax.f32 %v7700_v28, 0.0 }
 0x8d5   :  { %6032 = vpow2.f32 %v3747_v44  ;;  %v3732_v35 = vsub.f32 0.0, %v3716_v11  ;;  %v7705_v23 = vadd.f32 %v5633_v16, %v7686_v49  ;;  %v3550_v14 = vpop.f32.mrb[85].mxu1 }
 0x8d6   :  { %6034 = vpow2.f32 %v3745_v54  ;;  %v3731_v62 = vsub.f32 0.0, %v3715_v39  ;;  %v7708_v45 = vadd.f32 %v7686_v49, %v3550_v14 }
 0x8d7   :  { %v3751_v13 = vmul.f32 1.442695, %v3732_v35  ;;  %v3718_v37 = vand.u32 2147483647, %v7705_v23  ;;  %v3670_v40 = vmax.f32 %v7705_v23, 0.0 }
 0x8d8   :  { %v3749_v18 = vmul.f32 1.442695, %v3731_v62  ;;  %v3717_v9 = vand.u32 2147483647, %v7708_v45  ;;  %v5636_v0 = vpop.f32.mrb[86].mxu1  ;;  %v3669_v46 = vmax.f32 %v7708_v45, 0.0 }
 0x8d9   :  { %6036 = vpow2.f32 %v3751_v13  ;;  %v3734_v31 = vsub.f32 0.0, %v3718_v37  ;;  %v7713_v22 = vadd.f32 %v5636_v0, %v7686_v49  ;;  %v3560_v12 = vpop.f32.mrb[87].mxu1 }
 0x8da   :  { %6038 = vpow2.f32 %v3749_v18  ;;  %v3733_v47 = vsub.f32 0.0, %v3717_v9  ;;  %v7716_v8 = vadd.f32 %v7686_v49, %v3560_v12  ;;  %v3699_v12 = vsub.f32 %v3667_v53, %v7700_v28 }
 0x8db   :  { %v3755_v17 = vmul.f32 1.442695, %v3734_v31  ;;  %v3720_v41 = vand.u32 2147483647, %v7713_v22  ;;  %v3672_v35 = vmax.f32 %v7713_v22, 0.0  ;;  %v3700_v31 = vsub.f32 %v3668_v32, %v7697_v34 }
 0x8dc   :  { %v3753_v10 = vmul.f32 1.442695, %v3733_v47  ;;  %v3719_v26 = vand.u32 2147483647, %v7716_v8  ;;  %v5639_v38 = vpop.f32.mrb[88].mxu1 }
 0x8dd   :  { %6040 = vpow2.f32 %v3755_v17  ;;  %v3736_v2 = vsub.f32 0.0, %v3720_v41  ;;  %v7721_v51 = vadd.f32 %v5639_v38, %v7686_v49  ;;  %v3570_v19 = vpop.f32.mrb[89].mxu1  ;;  %v7761_v41 = vsub.f32 %v3670_v40, %v7705_v23 }
 0x8de   :  { %6042 = vpow2.f32 %v3753_v10  ;;  %v3735_v55 = vsub.f32 0.0, %v3719_v26  ;;  %v7724_v63 = vadd.f32 %v7686_v49, %v3570_v19  ;;  %v7764_v10 = vsub.f32 %v3669_v46, %v7708_v45 }
 0x8df   :  { %v6033_v56 = vpop.eup %6032  ;;  %v3759_v3 = vmul.f32 1.442695, %v3736_v2  ;;  %v3722_v6 = vand.u32 2147483647, %v7721_v51  ;;  %v3671_v26 = vmax.f32 %v7716_v8, 0.0  ;;  %v7768_v2 = vsub.f32 %v3672_v35, %v7713_v22 }
 0x8e0   :  { %v6035_v42 = vpop.eup %6034  ;;  %v3778_v27 = vadd.f32 1.0, %v6033_v56  ;;  %v3757_v48 = vmul.f32 1.442695, %v3735_v55  ;;  %v5642_v33 = vpop.f32.mrb[90].mxu1  ;;  %v3721_v4 = vand.u32 2147483647, %v7724_v63 }
 0x8e1   :  { %v3777_v59 = vadd.f32 1.0, %v6035_v42  ;;  %6044 = vpow2.f32 %v3759_v3  ;;  %v3738_v1 = vsub.f32 0.0, %v3722_v6  ;;  %v3580_v29 = vpop.f32.mrb[91].mxu1  ;;  %v7731_v58 = vadd.f32 %v5642_v33, %v7686_v49 }
 0x8e2   :  { %6046 = vlog2.f32 %v3778_v27  ;;  %v7737_v50 = vadd.f32 %v7686_v49, %v3580_v29  ;;  %v3737_v25 = vsub.f32 0.0, %v3721_v4  ;;  %v3674_v28 = vmax.f32 %v7721_v51, 0.0 }
 0x8e3   :  { %v6037_v7 = vpop.eup %6036  ;;  %6048 = vlog2.f32 %v3777_v59  ;;  %v3763_v30 = vmul.f32 1.442695, %v3738_v1  ;;  %v3724_v21 = vand.u32 2147483647, %v7731_v58  ;;  %v3690_v23 = vmul.f32 0.0, %v7721_v51 }
 0x8e4   :  { %v6039_v52 = vpop.eup %6038  ;;  %v3780_v43 = vadd.f32 1.0, %v6037_v7  ;;  %6050 = vpow2.f32 %v3757_v48  ;;  %v5645_v36 = vpop.f32.mrb[92].mxu1  ;;  %v3761_v20 = vmul.f32 1.442695, %v3737_v25  ;;  %v3723_v54 = vand.u32 2147483647, %v7737_v50 }
 0x8e5   :  { %v3779_v5 = vadd.f32 1.0, %v6039_v52  ;;  %6052 = vpow2.f32 %v3763_v30  ;;  %v3590_v24 = vpop.f32.mrb[93].mxu1  ;;  %v3740_v11 = vsub.f32 0.0, %v3724_v21  ;;  %v7750_v14 = vadd.f32 %v5645_v36, %v7686_v49 }
 0x8e6   :  { %6054 = vlog2.f32 %v3780_v43  ;;  %v3739_v18 = vsub.f32 0.0, %v3723_v54  ;;  %v7755_v9 = vadd.f32 %v7686_v49, %v3590_v24  ;;  %v3673_v22 = vmax.f32 %v7724_v63, 0.0 }
 0x8e7   :  { %v6041_v44 = vpop.eup %6040  ;;  %6056 = vlog2.f32 %v3779_v5  ;;  %v3767_v37 = vmul.f32 1.442695, %v3740_v11  ;;  %v3726_v47 = vand.u32 2147483647, %v7750_v14  ;;  %v3689_v59 = vmul.f32 0.0, %v7724_v63 }
 0x8e8   :  { %v6043_v39 = vpop.eup %6042  ;;  %v3782_v16 = vadd.f32 1.0, %v6041_v44  ;;  %6058 = vpow2.f32 %v3761_v20  ;;  %v7752_v62 = vpop.f32.mrb[94].mxu1  ;;  %v3765_v19 = vmul.f32 1.442695, %v3739_v18  ;;  %v3725_v45 = vand.u32 2147483647, %v7755_v9 }
 0x8e9   :  { %v3781_v13 = vadd.f32 1.0, %v6043_v39  ;;  %v3600_v0 = vpop.f32.mrb[95].mxu1  ;;  %v3742_v27 = vsub.f32 0.0, %v3726_v47  ;;  %v7782_v4 = vsub.f32 %v3671_v26, %v7716_v8  ;;  %v7795_v32 = vsub.f32 %v3674_v28, %v3690_v23 }
 0x8ea   :  { %6060 = vlog2.f32 %v3782_v16  ;;  %v3741_v1 = vsub.f32 0.0, %v3725_v45  ;;  %v7797_v24 = vsub.f32 %v3673_v22, %v3689_v59  ;;  %v3676_v11 = vmax.f32 %v7731_v58, 0.0 }
 0x8eb   :  { %v6045_v17 = vpop.eup %6044  ;;  %6062 = vlog2.f32 %v3781_v13  ;;  %s7790_s10 = spop %5981  ;;  %v3771_v5 = vmul.f32 1.442695, %v3742_v27  ;;  %v3692_v35 = vmul.f32 0.0, %v7731_v58  ;;  %v3691_v45 = vmul.f32 0.0, %v7737_v50 }
 0x8ec   :  { %v6047_v38 = vpop.eup %6046  ;;  %v3784_v34 = vadd.f32 1.0, %v6045_v17  ;;  %v7771_v55 = vpop.f32.mrb[96].mxu1  ;;  %6064 = vpow2.f32 %v3767_v37  ;;  %v3769_v40 = vmul.f32 1.442695, %v3741_v1  ;;  %s2284_s11 = smul.f32 0.03125, %s7790_s10  ;;  %v7811_v17 = vadd.f32 %v7752_v62, %v7686_v49 }
 0x8ed   :  { %v6049_v56 = vpop.eup %6048  ;;  %v3796_v61 = vmul.f32 0.6931472, %v6047_v38  ;;  %v7775_v3 = vpop.f32.mrb[97].mxu1 }
 0x8ee   :  { %v6051_v6 = vpop.eup %6050  ;;  %v3794_v42 = vmul.f32 0.6931472, %v6049_v56  ;;  %6066 = vlog2.f32 %v3784_v34 }
 0x8ef   :  { %v6053_v57 = vpop.eup %6052  ;;  %v3826_v48 = vadd.f32 %v3796_v61, %v7734_v15  ;;  %v3783_v33 = vadd.f32 1.0, %v6051_v6  ;;  %6068 = vpow2.f32 %v3765_v19  ;;  %v7788_v15 = vadd.f32 %v7686_v49, %v3600_v0 }
 0x8f0   :  { %v6055_v51 = vpop.eup %6054  ;;  %v3825_v29 = vadd.f32 %v3794_v42, %v7740_v60  ;;  %v3786_v7 = vadd.f32 1.0, %v6053_v57  ;;  %v7784_v30 = vpop.f32.mrb[98].mxu1  ;;  %v2285_v19 = vstv %s2284_s11  ;;  %v3678_v6 = vmax.f32 %v7750_v14, 0.0 }
 0x8f1   :  { %v6057_v52 = vpop.eup %6056  ;;  %v3842_v43 = vsel %vm2259_vm5, %v3826_v48, 0.0  ;;  %v3800_v25 = vmul.f32 0.6931472, %v6055_v51  ;;  %6070 = vlog2.f32 %v3783_v33  ;;  %v7792_v63 = vpop.f32.mrb[99].mxu1  ;;  %v3727_v13 = vand.u32 2147483647, %v7788_v15 }
 0x8f2   :  { %v6059_v60 = vpop.eup %6058  ;;  %v3841_v8 = vsel %vm2259_vm5, %v3825_v29, 0.0  ;;  %v3798_v36 = vmul.f32 0.6931472, %v6057_v52  ;;  %6072 = vlog2.f32 %v3786_v7  ;;  %2287 = vst.msk [vmem:[#allocation3] sm:$0x1] %vm2286_vm0, %v2285_v19  ;;  %v3693_v33 = vmul.f32 0.0, %v7755_v9 }
 0x8f3   :  { %v3843_v21 = vadd.f32 %v3842_v43, %v3841_v8  ;;  %v3785_v53 = vadd.f32 1.0, %v6059_v60  ;;  %v3828_v44 = vadd.f32 %v3800_v25, %v3700_v31  ;;  %v3675_v31 = vmax.f32 %v7737_v50, 0.0 }
 0x8f4   :  { %v6061_v20 = vpop.eup %6060  ;;  %v3827_v46 = vadd.f32 %v3798_v36, %v3699_v12  ;;  %v7801_v54 = vpop.f32.mrb[100].mxu1  ;;  %v3743_v26 = vsub.f32 0.0, %v3727_v13  ;;  %v3728_v50 = vand.u32 2147483647, %v7811_v17  ;;  %v4210_v51 = vand.u32 2147483647, %v7771_v55 }
 0x8f5   :  { %v6063_v39 = vpop.eup %6062  ;;  %v3804_v16 = vmul.f32 0.6931472, %v6061_v20  ;;  %6074 = vlog2.f32 %v3785_v53  ;;  %v7805_v37 = vpop.f32.mrb[101].mxu1  ;;  %v3846_v58 = vsel %vm2259_vm5, %v3828_v44, 0.0  ;;  %v7833_v52 = vsub.f32 %v3676_v11, %v3692_v35 }
 0x8f6   :  { %v3844_v18 = vsel %vm2259_vm5, %v3827_v46, 0.0  ;;  %v3802_v0 = vmul.f32 0.6931472, %v6063_v39  ;;  %6076 = vpow2.f32 %v3771_v5  ;;  %v6065_v12 = vpop.eup %6064  ;;  %v3773_v22 = vmul.f32 1.442695, %v3743_v26 }
 0x8f7   :  { %v3845_v47 = vadd.f32 %v3844_v18, %v3843_v21  ;;  %6078 = vpow2.f32 %v3769_v40  ;;  %v3830_v34 = vadd.f32 %v3804_v16, %v7761_v41  ;;  %v3694_v41 = vmul.f32 0.0, %v7750_v14 }
 0x8f8   :  { %v6067_v38 = vpop.eup %6066  ;;  %v3829_v28 = vadd.f32 %v3802_v0, %v7764_v10  ;;  %v7816_v56 = vpop.f32.mrb[102].mxu1  ;;  %v3677_v10 = vmax.f32 %v7755_v9, 0.0  ;;  %v3788_v48 = vadd.f32 1.0, %v6065_v12  ;;  %6080 = vpow2.f32 %v3773_v22 }
 0x8f9   :  { %v3847_v61 = vadd.f32 %v3846_v58, %v3845_v47  ;;  %v3808_v23 = vmul.f32 0.6931472, %v6067_v38  ;;  %v7820_v42 = vpop.f32.mrb[103].mxu1  ;;  %v6069_v49 = vpop.eup %6068  ;;  %v3850_v59 = vsel %vm2259_vm5, %v3830_v34, 0.0  ;;  %v7838_v8 = vsub.f32 %v3675_v31, %v3691_v45 }
 0x8fa   :  { %v3848_v62 = vsel %vm2259_vm5, %v3829_v28, 0.0  ;;  %v3787_v43 = vadd.f32 1.0, %v6069_v49  ;;  %v7840_v36 = vsub.f32 %v3678_v6, %v3694_v41  ;;  %v4218_v5 = vsub.f32 0.0, %v4210_v51 }
 0x8fb   :  { %v6071_v27 = vpop.eup %6070  ;;  %v3849_v57 = vadd.f32 %v3848_v62, %v3847_v61  ;;  %v3832_v14 = vadd.f32 %v3808_v23, %v7768_v2  ;;  %v7842_v53 = vsub.f32 %v3677_v10, %v3693_v33  ;;  %v3744_v40 = vsub.f32 0.0, %v3728_v50 }
 0x8fc   :  { %v3806_v1 = vmul.f32 0.6931472, %v6071_v27  ;;  %v7830_v29 = vpop.f32.mrb[104].mxu1  ;;  %v6073_v60 = vpop.eup %6072  ;;  %v4209_v2 = vand.u32 2147483647, %v7775_v3  ;;  %6082 = vlog2.f32 %v3788_v48  ;;  %v3679_v61 = vmax.f32 %v7788_v15, 0.0 }
 0x8fd   :  { %v3851_v7 = vadd.f32 %v3850_v59, %v3849_v57  ;;  %v7835_v25 = vpop.f32.mrb[105].mxu1  ;;  %v4212_v20 = vand.u32 2147483647, %v7784_v30  ;;  %v4227_v39 = vmul.f32 1.442695, %v4218_v5  ;;  %v3854_v35 = vsel %vm2259_vm5, %v3832_v14, 0.0 }
 0x8fe   :  { %v3831_v9 = vadd.f32 %v3806_v1, %v7782_v4  ;;  %6084 = vlog2.f32 %v3787_v43  ;;  %v4217_v18 = vsub.f32 0.0, %v4209_v2  ;;  %v3812_v31 = vmul.f32 0.6931472, %v6073_v60 }
 0x8ff   :  { %v6075_v21 = vpop.eup %6074  ;;  %6086 = vpow2.f32 %v4227_v39  ;;  %v4220_v47 = vsub.f32 0.0, %v4212_v20  ;;  %v3775_v38 = vmul.f32 1.442695, %v3744_v40  ;;  %v4211_v34 = vand.u32 2147483647, %v7792_v63 }
 0x900   :  { %v6077_v44 = vpop.eup %6076  ;;  %v3852_v46 = vsel %vm2259_vm5, %v3831_v9, 0.0  ;;  %v3810_v11 = vmul.f32 0.6931472, %v6075_v21  ;;  %v7847_v4 = vpop.f32.mrb[106].mxu1  ;;  %v4225_v58 = vmul.f32 1.442695, %v4217_v18  ;;  %v3834_v41 = vadd.f32 %v3812_v31, %v7795_v32 }
 0x901   :  { %v6079_v16 = vpop.eup %6078  ;;  %v3853_v13 = vadd.f32 %v3852_v46, %v3851_v7  ;;  %v7850_v0 = vpop.f32.mrb[107].mxu1  ;;  %v4231_v23 = vmul.f32 1.442695, %v4220_v47  ;;  %v3790_v6 = vadd.f32 1.0, %v6077_v44  ;;  %v3695_v49 = vmul.f32 0.0, %v7788_v15 }
 0x902   :  { %v3833_v12 = vadd.f32 %v3810_v11, %v7797_v24  ;;  %v3789_v19 = vadd.f32 1.0, %v6079_v16  ;;  %6088 = vpow2.f32 %v4225_v58  ;;  %v6081_v62 = vpop.eup %6080  ;;  %v4194_v10 = vsub.f32 0.0, %v7771_v55 }
 0x903   :  { %v3855_v26 = vadd.f32 %v3854_v35, %v3853_v13  ;;  %6090 = vpow2.f32 %v4231_v23  ;;  %v4219_v22 = vsub.f32 0.0, %v4211_v34  ;;  %v4193_v57 = vsub.f32 0.0, %v7775_v3 }
 0x904   :  { %v3856_v28 = vsel %vm2259_vm5, %v3833_v12, 0.0  ;;  %v7859_v24 = vpop.f32.mrb[108].mxu1  ;;  %6092 = vpow2.f32 %v3775_v38  ;;  %v4196_v48 = vsub.f32 0.0, %v7784_v30  ;;  %v4214_v33 = vand.u32 2147483647, %v7801_v54 }
 0x905   :  { %v7856_v45 = vadd.f32 %v3856_v28, %v3855_v26  ;;  %v7863_v27 = vpop.f32.mrb[109].mxu1  ;;  %6094 = vlog2.f32 %v3789_v19  ;;  %v3791_v15 = vadd.f32 1.0, %v6081_v62  ;;  %v4229_v50 = vmul.f32 1.442695, %v4219_v22 }
 0x906   :  { %v4213_v59 = vand.u32 2147483647, %v7805_v37  ;;  %6096 = vlog2.f32 %v3790_v6  ;;  %v7869_v32 = vsub.f32 %v3679_v61, %v3695_v49  ;;  %v4222_v55 = vsub.f32 0.0, %v4214_v33  ;;  %v6083_v14 = vpop.eup %6082 }
 0x907   :  { %v4216_v1 = vand.u32 2147483647, %v7816_v56  ;;  %v7875_v3 = vsel %vm2259_vm5, %v3834_v41, 0.0  ;;  %v7877_v30 = vmax.f32 %v4194_v10, 0.0  ;;  %6098 = vpow2.f32 %v4229_v50 }
 0x908   :  { %v7872_v51 = vpop.f32.mrb[110].mxu1  ;;  %v4221_v7 = vsub.f32 0.0, %v4213_v59  ;;  %v6085_v60 = vpop.eup %6084  ;;  %v7881_v9 = vmax.f32 %v4193_v57, 0.0  ;;  %v7883_v5 = vmax.f32 %v4196_v48, 0.0  ;;  %v4235_v21 = vmul.f32 1.442695, %v4222_v55 }
 0x909   :  { %v7879_v43 = vpop.f32.mrb[111].mxu1  ;;  %v4224_v40 = vsub.f32 0.0, %v4216_v1  ;;  %v6087_v2 = vpop.eup %6086  ;;  %6100 = vlog2.f32 %v3791_v15  ;;  %v4195_v20 = vsub.f32 0.0, %v7792_v63  ;;  %v4215_v46 = vand.u32 2147483647, %v7820_v42 }
 0x90a   :  { %v4233_v44 = vmul.f32 1.442695, %v4221_v7  ;;  %v3816_v11 = vmul.f32 0.6931472, %v6083_v14  ;;  %v4242_v39 = vadd.f32 1.0, %v6087_v2  ;;  %6102 = vpow2.f32 %v4235_v21 }
 0x90b   :  { %v4239_v16 = vmul.f32 1.442695, %v4224_v40  ;;  %v4198_v35 = vsub.f32 0.0, %v7801_v54  ;;  %v4223_v13 = vsub.f32 0.0, %v4215_v46  ;;  %v4309_v18 = vand.u32 2147483647, %v7830_v29 }
 0x90c   :  { %6104 = vpow2.f32 %v4233_v44  ;;  %v6089_v31 = vpop.eup %6088  ;;  %v3814_v12 = vmul.f32 0.6931472, %v6085_v60  ;;  %v4308_v47 = vand.u32 2147483647, %v7835_v25  ;;  %v4311_v63 = vand.u32 2147483647, %v7847_v4 }
 0x90d   :  { %6106 = vlog2.f32 %v4242_v39  ;;  %v6091_v26 = vpop.eup %6090  ;;  %v4241_v38 = vadd.f32 1.0, %v6089_v31  ;;  %v4237_v58 = vmul.f32 1.442695, %v4223_v13  ;;  %v4317_v34 = vsub.f32 0.0, %v4309_v18 }
 0x90e   :  { %6108 = vpow2.f32 %v4239_v16  ;;  %v6093_v28 = vpop.eup %6092  ;;  %v4244_v19 = vadd.f32 1.0, %v6091_v26  ;;  %v7891_v61 = vmax.f32 %v4195_v20, 0.0  ;;  %v4316_v23 = vsub.f32 0.0, %v4308_v47 }
 0x90f   :  { %v4319_v6 = vsub.f32 0.0, %v4311_v63  ;;  %v6095_v49 = vpop.eup %6094  ;;  %v3836_v62 = vadd.f32 %v3816_v11, %v7833_v52  ;;  %6110 = vlog2.f32 %v4241_v38  ;;  %v4326_v41 = vmul.f32 1.442695, %v4317_v34 }
 0x910   :  { %v4310_v10 = vand.u32 2147483647, %v7850_v0  ;;  %v6097_v22 = vpop.eup %6096  ;;  %v3835_v57 = vadd.f32 %v3814_v12, %v7838_v8  ;;  %6112 = vlog2.f32 %v4244_v19  ;;  %v4324_v48 = vmul.f32 1.442695, %v4316_v23 }
 0x911   :  { %v4313_v33 = vand.u32 2147483647, %v7859_v24  ;;  %v6099_v15 = vpop.eup %6098  ;;  %6114 = vpow2.f32 %v4237_v58  ;;  %v4330_v50 = vmul.f32 1.442695, %v4319_v6  ;;  %v4312_v55 = vand.u32 2147483647, %v7863_v27 }
 0x912   :  { %v4318_v59 = vsub.f32 0.0, %v4310_v10  ;;  %v3818_v1 = vmul.f32 0.6931472, %v6095_v49  ;;  %v4243_v14 = vadd.f32 1.0, %v6099_v15  ;;  %6116 = vpow2.f32 %v4326_v41 }
 0x913   :  { %v4321_v52 = vsub.f32 0.0, %v4313_v33  ;;  %v6101_v7 = vpop.eup %6100  ;;  %6118 = vpow2.f32 %v4324_v48  ;;  %v4320_v21 = vsub.f32 0.0, %v4312_v55  ;;  %v4315_v8 = vand.u32 2147483647, %v7872_v51 }
 0x914   :  { %v4328_v60 = vmul.f32 1.442695, %v4318_v59  ;;  %v6103_v40 = vpop.eup %6102  ;;  %v3860_v2 = vsel %vm2259_vm5, %v3835_v57, 0.0  ;;  %v7900_v20 = vadd.f32 1.0, %v6093_v28  ;;  %6120 = vlog2.f32 %v4243_v14 }
 0x915   :  { %v4314_v44 = vand.u32 2147483647, %v7879_v43  ;;  %v4246_v11 = vadd.f32 1.0, %v6103_v40  ;;  %6122 = vpow2.f32 %v4330_v50  ;;  %v4334_v39 = vmul.f32 1.442695, %v4321_v52 }
 0x916   :  { %v6105_v46 = vpop.eup %6104  ;;  %v4323_v16 = vsub.f32 0.0, %v4315_v8  ;;  %v3837_v18 = vadd.f32 %v3818_v1, %v7842_v53  ;;  %6124 = vpow2.f32 %v4328_v60  ;;  %v4332_v26 = vmul.f32 1.442695, %v4320_v21 }
 0x917   :  { %v6107_v13 = vpop.eup %6106  ;;  %v4245_v31 = vadd.f32 1.0, %v6105_v46  ;;  %v4322_v12 = vsub.f32 0.0, %v4314_v44  ;;  %6126 = vlog2.f32 %v4246_v11  ;;  %v3820_v38 = vmul.f32 0.6931472, %v6097_v22 }
 0x918   :  { %v6109_v47 = vpop.eup %6108  ;;  %v4252_v63 = vmul.f32 0.6931472, %v6107_v13  ;;  %v4338_v34 = vmul.f32 1.442695, %v4323_v16  ;;  %v3822_v28 = vmul.f32 0.6931472, %v6101_v7  ;;  %v3859_v53 = vadd.f32 %v7875_v3, %v7856_v45 }
 0x919   :  { %6128 = vlog2.f32 %v4245_v31  ;;  %v4248_v58 = vadd.f32 1.0, %v6109_v47  ;;  %v6111_v19 = vpop.eup %6110  ;;  %v4336_v6 = vmul.f32 1.442695, %v4322_v12  ;;  %v3838_v10 = vadd.f32 %v3820_v38, %v7840_v36 }
 0x91a   :  { %v4266_v23 = vadd.f32 %v4252_v63, %v7877_v30  ;;  %6130 = vpow2.f32 %v4334_v39  ;;  %v6113_v49 = vpop.eup %6112  ;;  %v4250_v41 = vmul.f32 0.6931472, %v6111_v19  ;;  %v3839_v57 = vadd.f32 %v3822_v28, %v7869_v32 }
 0x91b   :  { %6132 = vlog2.f32 %v4248_v58  ;;  %v6115_v22 = vpop.eup %6114  ;;  %v4256_v48 = vmul.f32 0.6931472, %v6113_v49  ;;  %v3861_v33 = vadd.f32 %v3860_v2, %v3859_v53  ;;  %v3862_v15 = vsel %vm2259_vm5, %v3836_v62, 0.0 }
 0x91c   :  { %6134 = vpow2.f32 %v4332_v26  ;;  %v6117_v50 = vpop.eup %6116  ;;  %v4274_v30 = vsel %vm2259_vm5, %v4266_v23, 0.0  ;;  %v4265_v59 = vadd.f32 %v4250_v41, %v7881_v9  ;;  %v4247_v55 = vadd.f32 1.0, %v6115_v22 }
 0x91d   :  { %6136 = vpow2.f32 %v4338_v34  ;;  %v6119_v45 = vpop.eup %6118  ;;  %v4341_v3 = vadd.f32 1.0, %v6117_v50  ;;  %v3863_v1 = vadd.f32 %v3862_v15, %v3861_v33  ;;  %v3864_v36 = vsel %vm2259_vm5, %v3837_v18, 0.0 }
 0x91e   :  { %6138 = vpow2.f32 %v4336_v6  ;;  %v6121_v32 = vpop.eup %6120  ;;  %v4273_v14 = vsel %vm2259_vm5, %v4265_v59, 0.0  ;;  %v4197_v52 = vsub.f32 0.0, %v7805_v37  ;;  %v4340_v62 = vadd.f32 1.0, %v6119_v45 }
 0x91f   :  { %6140 = vlog2.f32 %v4247_v55  ;;  %v6123_v7 = vpop.eup %6122  ;;  %v4275_v60 = vadd.f32 %v4274_v30, %v4273_v14  ;;  %v4268_v21 = vadd.f32 %v4256_v48, %v7883_v5  ;;  %v4254_v9 = vmul.f32 0.6931472, %v6121_v32 }
 0x920   :  { %6142 = vlog2.f32 %v4341_v3  ;;  %v6125_v8 = vpop.eup %6124  ;;  %v4343_v40 = vadd.f32 1.0, %v6123_v7  ;;  %v3865_v2 = vadd.f32 %v3864_v36, %v3863_v1  ;;  %v3866_v44 = vsel %vm2259_vm5, %v3838_v10, 0.0 }
 0x921   :  { %6144 = vlog2.f32 %v4340_v62  ;;  %v6127_v46 = vpop.eup %6126  ;;  %v4267_v11 = vadd.f32 %v4254_v9, %v7891_v61  ;;  %v4342_v39 = vadd.f32 1.0, %v6125_v8  ;;  %v3868_v37 = vsel %vm2259_vm5, %v3839_v57, 0.0 }
 0x922   :  { %6146 = vlog2.f32 %v7900_v20  ;;  %v4206_v5 = vmax.f32 %v4198_v35, 0.0  ;;  %v4260_v13 = vmul.f32 0.6931472, %v6127_v46  ;;  %v3867_v18 = vadd.f32 %v3866_v44, %v3865_v2 }
 0x923   :  { %v6129_v16 = vpop.eup %6128  ;;  %6148 = vlog2.f32 %v4343_v40  ;;  %v4276_v12 = vsel %vm2259_vm5, %v4267_v11, 0.0  ;;  %v4205_v47 = vmax.f32 %v4197_v52, 0.0  ;;  %v4200_v38 = vsub.f32 0.0, %v7816_v56 }
 0x924   :  { %v6131_v31 = vpop.eup %6130  ;;  %v4258_v63 = vmul.f32 0.6931472, %v6129_v16  ;;  %6150 = vlog2.f32 %v4342_v39  ;;  %v4277_v61 = vadd.f32 %v4276_v12, %v4275_v60  ;;  %v3869_v58 = vadd.f32 %v3868_v37, %v3867_v18 }
 0x925   :  { %v6133_v26 = vpop.eup %6132  ;;  %v4345_v20 = vadd.f32 1.0, %v6131_v31  ;;  %v4278_v28 = vsel %vm2259_vm5, %v4268_v21, 0.0  ;;  %v4270_v54 = vadd.f32 %v4260_v13, %v4206_v5  ;;  %v4199_v19 = vsub.f32 0.0, %v7820_v42 }
 0x926   :  { %v6135_v34 = vpop.eup %6134  ;;  %v4269_v35 = vadd.f32 %v4258_v63, %v4205_v47  ;;  %v3680_v6 = vmax.f32 %v7811_v17, 0.0  ;;  %v4279_v53 = vadd.f32 %v4278_v28, %v4277_v61  ;;  %v3696_v10 = vmul.f32 0.0, %v7811_v17 }
 0x927   :  { %v6137_v23 = vpop.eup %6136  ;;  %6152 = vlog2.f32 %v4345_v20  ;;  %v4344_v49 = vadd.f32 1.0, %v6135_v34  ;;  %v4264_v57 = vmul.f32 0.6931472, %v6133_v26  ;;  %v4208_v15 = vmax.f32 %v4200_v38, 0.0 }
 0x928   :  { %v6139_v41 = vpop.eup %6138  ;;  %v4280_v56 = vsel %vm2259_vm5, %v4269_v35, 0.0  ;;  %v4347_v22 = vadd.f32 1.0, %v6137_v23  ;;  %v4282_v42 = vsel %vm2259_vm5, %v4270_v54, 0.0  ;;  %v4207_v59 = vmax.f32 %v4199_v19, 0.0 }
 0x929   :  { %v6141_v48 = vpop.eup %6140  ;;  %v4281_v33 = vadd.f32 %v4280_v56, %v4279_v53  ;;  %6154 = vlog2.f32 %v4344_v49  ;;  %v4346_v50 = vadd.f32 1.0, %v6139_v41  ;;  %v4301_v3 = vmax.f32 %v7830_v29, 0.0 }
 0x92a   :  { %v6143_v30 = vpop.eup %6142  ;;  %v4262_v55 = vmul.f32 0.6931472, %v6141_v48  ;;  %6156 = vlog2.f32 %v4347_v22  ;;  %v4272_v32 = vadd.f32 %v4264_v57, %v4208_v15  ;;  %v4300_v52 = vmax.f32 %v7835_v25, 0.0 }
 0x92b   :  { %v6145_v45 = vpop.eup %6144  ;;  %v4351_v1 = vmul.f32 0.6931472, %v6143_v30  ;;  %6158 = vlog2.f32 %v4346_v50  ;;  %v4283_v17 = vadd.f32 %v4282_v42, %v4281_v33  ;;  %v4303_v21 = vmax.f32 %v7847_v4, 0.0 }
 0x92c   :  { %v6147_v36 = vpop.eup %6146  ;;  %v4271_v14 = vadd.f32 %v4262_v55, %v4207_v59  ;;  %v4349_v62 = vmul.f32 0.6931472, %v6145_v45  ;;  %v3712_v9 = vsub.f32 %v3680_v6, %v3696_v10  ;;  %v4302_v29 = vmax.f32 %v7850_v0, 0.0 }
 0x92d   :  { %v6149_v7 = vpop.eup %6148  ;;  %v4365_v60 = vadd.f32 %v4351_v1, %v4301_v3  ;;  %v3824_v8 = vmul.f32 0.6931472, %v6147_v36  ;;  %v4286_v13 = vsel %vm2259_vm5, %v4272_v32, 0.0  ;;  %v4305_v38 = vmax.f32 %v7859_v24, 0.0 }
 0x92e   :  { %v6151_v40 = vpop.eup %6150  ;;  %v4364_v2 = vadd.f32 %v4349_v62, %v4300_v52  ;;  %v4355_v44 = vmul.f32 0.6931472, %v6149_v7  ;;  %v4284_v46 = vsel %vm2259_vm5, %v4271_v14, 0.0  ;;  %v4304_v28 = vmax.f32 %v7863_v27, 0.0 }
 0x92f   :  { %v4373_v11 = vsel %vm2259_vm5, %v4365_v60, 0.0  ;;  %v4353_v39 = vmul.f32 0.6931472, %v6151_v40  ;;  %v3840_v37 = vadd.f32 %v3824_v8, %v3712_v9  ;;  %v4285_v16 = vadd.f32 %v4284_v46, %v4283_v17 }
 0x930   :  { %v4372_v25 = vsel %vm2259_vm5, %v4364_v2, 0.0  ;;  %v4367_v5 = vadd.f32 %v4355_v44, %v4303_v21  ;;  %v4306_v6 = vmax.f32 %v7879_v43, 0.0  ;;  %v4307_v24 = vmax.f32 %v7872_v51, 0.0 }
 0x931   :  { %v6153_v4 = vpop.eup %6152  ;;  %v4374_v18 = vadd.f32 %v4373_v11, %v4372_v25  ;;  %v4366_v31 = vadd.f32 %v4353_v39, %v4302_v29  ;;  %v3870_v12 = vsel %vm2259_vm5, %v3840_v37, 0.0  ;;  %v4287_v47 = vadd.f32 %v4286_v13, %v4285_v16 }
 0x932   :  { %v4359_v63 = vmul.f32 0.6931472, %v6153_v4  ;;  %v3871_v0 = vadd.f32 %v3870_v12, %v3869_v58  ;;  %v4377_v19 = vsel %vm2259_vm5, %v4367_v5, 0.0 }
 0x933   :  { %v6155_v26 = vpop.eup %6154  ;;  %v4375_v61 = vsel %vm2259_vm5, %v4366_v31, 0.0  ;;  %4288 = vadd.xlane.f32.xlu0 %v4287_v47 }
 0x934   :  { %v6157_v20 = vpop.eup %6156  ;;  %v4376_v34 = vadd.f32 %v4375_v61, %v4374_v18  ;;  %v4357_v54 = vmul.f32 0.6931472, %v6155_v26  ;;  %3872 = vadd.xlane.f32.xlu1 %v3871_v0  ;;  %v4369_v23 = vadd.f32 %v4359_v63, %v4305_v38 }
 0x935   :  { %v6159_v35 = vpop.eup %6158  ;;  %v4363_v49 = vmul.f32 0.6931472, %v6157_v20 }
 0x936   :  { %v4368_v53 = vadd.f32 %v4357_v54, %v4304_v28  ;;  %v4378_v58 = vadd.f32 %v4377_v19, %v4376_v34  ;;  %v4361_v41 = vmul.f32 0.6931472, %v6159_v35  ;;  %v4381_v27 = vsel %vm2259_vm5, %v4369_v23, 0.0 }
 0x937   :  { %v4371_v22 = vadd.f32 %v4363_v49, %v4307_v24 }
 0x938   :  { %v4379_v10 = vsel %vm2259_vm5, %v4368_v53, 0.0  ;;  %v4370_v56 = vadd.f32 %v4361_v41, %v4306_v6 }
 0x939   :  { %v4380_v57 = vadd.f32 %v4379_v10, %v4378_v58  ;;  %v4385_v50 = vsel %vm2259_vm5, %v4371_v22, 0.0 }
 0x93a   :  { %v4383_v48 = vsel %vm2259_vm5, %v4370_v56, 0.0 }
 0x93b   :  { %v4382_v33 = vadd.f32 %v4381_v27, %v4380_v57 }
 0x93d   :  { %v4384_v15 = vadd.f32 %v4383_v48, %v4382_v33 }
 0x93f   :  { %v4386_v43 = vadd.f32 %v4385_v50, %v4384_v15 }
 0x941   :  { %4387 = vadd.xlane.f32.xlu1 %v4386_v43 }
 0x942   :  { %6187 = shalt.err (!%p6184_p4)
}
 0x943   :  { %s6188_s14 = scalar_lea.hbm %s8006_s19, 16 }
 0x944   :  { %p6189_p5 = scmp.ne.s32.totalorder %s8006_s19, %s6188_s14  ;;  %p6192_p6 = scmp.lt.u32.totalorder %s6188_s14, %s8006_s19 }
 0x946   :  { %p6194_p7 = pnand %p6192_p6, %p6189_p5 }
 0x948   :  { %6197 = shalt.err (!%p6194_p7)
}
 0x949   :  { %4411 = dma.vmem_to_hbm [thread:$0]  %s4409_s4, 16, %s8006_s19, [#allocation4]  }
 0x94a   :  { %s6249_s19 = smov [#allocation5]  }
 0x94b   :  { %s4418_s25 = sshll.u32 %s6249_s19, 4  ;;  %s4419_s25 = int_to_ptr.vmem [resolvable:$true] %s4418_s25 }
 0x94c   :  { %s6198_s27 = scalar_lea.vmem %s4419_s25, 16  ;;  %s6202_s9 = scalar_lea.vmem %s4419_s25, 32 }
 0x94d   :  { %p6199_p8 = scmp.ne.s32.totalorder %s4419_s25, %s6198_s27  ;;  %p6203_p9 = scmp.lt.s32.totalorder %s4419_s25, %s4419_s25 }
 0x94e   :  { %p6204_p10 = scmp.lt.s32.totalorder %s6202_s9, %s6198_s27 }
 0x950   :  { %p6205_p11 = por %p6204_p10, %p6203_p9 }
 0x952   :  { %p6206_p12 = pnand %p6205_p11, %p6199_p8 }
 0x9c0   :  { %v4289_v51 = vpop.xlane.xlu0 %4288 }
 0x9c1   :  { %v3873_v30 = vpop.xlane.xlu1 %3872  ;;  %v4290_v42 = vrot.slane %v4289_v51, 4 }
 0x9c2   :  { %v3874_v59 = vrot.slane %v3873_v30, 4 }
 0x9c3   :  { %v4291_v55 = vadd.f32 %v4290_v42, %v4289_v51 }
 0x9c4   :  { %v3875_v45 = vadd.f32 %v3874_v59, %v3873_v30 }
 0x9c5   :  { %v4292_v3 = vrot.slane %v4291_v55, 2 }
 0x9c6   :  { %v3876_v1 = vrot.slane %v3875_v45, 2 }
 0x9c7   :  { %v4293_v17 = vadd.f32 %v4292_v3, %v4291_v55 }
 0x9c8   :  { %v3877_v36 = vadd.f32 %v3876_v1, %v3875_v45 }
 0x9c9   :  { %v4294_v32 = vrot.slane %v4293_v17, 1 }
 0x9ca   :  { %v3878_v14 = vrot.slane %v3877_v36, 1 }
 0x9cb   :  { %v4295_v52 = vadd.f32 %v4294_v32, %v4293_v17 }
 0x9cc   :  { %v3879_v62 = vadd.f32 %v3878_v14, %v3877_v36 }
 0x9ce   :  { %5983 = vpush %v3879_v62  ;;  %v4388_v7 = vpop.xlane.xlu1 %4387 }
 0x9cf   :  { %5985 = vpush %v4295_v52  ;;  %v4389_v60 = vrot.slane %v4388_v7, 4 }
 0x9d1   :  { %v4390_v21 = vadd.f32 %v4389_v60, %v4388_v7 }
 0x9d3   :  { %v4391_v9 = vrot.slane %v4390_v21, 2 }
 0x9d5   :  { %v4392_v8 = vadd.f32 %v4391_v9, %v4390_v21 }
 0x9d7   :  { %v4393_v40 = vrot.slane %v4392_v8, 1 }
 0x9d9   :  { %v4394_v2 = vadd.f32 %v4393_v40, %v4392_v8 }
 0x9db   :  { %5987 = vpush %v4394_v2 }
 0x9ff   :  { %s5984_s26 = spop %5983 }
 0xa00   :  { %s3883_s18 = smul.f32 0.0078125, %s5984_s26 }
 0xa02   :  { %v3884_v44 = vstv %s3883_s18 }
 0xa03   :  { %3885 = vst.msk [vmem:[#allocation5] sm:$0x1] %vm2286_vm0, %v3884_v44 }
 0xa04   :  { %6209 = shalt.err (!%p6206_p12)
}
 0xa05   :  { %s6210_s8 = scalar_lea.hbm %s8007_s20, 16 }
 0xa06   :  { %p6211_p13 = scmp.ne.s32.totalorder %s8007_s20, %s6210_s8  ;;  %p6214_p0 = scmp.lt.u32.totalorder %s6210_s8, %s8007_s20 }
 0xa08   :  { %p6216_p1 = pnand %p6214_p0, %p6211_p13 }
 0xa0a   :  { %6219 = shalt.err (!%p6216_p1)
}
 0xa0b   :  { %4421 = dma.vmem_to_hbm [thread:$0]  %s4419_s25, 16, %s8007_s20, [#allocation6]  }
 0xa0c   :  { %s5986_s11 = spop %5985  ;;  %s6250_s5 = smov [#allocation7]  }
 0xa0d   :  { %s4299_s0 = smul.f32 0.015625, %s5986_s11  ;;  %s5988_s4 = spop %5987 }
 0xa0e   :  { %s4398_s30 = smul.f32 0.015625, %s5988_s4  ;;  %s4428_s6 = sshll.u32 %s6250_s5, 4  ;;  %s4429_s6 = int_to_ptr.vmem [resolvable:$true] %s4428_s6 }
 0xa0f   :  { %s6220_s14 = scalar_lea.vmem %s4429_s6, 16  ;;  %s6224_s23 = scalar_lea.vmem %s4429_s6, 32 }
 0xa10   :  { %s4399_s7 = sadd.f32 %s4398_s30, %s4299_s0  ;;  %p6221_p2 = scmp.ne.s32.totalorder %s4429_s6, %s6220_s14 }
 0xa11   :  { %p6225_p3 = scmp.lt.s32.totalorder %s4429_s6, %s4429_s6  ;;  %p6226_p4 = scmp.lt.s32.totalorder %s6224_s23, %s6220_s14 }
 0xa12   :  { %v4400_v29 = vstv %s4399_s7 }
 0xa13   :  { %4401 = vst.msk [vmem:[#allocation7] sm:$0x1] %vm2286_vm0, %v4400_v29  ;;  %p6227_p5 = por %p6226_p4, %p6225_p3 }
 0xa15   :  { %p6228_p6 = pnand %p6227_p5, %p6221_p2 }
 0xa17   :  { %6231 = shalt.err (!%p6228_p6)
}
 0xa18   :  { %s6232_s1 = scalar_lea.hbm %s8008_s21, 16 }
 0xa19   :  { %p6233_p7 = scmp.ne.s32.totalorder %s8008_s21, %s6232_s1  ;;  %p6236_p8 = scmp.lt.u32.totalorder %s6232_s1, %s8008_s21 }
 0xa1b   :  { %p6238_p9 = pnand %p6236_p8, %p6233_p7 }
 0xa1d   :  { %6241 = shalt.err (!%p6238_p9)
}
 0xa1e   :  { %4431 = dma.vmem_to_hbm [thread:$0]  %s4429_s6, 16, %s8008_s21, [#allocation6]  }
 0xa1f   :  { %6242 = dma.done.wait [#allocation4], 16  }
 0xa20   :  { %6243 = vsyncadd [#allocation4], 4294967280 }
 0xa21   :  { %6244 = dma.done.wait [#allocation6], 32  }
 0xa22   :  { %6245 = vsyncadd [#allocation6], 4294967264 }
 0xa23   :  { %4441 = vsyncpa [#allocation4], 1 }
 0xa24   :  { %4442 = vsyncpa [#allocation6], 1 }

</bundles_post_ra>
